<compile_context>
chip_gen: v5e
topology: v5e:2x2
jax: 0.10.0
libtpu: 0.0.40
codegen_flags: <defaults>
</compile_context>

<pallas_src>
import math
import functools

import jax
import jax.numpy as jnp
from jax import lax
from jax.experimental import pallas as pl
from jax.experimental.pallas import tpu as pltpu


@functools.lru_cache(maxsize=1)
def _vmem_limit_bytes():
    """Generation-aware scoped-VMEM limit: ~80% of physical VMEM, capped."""
    try:
        cap = int(pltpu.get_tpu_info().vmem_capacity_bytes)
        return int(max(32 * 1024 * 1024, min(0.8 * cap, 112 * 1024 * 1024)))
    except Exception:
        return 48 * 1024 * 1024


# ----------------------------------------------------------------------------
# Kernel 1: fused node projections  [q|k|v] (bf16), skip (f32) = x @ [Wq|Wk|Wv|Ws]+b
# ----------------------------------------------------------------------------
def _proj_kernel(x_ref, w_ref, b_ref, qkv_ref, skip_ref):
    full = (jnp.dot(x_ref[...], w_ref[...], preferred_element_type=jnp.float32)
            + b_ref[...])
    n_qkv = qkv_ref.shape[1]                      # 3 * HCP
    qkv_ref[...] = full[:, :n_qkv].astype(qkv_ref.dtype)
    skip_ref[...] = full[:, n_qkv:]


# ----------------------------------------------------------------------------
# Kernel 2a (pass 1): per-edge logits + exact per-node/per-head segment max
# ----------------------------------------------------------------------------
def _logits_segmax_kernel(qk_ref, ea_ref, we_ref, pool_ref, tgt_ref, src_ref,
                          lg_ref, m_ref, *, head_dim):
    e_tile = ea_ref.shape[0]
    n_pad = qk_ref.shape[0]
    hcp = qk_ref.shape[1] // 2
    hp = m_ref.shape[0]
    NEG = jnp.float32(-1e30)

    @pl.when(pl.program_id(0) == 0)
    def _init():
        m_ref[...] = jnp.full_like(m_ref, NEG)

    # In-kernel one-hots (never touch HBM).  bf16: exact for 0/1, MXU-native,
    # halves the footprint/traffic of the largest per-tile temporary.
    node_iota = lax.broadcasted_iota(jnp.int32, (e_tile, n_pad), 1)
    oh_tgt_b = tgt_ref[...] == node_iota                      # (E_t, N_pad) bool
    oh_tgt = oh_tgt_b.astype(jnp.bfloat16)
    oh_src = (src_ref[...] == node_iota).astype(jnp.bfloat16)

    # MXU one-hot gathers of q (by target) and k (by source)
    qt = jnp.dot(oh_tgt, qk_ref[:, :hcp], preferred_element_type=jnp.float32)
    ks = jnp.dot(oh_src, qk_ref[:, hcp:], preferred_element_type=jnp.float32)

    ef = jnp.dot(ea_ref[...], we_ref[...], preferred_element_type=jnp.float32)
    qk = qt * (ks + ef)                                       # (E_t, HCP) f32
    inv_sqrt = jnp.float32(1.0 / math.sqrt(head_dim))

    # per-edge per-head logits (head pooling on the MXU)
    lg = jnp.dot(qk, pool_ref[...], preferred_element_type=jnp.float32) * inv_sqrt
    # lane-dense transposed store for pass 2 (second tiny matmul avoids an XLU
    # transpose of the (E_t, HP) logits)
    lg_ref[...] = lax.dot_general(
        pool_ref[...], qk, (((0,), (1,)), ((), ())),
        preferred_element_type=jnp.float32) * inv_sqrt        # (HP, E_t)

    # masked segment max over this edge tile, merged into the running max
    # (pad heads mirror head 0 -> finite everywhere; their rows are never used)
    for h in range(hp):
        masked = jnp.where(oh_tgt_b, lg[:, h:h + 1], NEG)     # (E_t, N_pad)
        m_ref[h:h + 1, :] = jnp.maximum(
            m_ref[h:h + 1, :], jnp.max(masked, axis=0, keepdims=True))


# ----------------------------------------------------------------------------
# Kernel 2b (pass 2): exp + segment sum + scatter-add + final normalization
# ----------------------------------------------------------------------------
def _softmax_scatter_kernel(v_ref, m_ref, ea_ref, we_ref, expand_ref, lg_ref,
                            tgt_ref, src_ref, out_ref, l_ref):
    e_tile = ea_ref.shape[0]
    n_pad = v_ref.shape[0]
    step = pl.program_id(0)

    @pl.when(step == 0)
    def _init():
        out_ref[...] = jnp.zeros_like(out_ref)
        l_ref[...] = jnp.zeros_like(l_ref)

    node_iota = lax.broadcasted_iota(jnp.int32, (e_tile, n_pad), 1)
    # target one-hot kept f32: its matmul partners (m, p, msg) are f32 and a bf16
    # version would be silently up-converted; source one-hot is bf16 (partner bf16 v)
    oh_tgt = (tgt_ref[...] == node_iota).astype(jnp.float32)
    oh_src = (src_ref[...] == node_iota).astype(jnp.bfloat16)

    # gather the exact segment max for each edge's target:  (HP, E_t)
    m_e = lax.dot_general(m_ref[...], oh_tgt, (((1,), (1,)), ((), ())),
                          preferred_element_type=jnp.float32)
    p = jnp.exp(lg_ref[...] - m_e)                            # (HP, E_t), <= 1

    # segment sum of p into the running denominator (HP, N_pad)
    l_ref[...] = l_ref[...] + jnp.dot(p, oh_tgt,
                                      preferred_element_type=jnp.float32)

    # attention-weighted messages
    p_wide = lax.dot_general(p, expand_ref[...], (((0,), (0,)), ((), ())),
                             preferred_element_type=jnp.float32)      # (E_t, HCP)
    vs = jnp.dot(oh_src, v_ref[...], preferred_element_type=jnp.float32)
    ef = jnp.dot(ea_ref[...], we_ref[...], preferred_element_type=jnp.float32)
    msg = p_wide * (vs + ef)                                          # (E_t, HCP)

    # scatter-add into target rows
    out_ref[...] = out_ref[...] + lax.dot_general(
        oh_tgt, msg, (((0,), (0,)), ((), ())),
        preferred_element_type=jnp.float32)                           # (N_pad, HCP)

    @pl.when(step == pl.num_programs(0) - 1)
    def _finalize():
        l_wide = lax.dot_general(l_ref[...], expand_ref[...],
                                 (((0,), (0,)), ((), ())),
                                 preferred_element_type=jnp.float32)  # (N_pad, HCP)
        inv = pl.reciprocal(l_wide + jnp.float32(1e-16), approx=False)
        out_ref[...] = out_ref[...] * inv


# ----------------------------------------------------------------------------
# Wrapper
# ----------------------------------------------------------------------------
@functools.partial(jax.jit, static_argnames=("nhead", "node_tile", "edge_tile"))
def transformer_conv(x, edge_index, edge_attr, params, nhead,
                     node_tile=512, edge_tile=256):
    f32, bf16 = jnp.float32, jnp.bfloat16
    N, nin = x.shape
    E = edge_index.shape[1]
    HC = params["wq"].shape[1]
    C = HC // nhead
    HCP = ((HC + 127) // 128) * 128                 # lane-dense heads*channels
    HP = max(8, ((nhead + 7) // 8) * 8)             # padded head count

    N_pad = ((N + 1 + 127) // 128) * 128            # >= N+1 (pad node for pad edges)
    node_tile = math.gcd(int(min(node_tile, N_pad)), N_pad)
    assert node_tile % 16 == 0                      # bf16 sublane tiling of qkv blocks
    assert edge_tile % 128 == 0                     # lane-dense logits tiles
    E_pad = max(edge_tile, ((E + edge_tile - 1) // edge_tile) * edge_tile)
    vmem_limit = _vmem_limit_bytes()

    # ---- pad inputs ----------------------------------------------------------
    x_pad = jnp.zeros((N_pad, nin), f32).at[:N, :].set(x.astype(f32))
    ea_pad = jnp.zeros((E_pad, nin), f32).at[:E, :].set(edge_attr.astype(f32))
    src = edge_index[0].astype(jnp.int32)
    tgt = edge_index[1].astype(jnp.int32)
    src_col = jnp.zeros((E_pad,), jnp.int32).at[:E].set(src).reshape(E_pad, 1)
    tgt_col = jnp.full((E_pad,), N, jnp.int32).at[:E].set(tgt).reshape(E_pad, 1)

    # ---- pad / fuse weights --------------------------------------------------
    def padw(w):
        return jnp.zeros((nin, HCP), f32).at[:, :HC].set(w.astype(f32))

    def padb(b):
        return jnp.zeros((1, HCP), f32).at[:, :HC].set(
            jnp.reshape(b, (1, HC)).astype(f32))

    w_all = jnp.concatenate([padw(params["wq"]), padw(params["wk"]),
                             padw(params["wv"]), padw(params["ws"])], axis=1)
    b_all = jnp.concatenate([padb(params["bq"]), padb(params["bk"]),
                             padb(params["bv"]), padb(params["bs"])], axis=1)
    we_p = padw(params["we"])                       # lin_edge (bias=False)

    # ---- head pooling / expansion matrices (tiny, static) --------------------
    cols = jnp.arange(HCP)
    head_of_col = jnp.where(cols < HC, cols // C, -1)
    pool_cols, exp_rows = [], []
    for h in range(HP):
        hh = h if h < nhead else 0                  # pad heads mirror head 0
        pool_cols.append((head_of_col == hh).astype(f32))
        exp_rows.append((head_of_col == h).astype(f32) if h < nhead
                        else jnp.zeros((HCP,), f32))
    pool = jnp.stack(pool_cols, axis=1)             # (HCP, HP)
    expand = jnp.stack(exp_rows, axis=0)            # (HP, HCP)

    # ---- kernel 1: fused projections (node-tiled, parallel, pipelined) -------
    qkv, skip = pl.pallas_call(
        _proj_kernel,
        out_shape=(jax.ShapeDtypeStruct((N_pad, 3 * HCP), bf16),
                   jax.ShapeDtypeStruct((N_pad, HCP), f32)),
        grid=(N_pad // node_tile,),
        in_specs=[pl.BlockSpec((node_tile, nin), lambda i: (i, 0)),
                  pl.BlockSpec((nin, 4 * HCP), lambda i: (0, 0)),
                  pl.BlockSpec((1, 4 * HCP), lambda i: (0, 0))],
        out_specs=(pl.BlockSpec((node_tile, 3 * HCP), lambda i: (i, 0)),
                   pl.BlockSpec((node_tile, HCP), lambda i: (i, 0))),
        compiler_params=pltpu.CompilerParams(
            dimension_semantics=("parallel",), vmem_limit_bytes=vmem_limit),
    )(x_pad, w_all, b_all)

    # ---- kernel 2a: per-edge logits + exact segment max ----------------------
    lg, seg_max = pl.pallas_call(
        functools.partial(_logits_segmax_kernel, head_dim=C),
        out_shape=(jax.ShapeDtypeStruct((HP, E_pad), f32),
                   jax.ShapeDtypeStruct((HP, N_pad), f32)),
        grid=(E_pad // edge_tile,),
        in_specs=[pl.BlockSpec((N_pad, 2 * HCP), lambda e: (0, 0)),   # q|k slabs (bf16)
                  pl.BlockSpec((edge_tile, nin), lambda e: (e, 0)),   # edge_attr tile
                  pl.BlockSpec((nin, HCP), lambda e: (0, 0)),         # lin_edge W
                  pl.BlockSpec((HCP, HP), lambda e: (0, 0)),          # head pooling
                  pl.BlockSpec((edge_tile, 1), lambda e: (e, 0)),     # tgt ids
                  pl.BlockSpec((edge_tile, 1), lambda e: (e, 0))],    # src ids
        out_specs=(pl.BlockSpec((HP, edge_tile), lambda e: (0, e)),   # logits (lane-dense)
                   pl.BlockSpec((HP, N_pad), lambda e: (0, 0))),      # segment max (resident)
        compiler_params=pltpu.CompilerParams(
            dimension_semantics=("arbitrary",), vmem_limit_bytes=vmem_limit),
    )(qkv, ea_pad, we_p, pool, tgt_col, src_col)

    # ---- kernel 2b: exp + segment sum + scatter-add + normalize --------------
    out_msg = pl.pallas_call(
        _softmax_scatter_kernel,
        out_shape=jax.ShapeDtypeStruct((N_pad, HCP), f32),
        grid=(E_pad // edge_tile,),
        in_specs=[pl.BlockSpec((N_pad, HCP), lambda e: (0, 2)),       # v slab (bf16)
                  pl.BlockSpec((HP, N_pad), lambda e: (0, 0)),        # segment max
                  pl.BlockSpec((edge_tile, nin), lambda e: (e, 0)),   # edge_attr tile
                  pl.BlockSpec((nin, HCP), lambda e: (0, 0)),         # lin_edge W
                  pl.BlockSpec((HP, HCP), lambda e: (0, 0)),          # head expansion
                  pl.BlockSpec((HP, edge_tile), lambda e: (0, e)),    # logits tile
                  pl.BlockSpec((edge_tile, 1), lambda e: (e, 0)),     # tgt ids
                  pl.BlockSpec((edge_tile, 1), lambda e: (e, 0))],    # src ids
        out_specs=pl.BlockSpec((N_pad, HCP), lambda e: (0, 0)),
        scratch_shapes=[pltpu.VMEM((HP, N_pad), f32)],                # running denom
        compiler_params=pltpu.CompilerParams(
            dimension_semantics=("arbitrary",), vmem_limit_bytes=vmem_limit),
    )(qkv, seg_max, ea_pad, we_p, expand, lg, tgt_col, src_col)

    # skip connection added outside the edge reduction (never held resident)
    return out_msg[:N, :HC] + skip[:N, :HC]


# ----------------------------------------------------------------------------
# Parameters + pure-JAX reference (mirrors torch_geometric.nn.TransformerConv)
# ----------------------------------------------------------------------------
def init_params(key, nin, nout, nhead):
    assert nout % nhead == 0
    hc = nout
    ks = jax.random.split(key, 9)
    bound = 1.0 / math.sqrt(nin)

    def w(k):
        return jax.random.uniform(k, (nin, hc), jnp.float32, -bound, bound)

    def b(k):
        return jax.random.uniform(k, (1, hc), jnp.float32, -bound, bound)

    return dict(
        wq=w(ks[0]), bq=b(ks[1]),
        wk=w(ks[2]), bk=b(ks[3]),
        wv=w(ks[4]), bv=b(ks[5]),
        we=w(ks[6]),                 # lin_edge has bias=False
        ws=w(ks[7]), bs=b(ks[8]),    # lin_skip (root weight)
    )


def transformer_conv_ref(x, edge_index, edge_attr, params, nhead):
    N = x.shape[0]
    HC = params["wq"].shape[1]
    C = HC // nhead
    src, tgt = edge_index[0], edge_index[1]

    q = (x @ params["wq"] + params["bq"]).reshape(N, nhead, C)
    k = (x @ params["wk"] + params["bk"]).reshape(N, nhead, C)
    v = (x @ params["wv"] + params["bv"]).reshape(N, nhead, C)
    ef = (edge_attr @ params["we"]).reshape(-1, nhead, C)
    skip = x @ params["ws"] + params["bs"]

    qt, ks, vs = q[tgt], k[src], v[src]
    kk = ks + ef
    logits = (qt * kk).sum(-1) / math.sqrt(C)
    seg_max = jax.ops.segment_max(logits, tgt, num_segments=N)
    p = jnp.exp(logits - seg_max[tgt])
    denom = jax.ops.segment_sum(p, tgt, num_segments=N) + 1e-16
    alpha = p / denom[tgt]
    msg = (vs + ef) * alpha[:, :, None]
    out = jax.ops.segment_sum(msg.reshape(-1, HC), tgt, num_segments=N)
    return out + skip


if __name__ == "__main__":
    key = jax.random.PRNGKey(0)
    nin, nout, nhead = 16, 32, 4          # out_channels per head = 8
    N, E = 24, 200

    k1, k2, k3, k4, kp = jax.random.split(key, 5)
    x = jax.random.normal(k1, (N, nin), jnp.float32)
    src = jax.random.randint(k2, (E,), 0, N, dtype=jnp.int32)
    tgt = jax.random.randint(k3, (E,), 0, N, dtype=jnp.int32)
    edge_index = jnp.stack([src, tgt], axis=0)
    edge_attr = jax.random.normal(k4, (E, nin), jnp.float32)
    params = init_params(kp, nin, nout, nhead)

    # small tiles so the demo exercises both grid axes (2 node tiles, 2 edge tiles)
    out = transformer_conv(x, edge_index, edge_attr, params, nhead=nhead,
                           node_tile=64, edge_tile=128)
    out = jax.block_until_ready(out)

    ref = transformer_conv_ref(x, edge_index, edge_attr, params, nhead)
    assert out.shape == (N, nout)
    assert bool(jnp.all(jnp.isfinite(out)))
    # q/k/v are stored in bf16 (perf-review item); tolerance covers that rounding.
    max_err = float(jnp.max(jnp.abs(out - ref)))
    assert max_err < 1e-1, f"max abs err {max_err}"
    print("KERNEL_OK")
</pallas_src>

<mosaic_0001>
module attributes {stable_mosaic.version = 11 : i64} {
  func.func @_proj_kernel(%arg0: i32, %arg1: memref<64x16xf32, #tpu.memory_space<vmem>>, %arg2: memref<16x512xf32, #tpu.memory_space<vmem>>, %arg3: memref<1x512xf32, #tpu.memory_space<vmem>>, %arg4: memref<64x384xbf16, #tpu.memory_space<vmem>>, %arg5: memref<64x128xf32, #tpu.memory_space<vmem>>) attributes {dimension_semantics = [#tpu.dimension_semantics<parallel>], iteration_bounds = array<i64: 2>, scalar_prefetch = 0 : i64, scratch_operands = 0 : i64, tpu.core_type = #tpu.core_type<tc>, window_params = [{transform_indices = @transform_0, window_bounds = array<i64: 64, 16>}, {pipeline_mode = #tpu.pipeline_mode<synchronous>, transform_indices = @transform_1, window_bounds = array<i64: 16, 512>}, {pipeline_mode = #tpu.pipeline_mode<synchronous>, transform_indices = @transform_2, window_bounds = array<i64: 1, 512>}, {transform_indices = @transform_3, window_bounds = array<i64: 64, 384>}, {transform_indices = @transform_4, window_bounds = array<i64: 64, 128>}]} {
    %c0 = arith.constant 0 : index
    %c0_0 = arith.constant 0 : index
    %0 = vector.load %arg1[%c0, %c0_0] : memref<64x16xf32, #tpu.memory_space<vmem>>, vector<64x16xf32>
    %c0_1 = arith.constant 0 : index
    %c0_2 = arith.constant 0 : index
    %1 = vector.load %arg2[%c0_1, %c0_2] : memref<16x512xf32, #tpu.memory_space<vmem>>, vector<16x512xf32>
    %cst = arith.constant dense<0.000000e+00> : vector<64x512xf32>
    %2 = tpu.matmul %0, %1, %cst {dimension_numbers = #tpu.dot_dimension_numbers<[1], [0], [0], [1], [0, 0, 1, 1], [], []>} : vector<64x16xf32>, vector<16x512xf32>, vector<64x512xf32> -> vector<64x512xf32>
    %c0_3 = arith.constant 0 : index
    %c0_4 = arith.constant 0 : index
    %3 = vector.load %arg3[%c0_3, %c0_4] : memref<1x512xf32, #tpu.memory_space<vmem>>, vector<1x512xf32>
    %4 = vector.broadcast %3 : vector<1x512xf32> to vector<64x512xf32>
    %5 = arith.addf %2, %4 : vector<64x512xf32>
    %6 = vector.extract_strided_slice %5 {offsets = [0, 0], sizes = [64, 384], strides = [1, 1]} : vector<64x512xf32> to vector<64x384xf32>
    %7 = arith.truncf %6 : vector<64x384xf32> to vector<64x384xbf16>
    %c0_5 = arith.constant 0 : index
    %c0_6 = arith.constant 0 : index
    %8 = vector.load %arg4[%c0_5, %c0_6] : memref<64x384xbf16, #tpu.memory_space<vmem>>, vector<64x384xbf16>
    tpu.vector_store %arg4[%c0_5, %c0_6], %7 {strides = array<i32>} : memref<64x384xbf16, #tpu.memory_space<vmem>>, vector<64x384xbf16>,
    %9 = vector.extract_strided_slice %5 {offsets = [0, 384], sizes = [64, 128], strides = [1, 1]} : vector<64x512xf32> to vector<64x128xf32>
    %c0_7 = arith.constant 0 : index
    %c0_8 = arith.constant 0 : index
    %10 = vector.load %arg5[%c0_7, %c0_8] : memref<64x128xf32, #tpu.memory_space<vmem>>, vector<64x128xf32>
    tpu.vector_store %arg5[%c0_7, %c0_8], %9 {strides = array<i32>} : memref<64x128xf32, #tpu.memory_space<vmem>>, vector<64x128xf32>,
    return
  }
  func.func @transform_0(%arg0: i32) -> (i32, i32) {
    %c0_i32 = arith.constant 0 : i32
    %c0_i32_0 = arith.constant 0 : i32
    return %arg0, %c0_i32 : i32, i32
  }
  func.func @transform_1(%arg0: i32) -> (i32, i32) {
    %c0_i32 = arith.constant 0 : i32
    %c0_i32_0 = arith.constant 0 : i32
    %c0_i32_1 = arith.constant 0 : i32
    return %c0_i32, %c0_i32_0 : i32, i32
  }
  func.func @transform_2(%arg0: i32) -> (i32, i32) {
    %c0_i32 = arith.constant 0 : i32
    %c0_i32_0 = arith.constant 0 : i32
    %c0_i32_1 = arith.constant 0 : i32
    return %c0_i32, %c0_i32_0 : i32, i32
  }
  func.func @transform_3(%arg0: i32) -> (i32, i32) {
    %c0_i32 = arith.constant 0 : i32
    %c0_i32_0 = arith.constant 0 : i32
    return %arg0, %c0_i32 : i32, i32
  }
  func.func @transform_4(%arg0: i32) -> (i32, i32) {
    %c0_i32 = arith.constant 0 : i32
    %c0_i32_0 = arith.constant 0 : i32
    return %arg0, %c0_i32 : i32, i32
  }
}

module attributes {stable_mosaic.version = 11 : i64} {
  func.func @_logits_segmax_kernel(%arg0: i32, %arg1: memref<128x256xbf16, #tpu.memory_space<vmem>>, %arg2: memref<128x16xf32, #tpu.memory_space<vmem>>, %arg3: memref<16x128xf32, #tpu.memory_space<vmem>>, %arg4: memref<128x8xf32, #tpu.memory_space<vmem>>, %arg5: memref<128x1xi32, #tpu.memory_space<vmem>>, %arg6: memref<128x1xi32, #tpu.memory_space<vmem>>, %arg7: memref<8x128xf32, #tpu.memory_space<vmem>>, %arg8: memref<8x128xf32, #tpu.memory_space<vmem>>) attributes {dimension_semantics = [#tpu.dimension_semantics<arbitrary>], iteration_bounds = array<i64: 2>, scalar_prefetch = 0 : i64, scratch_operands = 0 : i64, tpu.core_type = #tpu.core_type<tc>, window_params = [{transform_indices = @transform_0, window_bounds = array<i64: 128, 256>}, {transform_indices = @transform_1, window_bounds = array<i64: 128, 16>}, {pipeline_mode = #tpu.pipeline_mode<synchronous>, transform_indices = @transform_2, window_bounds = array<i64: 16, 128>}, {pipeline_mode = #tpu.pipeline_mode<synchronous>, transform_indices = @transform_3, window_bounds = array<i64: 128, 8>}, {transform_indices = @transform_4, window_bounds = array<i64: 128, 1>}, {transform_indices = @transform_5, window_bounds = array<i64: 128, 1>}, {transform_indices = @transform_6, window_bounds = array<i64: 8, 128>}, {pipeline_mode = #tpu.pipeline_mode<synchronous>, transform_indices = @transform_7, window_bounds = array<i64: 8, 128>}]} {
    %c0_i32 = arith.constant 0 : i32
    %0 = arith.cmpi eq, %arg0, %c0_i32 : i32
    %1 = arith.extui %0 : i1 to i32
    %cst = arith.constant -1.000000e+30 : f32
    %c0_i32_0 = arith.constant 0 : i32
    %2 = arith.cmpi ne, %1, %c0_i32_0 : i32
    scf.if %2 {
      %114 = vector.broadcast %cst : f32 to vector<8x128xf32>
      %c0_65 = arith.constant 0 : index
      %c0_66 = arith.constant 0 : index
      %115 = vector.load %arg8[%c0_65, %c0_66] : memref<8x128xf32, #tpu.memory_space<vmem>>, vector<8x128xf32>
      tpu.vector_store %arg8[%c0_65, %c0_66], %114 {strides = array<i32>} : memref<8x128xf32, #tpu.memory_space<vmem>>, vector<8x128xf32>,
    } else {
    }
    %3 = tpu.iota {dimensions = array<i32: 1>} : vector<128x128xi32>
    %c0 = arith.constant 0 : index
    %c0_1 = arith.constant 0 : index
    %4 = vector.load %arg5[%c0, %c0_1] : memref<128x1xi32, #tpu.memory_space<vmem>>, vector<128x1xi32>
    %5 = vector.broadcast %4 : vector<128x1xi32> to vector<128x128xi32>
    %6 = arith.cmpi eq, %5, %3 : vector<128x128xi32>
    %7 = arith.extui %6 : vector<128x128xi1> to vector<128x128xi32>
    %8 = arith.sitofp %7 : vector<128x128xi32> to vector<128x128xf32>
    %9 = arith.truncf %8 : vector<128x128xf32> to vector<128x128xbf16>
    %c0_2 = arith.constant 0 : index
    %c0_3 = arith.constant 0 : index
    %10 = vector.load %arg6[%c0_2, %c0_3] : memref<128x1xi32, #tpu.memory_space<vmem>>, vector<128x1xi32>
    %11 = vector.broadcast %10 : vector<128x1xi32> to vector<128x128xi32>
    %12 = arith.cmpi eq, %11, %3 : vector<128x128xi32>
    %13 = arith.extui %12 : vector<128x128xi1> to vector<128x128xi32>
    %14 = arith.sitofp %13 : vector<128x128xi32> to vector<128x128xf32>
    %15 = arith.truncf %14 : vector<128x128xf32> to vector<128x128xbf16>
    %c0_4 = arith.constant 0 : index
    %c0_5 = arith.constant 0 : index
    %16 = vector.load %arg1[%c0_4, %c0_5] : memref<128x256xbf16, #tpu.memory_space<vmem>>, vector<128x128xbf16>
    %cst_6 = arith.constant dense<0.000000e+00> : vector<128x128xf32>
    %17 = tpu.matmul %9, %16, %cst_6 {dimension_numbers = #tpu.dot_dimension_numbers<[1], [0], [0], [1], [0, 0, 1, 1], [], []>} : vector<128x128xbf16>, vector<128x128xbf16>, vector<128x128xf32> -> vector<128x128xf32>
    %c0_7 = arith.constant 0 : index
    %c128 = arith.constant 128 : index
    %18 = vector.load %arg1[%c0_7, %c128] : memref<128x256xbf16, #tpu.memory_space<vmem>>, vector<128x128xbf16>
    %cst_8 = arith.constant dense<0.000000e+00> : vector<128x128xf32>
    %19 = tpu.matmul %15, %18, %cst_8 {dimension_numbers = #tpu.dot_dimension_numbers<[1], [0], [0], [1], [0, 0, 1, 1], [], []>} : vector<128x128xbf16>, vector<128x128xbf16>, vector<128x128xf32> -> vector<128x128xf32>
    %c0_9 = arith.constant 0 : index
    %c0_10 = arith.constant 0 : index
    %20 = vector.load %arg2[%c0_9, %c0_10] : memref<128x16xf32, #tpu.memory_space<vmem>>, vector<128x16xf32>
    %c0_11 = arith.constant 0 : index
    %c0_12 = arith.constant 0 : index
    %21 = vector.load %arg3[%c0_11, %c0_12] : memref<16x128xf32, #tpu.memory_space<vmem>>, vector<16x128xf32>
    %cst_13 = arith.constant dense<0.000000e+00> : vector<128x128xf32>
    %22 = tpu.matmul %20, %21, %cst_13 {dimension_numbers = #tpu.dot_dimension_numbers<[1], [0], [0], [1], [0, 0, 1, 1], [], []>} : vector<128x16xf32>, vector<16x128xf32>, vector<128x128xf32> -> vector<128x128xf32>
    %23 = arith.addf %19, %22 : vector<128x128xf32>
    %24 = arith.mulf %17, %23 : vector<128x128xf32>
    %c0_14 = arith.constant 0 : index
    %c0_15 = arith.constant 0 : index
    %25 = vector.load %arg4[%c0_14, %c0_15] : memref<128x8xf32, #tpu.memory_space<vmem>>, vector<128x8xf32>
    %cst_16 = arith.constant dense<0.000000e+00> : vector<128x8xf32>
    %26 = tpu.matmul %24, %25, %cst_16 {dimension_numbers = #tpu.dot_dimension_numbers<[1], [0], [0], [1], [0, 0, 1, 1], [], []>} : vector<128x128xf32>, vector<128x8xf32>, vector<128x8xf32> -> vector<128x8xf32>
    %cst_17 = arith.constant 0.353553385 : f32
    %27 = vector.broadcast %cst_17 : f32 to vector<128x8xf32>
    %28 = arith.mulf %26, %27 : vector<128x8xf32>
    %c0_18 = arith.constant 0 : index
    %c0_19 = arith.constant 0 : index
    %29 = vector.load %arg4[%c0_18, %c0_19] : memref<128x8xf32, #tpu.memory_space<vmem>>, vector<128x8xf32>
    %cst_20 = arith.constant dense<0.000000e+00> : vector<8x128xf32>
    %30 = tpu.matmul %29, %24, %cst_20 {dimension_numbers = #tpu.dot_dimension_numbers<[0], [1], [1], [0], [0, 1, 1, 0], [], []>} : vector<128x8xf32>, vector<128x128xf32>, vector<8x128xf32> -> vector<8x128xf32>
    %cst_21 = arith.constant 0.353553385 : f32
    %31 = vector.broadcast %cst_21 : f32 to vector<8x128xf32>
    %32 = arith.mulf %30, %31 : vector<8x128xf32>
    %c0_22 = arith.constant 0 : index
    %c0_23 = arith.constant 0 : index
    %33 = vector.load %arg7[%c0_22, %c0_23] : memref<8x128xf32, #tpu.memory_space<vmem>>, vector<8x128xf32>
    tpu.vector_store %arg7[%c0_22, %c0_23], %32 {strides = array<i32>} : memref<8x128xf32, #tpu.memory_space<vmem>>, vector<8x128xf32>,
    %34 = vector.extract_strided_slice %28 {offsets = [0, 0], sizes = [128, 1], strides = [1, 1]} : vector<128x8xf32> to vector<128x1xf32>
    %cst_24 = arith.constant -1.000000e+30 : f32
    %35 = vector.shape_cast %34 : vector<128x1xf32> to vector<128x1xf32>
    %36 = vector.broadcast %35 : vector<128x1xf32> to vector<128x128xf32>
    %37 = vector.broadcast %cst_24 : f32 to vector<128x128xf32>
    %38 = arith.select %6, %36, %37 : vector<128x128xi1>, vector<128x128xf32>
    %c0_25 = arith.constant 0 : index
    %c0_26 = arith.constant 0 : index
    %39 = vector.load %arg8[%c0_25, %c0_26] : memref<8x128xf32, #tpu.memory_space<vmem>>, vector<1x128xf32>
    %cst_27 = arith.constant dense<0xFF800000> : vector<128xf32>
    %40 = vector.multi_reduction <maximumf>, %38, %cst_27 [0] : vector<128x128xf32> to vector<128xf32>
    %41 = vector.shape_cast %40 : vector<128xf32> to vector<1x128xf32>
    %42 = arith.maximumf %39, %41 : vector<1x128xf32>
    %c0_28 = arith.constant 0 : index
    %c0_29 = arith.constant 0 : index
    %43 = vector.load %arg8[%c0_28, %c0_29] : memref<8x128xf32, #tpu.memory_space<vmem>>, vector<1x128xf32>
    tpu.vector_store %arg8[%c0_28, %c0_29], %42 {strides = array<i32>} : memref<8x128xf32, #tpu.memory_space<vmem>>, vector<1x128xf32>,
    %44 = vector.extract_strided_slice %28 {offsets = [0, 1], sizes = [128, 1], strides = [1, 1]} : vector<128x8xf32> to vector<128x1xf32>
    %cst_30 = arith.constant -1.000000e+30 : f32
    %45 = vector.shape_cast %44 : vector<128x1xf32> to vector<128x1xf32>
    %46 = vector.broadcast %45 : vector<128x1xf32> to vector<128x128xf32>
    %47 = vector.broadcast %cst_30 : f32 to vector<128x128xf32>
    %48 = arith.select %6, %46, %47 : vector<128x128xi1>, vector<128x128xf32>
    %c1 = arith.constant 1 : index
    %c0_31 = arith.constant 0 : index
    %49 = vector.load %arg8[%c1, %c0_31] : memref<8x128xf32, #tpu.memory_space<vmem>>, vector<1x128xf32>
    %cst_32 = arith.constant dense<0xFF800000> : vector<128xf32>
    %50 = vector.multi_reduction <maximumf>, %48, %cst_32 [0] : vector<128x128xf32> to vector<128xf32>
    %51 = vector.shape_cast %50 : vector<128xf32> to vector<1x128xf32>
    %52 = arith.maximumf %49, %51 : vector<1x128xf32>
    %c1_33 = arith.constant 1 : index
    %c0_34 = arith.constant 0 : index
    %53 = vector.load %arg8[%c1_33, %c0_34] : memref<8x128xf32, #tpu.memory_space<vmem>>, vector<1x128xf32>
    tpu.vector_store %arg8[%c1_33, %c0_34], %52 {strides = array<i32>} : memref<8x128xf32, #tpu.memory_space<vmem>>, vector<1x128xf32>,
    %54 = vector.extract_strided_slice %28 {offsets = [0, 2], sizes = [128, 1], strides = [1, 1]} : vector<128x8xf32> to vector<128x1xf32>
    %cst_35 = arith.constant -1.000000e+30 : f32
    %55 = vector.shape_cast %54 : vector<128x1xf32> to vector<128x1xf32>
    %56 = vector.broadcast %55 : vector<128x1xf32> to vector<128x128xf32>
    %57 = vector.broadcast %cst_35 : f32 to vector<128x128xf32>
    %58 = arith.select %6, %56, %57 : vector<128x128xi1>, vector<128x128xf32>
    %c2 = arith.constant 2 : index
    %c0_36 = arith.constant 0 : index
    %59 = vector.load %arg8[%c2, %c0_36] : memref<8x128xf32, #tpu.memory_space<vmem>>, vector<1x128xf32>
    %cst_37 = arith.constant dense<0xFF800000> : vector<128xf32>
    %60 = vector.multi_reduction <maximumf>, %58, %cst_37 [0] : vector<128x128xf32> to vector<128xf32>
    %61 = vector.shape_cast %60 : vector<128xf32> to vector<1x128xf32>
    %62 = arith.maximumf %59, %61 : vector<1x128xf32>
    %c2_38 = arith.constant 2 : index
    %c0_39 = arith.constant 0 : index
    %63 = vector.load %arg8[%c2_38, %c0_39] : memref<8x128xf32, #tpu.memory_space<vmem>>, vector<1x128xf32>
    tpu.vector_store %arg8[%c2_38, %c0_39], %62 {strides = array<i32>} : memref<8x128xf32, #tpu.memory_space<vmem>>, vector<1x128xf32>,
    %64 = vector.extract_strided_slice %28 {offsets = [0, 3], sizes = [128, 1], strides = [1, 1]} : vector<128x8xf32> to vector<128x1xf32>
    %cst_40 = arith.constant -1.000000e+30 : f32
    %65 = vector.shape_cast %64 : vector<128x1xf32> to vector<128x1xf32>
    %66 = vector.broadcast %65 : vector<128x1xf32> to vector<128x128xf32>
    %67 = vector.broadcast %cst_40 : f32 to vector<128x128xf32>
    %68 = arith.select %6, %66, %67 : vector<128x128xi1>, vector<128x128xf32>
    %c3 = arith.constant 3 : index
    %c0_41 = arith.constant 0 : index
    %69 = vector.load %arg8[%c3, %c0_41] : memref<8x128xf32, #tpu.memory_space<vmem>>, vector<1x128xf32>
    %cst_42 = arith.constant dense<0xFF800000> : vector<128xf32>
    %70 = vector.multi_reduction <maximumf>, %68, %cst_42 [0] : vector<128x128xf32> to vector<128xf32>
    %71 = vector.shape_cast %70 : vector<128xf32> to vector<1x128xf32>
    %72 = arith.maximumf %69, %71 : vector<1x128xf32>
    %c3_43 = arith.constant 3 : index
    %c0_44 = arith.constant 0 : index
    %73 = vector.load %arg8[%c3_43, %c0_44] : memref<8x128xf32, #tpu.memory_space<vmem>>, vector<1x128xf32>
    tpu.vector_store %arg8[%c3_43, %c0_44], %72 {strides = array<i32>} : memref<8x128xf32, #tpu.memory_space<vmem>>, vector<1x128xf32>,
    %74 = vector.extract_strided_slice %28 {offsets = [0, 4], sizes = [128, 1], strides = [1, 1]} : vector<128x8xf32> to vector<128x1xf32>
    %cst_45 = arith.constant -1.000000e+30 : f32
    %75 = vector.shape_cast %74 : vector<128x1xf32> to vector<128x1xf32>
    %76 = vector.broadcast %75 : vector<128x1xf32> to vector<128x128xf32>
    %77 = vector.broadcast %cst_45 : f32 to vector<128x128xf32>
    %78 = arith.select %6, %76, %77 : vector<128x128xi1>, vector<128x128xf32>
    %c4 = arith.constant 4 : index
    %c0_46 = arith.constant 0 : index
    %79 = vector.load %arg8[%c4, %c0_46] : memref<8x128xf32, #tpu.memory_space<vmem>>, vector<1x128xf32>
    %cst_47 = arith.constant dense<0xFF800000> : vector<128xf32>
    %80 = vector.multi_reduction <maximumf>, %78, %cst_47 [0] : vector<128x128xf32> to vector<128xf32>
    %81 = vector.shape_cast %80 : vector<128xf32> to vector<1x128xf32>
    %82 = arith.maximumf %79, %81 : vector<1x128xf32>
    %c4_48 = arith.constant 4 : index
    %c0_49 = arith.constant 0 : index
    %83 = vector.load %arg8[%c4_48, %c0_49] : memref<8x128xf32, #tpu.memory_space<vmem>>, vector<1x128xf32>
    tpu.vector_store %arg8[%c4_48, %c0_49], %82 {strides = array<i32>} : memref<8x128xf32, #tpu.memory_space<vmem>>, vector<1x128xf32>,
    %84 = vector.extract_strided_slice %28 {offsets = [0, 5], sizes = [128, 1], strides = [1, 1]} : vector<128x8xf32> to vector<128x1xf32>
    %cst_50 = arith.constant -1.000000e+30 : f32
    %85 = vector.shape_cast %84 : vector<128x1xf32> to vector<128x1xf32>
    %86 = vector.broadcast %85 : vector<128x1xf32> to vector<128x128xf32>
    %87 = vector.broadcast %cst_50 : f32 to vector<128x128xf32>
    %88 = arith.select %6, %86, %87 : vector<128x128xi1>, vector<128x128xf32>
    %c5 = arith.constant 5 : index
    %c0_51 = arith.constant 0 : index
    %89 = vector.load %arg8[%c5, %c0_51] : memref<8x128xf32, #tpu.memory_space<vmem>>, vector<1x128xf32>
    %cst_52 = arith.constant dense<0xFF800000> : vector<128xf32>
    %90 = vector.multi_reduction <maximumf>, %88, %cst_52 [0] : vector<128x128xf32> to vector<128xf32>
    %91 = vector.shape_cast %90 : vector<128xf32> to vector<1x128xf32>
    %92 = arith.maximumf %89, %91 : vector<1x128xf32>
    %c5_53 = arith.constant 5 : index
    %c0_54 = arith.constant 0 : index
    %93 = vector.load %arg8[%c5_53, %c0_54] : memref<8x128xf32, #tpu.memory_space<vmem>>, vector<1x128xf32>
    tpu.vector_store %arg8[%c5_53, %c0_54], %92 {strides = array<i32>} : memref<8x128xf32, #tpu.memory_space<vmem>>, vector<1x128xf32>,
    %94 = vector.extract_strided_slice %28 {offsets = [0, 6], sizes = [128, 1], strides = [1, 1]} : vector<128x8xf32> to vector<128x1xf32>
    %cst_55 = arith.constant -1.000000e+30 : f32
    %95 = vector.shape_cast %94 : vector<128x1xf32> to vector<128x1xf32>
    %96 = vector.broadcast %95 : vector<128x1xf32> to vector<128x128xf32>
    %97 = vector.broadcast %cst_55 : f32 to vector<128x128xf32>
    %98 = arith.select %6, %96, %97 : vector<128x128xi1>, vector<128x128xf32>
    %c6 = arith.constant 6 : index
    %c0_56 = arith.constant 0 : index
    %99 = vector.load %arg8[%c6, %c0_56] : memref<8x128xf32, #tpu.memory_space<vmem>>, vector<1x128xf32>
    %cst_57 = arith.constant dense<0xFF800000> : vector<128xf32>
    %100 = vector.multi_reduction <maximumf>, %98, %cst_57 [0] : vector<128x128xf32> to vector<128xf32>
    %101 = vector.shape_cast %100 : vector<128xf32> to vector<1x128xf32>
    %102 = arith.maximumf %99, %101 : vector<1x128xf32>
    %c6_58 = arith.constant 6 : index
    %c0_59 = arith.constant 0 : index
    %103 = vector.load %arg8[%c6_58, %c0_59] : memref<8x128xf32, #tpu.memory_space<vmem>>, vector<1x128xf32>
    tpu.vector_store %arg8[%c6_58, %c0_59], %102 {strides = array<i32>} : memref<8x128xf32, #tpu.memory_space<vmem>>, vector<1x128xf32>,
    %104 = vector.extract_strided_slice %28 {offsets = [0, 7], sizes = [128, 1], strides = [1, 1]} : vector<128x8xf32> to vector<128x1xf32>
    %cst_60 = arith.constant -1.000000e+30 : f32
    %105 = vector.shape_cast %104 : vector<128x1xf32> to vector<128x1xf32>
    %106 = vector.broadcast %105 : vector<128x1xf32> to vector<128x128xf32>
    %107 = vector.broadcast %cst_60 : f32 to vector<128x128xf32>
    %108 = arith.select %6, %106, %107 : vector<128x128xi1>, vector<128x128xf32>
    %c7 = arith.constant 7 : index
    %c0_61 = arith.constant 0 : index
    %109 = vector.load %arg8[%c7, %c0_61] : memref<8x128xf32, #tpu.memory_space<vmem>>, vector<1x128xf32>
    %cst_62 = arith.constant dense<0xFF800000> : vector<128xf32>
    %110 = vector.multi_reduction <maximumf>, %108, %cst_62 [0] : vector<128x128xf32> to vector<128xf32>
    %111 = vector.shape_cast %110 : vector<128xf32> to vector<1x128xf32>
    %112 = arith.maximumf %109, %111 : vector<1x128xf32>
    %c7_63 = arith.constant 7 : index
    %c0_64 = arith.constant 0 : index
    %113 = vector.load %arg8[%c7_63, %c0_64] : memref<8x128xf32, #tpu.memory_space<vmem>>, vector<1x128xf32>
    tpu.vector_store %arg8[%c7_63, %c0_64], %112 {strides = array<i32>} : memref<8x128xf32, #tpu.memory_space<vmem>>, vector<1x128xf32>,
    return
  }
  func.func @transform_0(%arg0: i32) -> (i32, i32) {
    %c0_i32 = arith.constant 0 : i32
    %c0_i32_0 = arith.constant 0 : i32
    %c0_i32_1 = arith.constant 0 : i32
    return %c0_i32, %c0_i32_0 : i32, i32
  }
  func.func @transform_1(%arg0: i32) -> (i32, i32) {
    %c0_i32 = arith.constant 0 : i32
    %c0_i32_0 = arith.constant 0 : i32
    return %arg0, %c0_i32 : i32, i32
  }
  func.func @transform_2(%arg0: i32) -> (i32, i32) {
    %c0_i32 = arith.constant 0 : i32
    %c0_i32_0 = arith.constant 0 : i32
    %c0_i32_1 = arith.constant 0 : i32
    return %c0_i32, %c0_i32_0 : i32, i32
  }
  func.func @transform_3(%arg0: i32) -> (i32, i32) {
    %c0_i32 = arith.constant 0 : i32
    %c0_i32_0 = arith.constant 0 : i32
    %c0_i32_1 = arith.constant 0 : i32
    return %c0_i32, %c0_i32_0 : i32, i32
  }
  func.func @transform_4(%arg0: i32) -> (i32, i32) {
    %c0_i32 = arith.constant 0 : i32
    %c0_i32_0 = arith.constant 0 : i32
    return %arg0, %c0_i32 : i32, i32
  }
  func.func @transform_5(%arg0: i32) -> (i32, i32) {
    %c0_i32 = arith.constant 0 : i32
    %c0_i32_0 = arith.constant 0 : i32
    return %arg0, %c0_i32 : i32, i32
  }
  func.func @transform_6(%arg0: i32) -> (i32, i32) {
    %c0_i32 = arith.constant 0 : i32
    %c0_i32_0 = arith.constant 0 : i32
    return %c0_i32, %arg0 : i32, i32
  }
  func.func @transform_7(%arg0: i32) -> (i32, i32) {
    %c0_i32 = arith.constant 0 : i32
    %c0_i32_0 = arith.constant 0 : i32
    %c0_i32_1 = arith.constant 0 : i32
    return %c0_i32, %c0_i32_0 : i32, i32
  }
}

module attributes {stable_mosaic.version = 11 : i64} {
  func.func @_softmax_scatter_kernel(%arg0: i32, %arg1: memref<128x128xbf16, #tpu.memory_space<vmem>>, %arg2: memref<8x128xf32, #tpu.memory_space<vmem>>, %arg3: memref<128x16xf32, #tpu.memory_space<vmem>>, %arg4: memref<16x128xf32, #tpu.memory_space<vmem>>, %arg5: memref<8x128xf32, #tpu.memory_space<vmem>>, %arg6: memref<8x128xf32, #tpu.memory_space<vmem>>, %arg7: memref<128x1xi32, #tpu.memory_space<vmem>>, %arg8: memref<128x1xi32, #tpu.memory_space<vmem>>, %arg9: memref<128x128xf32, #tpu.memory_space<vmem>>, %arg10: memref<8x128xf32, #tpu.memory_space<vmem>>) attributes {dimension_semantics = [#tpu.dimension_semantics<arbitrary>], iteration_bounds = array<i64: 2>, scalar_prefetch = 0 : i64, scratch_operands = 1 : i64, tpu.core_type = #tpu.core_type<tc>, window_params = [{transform_indices = @transform_0, window_bounds = array<i64: 128, 128>}, {pipeline_mode = #tpu.pipeline_mode<synchronous>, transform_indices = @transform_1, window_bounds = array<i64: 8, 128>}, {transform_indices = @transform_2, window_bounds = array<i64: 128, 16>}, {pipeline_mode = #tpu.pipeline_mode<synchronous>, transform_indices = @transform_3, window_bounds = array<i64: 16, 128>}, {pipeline_mode = #tpu.pipeline_mode<synchronous>, transform_indices = @transform_4, window_bounds = array<i64: 8, 128>}, {transform_indices = @transform_5, window_bounds = array<i64: 8, 128>}, {transform_indices = @transform_6, window_bounds = array<i64: 128, 1>}, {transform_indices = @transform_7, window_bounds = array<i64: 128, 1>}, {pipeline_mode = #tpu.pipeline_mode<synchronous>, transform_indices = @transform_8, window_bounds = array<i64: 128, 128>}]} {
    %c0_i32 = arith.constant 0 : i32
    %0 = arith.cmpi eq, %arg0, %c0_i32 : i32
    %1 = arith.extui %0 : i1 to i32
    %c0_i32_0 = arith.constant 0 : i32
    %2 = arith.cmpi ne, %1, %c0_i32_0 : i32
    scf.if %2 {
      %cst_30 = arith.constant 0.000000e+00 : f32
      %40 = vector.broadcast %cst_30 : f32 to vector<128x128xf32>
      %c0_31 = arith.constant 0 : index
      %c0_32 = arith.constant 0 : index
      %41 = vector.load %arg9[%c0_31, %c0_32] : memref<128x128xf32, #tpu.memory_space<vmem>>, vector<128x128xf32>
      tpu.vector_store %arg9[%c0_31, %c0_32], %40 {strides = array<i32>} : memref<128x128xf32, #tpu.memory_space<vmem>>, vector<128x128xf32>,
      %cst_33 = arith.constant 0.000000e+00 : f32
      %42 = vector.broadcast %cst_33 : f32 to vector<8x128xf32>
      %c0_34 = arith.constant 0 : index
      %c0_35 = arith.constant 0 : index
      %43 = vector.load %arg10[%c0_34, %c0_35] : memref<8x128xf32, #tpu.memory_space<vmem>>, vector<8x128xf32>
      tpu.vector_store %arg10[%c0_34, %c0_35], %42 {strides = array<i32>} : memref<8x128xf32, #tpu.memory_space<vmem>>, vector<8x128xf32>,
    } else {
    }
    %3 = tpu.iota {dimensions = array<i32: 1>} : vector<128x128xi32>
    %c0 = arith.constant 0 : index
    %c0_1 = arith.constant 0 : index
    %4 = vector.load %arg7[%c0, %c0_1] : memref<128x1xi32, #tpu.memory_space<vmem>>, vector<128x1xi32>
    %5 = vector.broadcast %4 : vector<128x1xi32> to vector<128x128xi32>
    %6 = arith.cmpi eq, %5, %3 : vector<128x128xi32>
    %7 = arith.extui %6 : vector<128x128xi1> to vector<128x128xi32>
    %8 = arith.sitofp %7 : vector<128x128xi32> to vector<128x128xf32>
    %c0_2 = arith.constant 0 : index
    %c0_3 = arith.constant 0 : index
    %9 = vector.load %arg8[%c0_2, %c0_3] : memref<128x1xi32, #tpu.memory_space<vmem>>, vector<128x1xi32>
    %10 = vector.broadcast %9 : vector<128x1xi32> to vector<128x128xi32>
    %11 = arith.cmpi eq, %10, %3 : vector<128x128xi32>
    %12 = arith.extui %11 : vector<128x128xi1> to vector<128x128xi32>
    %13 = arith.sitofp %12 : vector<128x128xi32> to vector<128x128xf32>
    %14 = arith.truncf %13 : vector<128x128xf32> to vector<128x128xbf16>
    %c0_4 = arith.constant 0 : index
    %c0_5 = arith.constant 0 : index
    %15 = vector.load %arg2[%c0_4, %c0_5] : memref<8x128xf32, #tpu.memory_space<vmem>>, vector<8x128xf32>
    %cst = arith.constant dense<0.000000e+00> : vector<8x128xf32>
    %16 = tpu.matmul %15, %8, %cst {dimension_numbers = #tpu.dot_dimension_numbers<[1], [1], [0], [0], [0, 0, 1, 0], [], []>} : vector<8x128xf32>, vector<128x128xf32>, vector<8x128xf32> -> vector<8x128xf32>
    %c0_6 = arith.constant 0 : index
    %c0_7 = arith.constant 0 : index
    %17 = vector.load %arg6[%c0_6, %c0_7] : memref<8x128xf32, #tpu.memory_space<vmem>>, vector<8x128xf32>
    %18 = arith.subf %17, %16 : vector<8x128xf32>
    %19 = math.exp %18 : vector<8x128xf32>
    %c0_8 = arith.constant 0 : index
    %c0_9 = arith.constant 0 : index
    %20 = vector.load %arg10[%c0_8, %c0_9] : memref<8x128xf32, #tpu.memory_space<vmem>>, vector<8x128xf32>
    %cst_10 = arith.constant dense<0.000000e+00> : vector<8x128xf32>
    %21 = tpu.matmul %19, %8, %cst_10 {dimension_numbers = #tpu.dot_dimension_numbers<[1], [0], [0], [1], [0, 0, 1, 1], [], []>} : vector<8x128xf32>, vector<128x128xf32>, vector<8x128xf32> -> vector<8x128xf32>
    %22 = arith.addf %20, %21 : vector<8x128xf32>
    %c0_11 = arith.constant 0 : index
    %c0_12 = arith.constant 0 : index
    %23 = vector.load %arg10[%c0_11, %c0_12] : memref<8x128xf32, #tpu.memory_space<vmem>>, vector<8x128xf32>
    tpu.vector_store %arg10[%c0_11, %c0_12], %22 {strides = array<i32>} : memref<8x128xf32, #tpu.memory_space<vmem>>, vector<8x128xf32>,
    %c0_13 = arith.constant 0 : index
    %c0_14 = arith.constant 0 : index
    %24 = vector.load %arg5[%c0_13, %c0_14] : memref<8x128xf32, #tpu.memory_space<vmem>>, vector<8x128xf32>
    %cst_15 = arith.constant dense<0.000000e+00> : vector<128x128xf32>
    %25 = tpu.matmul %19, %24, %cst_15 {dimension_numbers = #tpu.dot_dimension_numbers<[0], [0], [1], [1], [0, 1, 1, 1], [], []>} : vector<8x128xf32>, vector<8x128xf32>, vector<128x128xf32> -> vector<128x128xf32>
    %c0_16 = arith.constant 0 : index
    %c0_17 = arith.constant 0 : index
    %26 = vector.load %arg1[%c0_16, %c0_17] : memref<128x128xbf16, #tpu.memory_space<vmem>>, vector<128x128xbf16>
    %cst_18 = arith.constant dense<0.000000e+00> : vector<128x128xf32>
    %27 = tpu.matmul %14, %26, %cst_18 {dimension_numbers = #tpu.dot_dimension_numbers<[1], [0], [0], [1], [0, 0, 1, 1], [], []>} : vector<128x128xbf16>, vector<128x128xbf16>, vector<128x128xf32> -> vector<128x128xf32>
    %c0_19 = arith.constant 0 : index
    %c0_20 = arith.constant 0 : index
    %28 = vector.load %arg3[%c0_19, %c0_20] : memref<128x16xf32, #tpu.memory_space<vmem>>, vector<128x16xf32>
    %c0_21 = arith.constant 0 : index
    %c0_22 = arith.constant 0 : index
    %29 = vector.load %arg4[%c0_21, %c0_22] : memref<16x128xf32, #tpu.memory_space<vmem>>, vector<16x128xf32>
    %cst_23 = arith.constant dense<0.000000e+00> : vector<128x128xf32>
    %30 = tpu.matmul %28, %29, %cst_23 {dimension_numbers = #tpu.dot_dimension_numbers<[1], [0], [0], [1], [0, 0, 1, 1], [], []>} : vector<128x16xf32>, vector<16x128xf32>, vector<128x128xf32> -> vector<128x128xf32>
    %31 = arith.addf %27, %30 : vector<128x128xf32>
    %32 = arith.mulf %25, %31 : vector<128x128xf32>
    %c0_24 = arith.constant 0 : index
    %c0_25 = arith.constant 0 : index
    %33 = vector.load %arg9[%c0_24, %c0_25] : memref<128x128xf32, #tpu.memory_space<vmem>>, vector<128x128xf32>
    %cst_26 = arith.constant dense<0.000000e+00> : vector<128x128xf32>
    %34 = tpu.matmul %8, %32, %cst_26 {dimension_numbers = #tpu.dot_dimension_numbers<[0], [0], [1], [1], [0, 1, 1, 1], [], []>} : vector<128x128xf32>, vector<128x128xf32>, vector<128x128xf32> -> vector<128x128xf32>
    %35 = arith.addf %33, %34 : vector<128x128xf32>
    %c0_27 = arith.constant 0 : index
    %c0_28 = arith.constant 0 : index
    %36 = vector.load %arg9[%c0_27, %c0_28] : memref<128x128xf32, #tpu.memory_space<vmem>>, vector<128x128xf32>
    tpu.vector_store %arg9[%c0_27, %c0_28], %35 {strides = array<i32>} : memref<128x128xf32, #tpu.memory_space<vmem>>, vector<128x128xf32>,
    %c1_i32 = arith.constant 1 : i32
    %37 = arith.cmpi eq, %arg0, %c1_i32 : i32
    %38 = arith.extui %37 : i1 to i32
    %c0_i32_29 = arith.constant 0 : i32
    %39 = arith.cmpi ne, %38, %c0_i32_29 : i32
    scf.if %39 {
      %c0_30 = arith.constant 0 : index
      %c0_31 = arith.constant 0 : index
      %40 = vector.load %arg10[%c0_30, %c0_31] : memref<8x128xf32, #tpu.memory_space<vmem>>, vector<8x128xf32>
      %c0_32 = arith.constant 0 : index
      %c0_33 = arith.constant 0 : index
      %41 = vector.load %arg5[%c0_32, %c0_33] : memref<8x128xf32, #tpu.memory_space<vmem>>, vector<8x128xf32>
      %cst_34 = arith.constant dense<0.000000e+00> : vector<128x128xf32>
      %42 = tpu.matmul %40, %41, %cst_34 {dimension_numbers = #tpu.dot_dimension_numbers<[0], [0], [1], [1], [0, 1, 1, 1], [], []>} : vector<8x128xf32>, vector<8x128xf32>, vector<128x128xf32> -> vector<128x128xf32>
      %cst_35 = arith.constant 1.000000e-16 : f32
      %43 = vector.broadcast %cst_35 : f32 to vector<128x128xf32>
      %44 = arith.addf %42, %43 : vector<128x128xf32>
      %45 = tpu.reciprocal %44 : vector<128x128xf32> -> vector<128x128xf32>
      %c0_36 = arith.constant 0 : index
      %c0_37 = arith.constant 0 : index
      %46 = vector.load %arg9[%c0_36, %c0_37] : memref<128x128xf32, #tpu.memory_space<vmem>>, vector<128x128xf32>
      %47 = arith.mulf %46, %45 : vector<128x128xf32>
      %c0_38 = arith.constant 0 : index
      %c0_39 = arith.constant 0 : index
      %48 = vector.load %arg9[%c0_38, %c0_39] : memref<128x128xf32, #tpu.memory_space<vmem>>, vector<128x128xf32>
      tpu.vector_store %arg9[%c0_38, %c0_39], %47 {strides = array<i32>} : memref<128x128xf32, #tpu.memory_space<vmem>>, vector<128x128xf32>,
    } else {
    }
    return
  }
  func.func @transform_0(%arg0: i32) -> (i32, i32) {
    %c0_i32 = arith.constant 0 : i32
    %c2_i32 = arith.constant 2 : i32
    %c0_i32_0 = arith.constant 0 : i32
    return %c0_i32, %c2_i32 : i32, i32
  }
  func.func @transform_1(%arg0: i32) -> (i32, i32) {
    %c0_i32 = arith.constant 0 : i32
    %c0_i32_0 = arith.constant 0 : i32
    %c0_i32_1 = arith.constant 0 : i32
    return %c0_i32, %c0_i32_0 : i32, i32
  }
  func.func @transform_2(%arg0: i32) -> (i32, i32) {
    %c0_i32 = arith.constant 0 : i32
    %c0_i32_0 = arith.constant 0 : i32
    return %arg0, %c0_i32 : i32, i32
  }
  func.func @transform_3(%arg0: i32) -> (i32, i32) {
    %c0_i32 = arith.constant 0 : i32
    %c0_i32_0 = arith.constant 0 : i32
    %c0_i32_1 = arith.constant 0 : i32
    return %c0_i32, %c0_i32_0 : i32, i32
  }
  func.func @transform_4(%arg0: i32) -> (i32, i32) {
    %c0_i32 = arith.constant 0 : i32
    %c0_i32_0 = arith.constant 0 : i32
    %c0_i32_1 = arith.constant 0 : i32
    return %c0_i32, %c0_i32_0 : i32, i32
  }
  func.func @transform_5(%arg0: i32) -> (i32, i32) {
    %c0_i32 = arith.constant 0 : i32
    %c0_i32_0 = arith.constant 0 : i32
    return %c0_i32, %arg0 : i32, i32
  }
  func.func @transform_6(%arg0: i32) -> (i32, i32) {
    %c0_i32 = arith.constant 0 : i32
    %c0_i32_0 = arith.constant 0 : i32
    return %arg0, %c0_i32 : i32, i32
  }
  func.func @transform_7(%arg0: i32) -> (i32, i32) {
    %c0_i32 = arith.constant 0 : i32
    %c0_i32_0 = arith.constant 0 : i32
    return %arg0, %c0_i32 : i32, i32
  }
  func.func @transform_8(%arg0: i32) -> (i32, i32) {
    %c0_i32 = arith.constant 0 : i32
    %c0_i32_0 = arith.constant 0 : i32
    %c0_i32_1 = arith.constant 0 : i32
    return %c0_i32, %c0_i32_0 : i32, i32
  }
}

</mosaic_0001>

<bundles_post_ra>
// kernel: transformer_conv.3
= control target key start
LH: loop header
LB: loop body
LE: loop exit
PB: predicated region body
PF: predicated region fallthrough
CT: control target
= control target key end

     0   :  { %s651_s15 = smov 0   ;;  %s816_s0 = inlined_call_operand.vmem [shape: f32[128,16], index: 0, kind: input, shape index: {}]   ;;  %s817_s1 = inlined_call_operand.vmem [shape: f32[16,512], index: 1, kind: input, shape index: {}]   ;;  %s818_s2 = inlined_call_operand.vmem [shape: f32[1,512], index: 2, kind: input, shape index: {}]   ;;  %s819_s3 = inlined_call_operand.vmem [shape: bf16[128,384], index: 3, kind: output, shape index: {0}]   ;;  %s820_s4 = inlined_call_operand.vmem [shape: f32[128,128], index: 4, kind: output, shape index: {1}]  }
   0x1 LB: > { %s564_s16 = sadd.s32 4294967295, %s624_s15   ;;  %p568_p0 = scmp.ge.s32.totalorder %s624_s15, 1  ;;  %s624_s15 = sphi %s651_s15, %s15_s15  }
   0x2   : > { %p166_p1 = scmp.lt.s32.totalorder %s624_s15, 3 }
   0x4   : > { %p167_p2 = pnand %p568_p0, %p166_p1 }
   0x5   : > { %s569_s23 = sshll.u32 (!%p167_p2), %s564_s16, 3 }
   0x6   : > { %170 = sbr.rel (%p167_p2) target bundleno = 209 (0xd1), region = 32  ;;  %p199_p3 = scmp.lt.s32.totalorder (!%p167_p2), %s569_s23, 15 }
   0xb   : > { %v231_v0 = vld [vmem:[%s817_s1 + $0x30] sm:$0xff]  ;;  %v232_v2 = vld [vmem:[%s817_s1 + $0x38] sm:$0xff]  ;;  %v229_v4 = vld [vmem:[%s817_s1 + $0x20] sm:$0xff]  ;;  %s822_s23 = smov (!%p199_p3, %s569_s23), 15  ;;  %vm243_vm0 = vcmask 130048  }
   0xc   : > { %v227_v1 = vld [vmem:[%s817_s1 + $0x10] sm:$0xff]  ;;  %364 = vmatpush.msra.mxu2 %v231_v0  ;;  %405 = vmatpush.msra.mxu3 %v232_v2  ;;  %v228_v3 = vld [vmem:[%s817_s1 + $0x18] sm:$0xff]  ;;  %v230_v5 = vld [vmem:[%s817_s1 + $0x28] sm:$0xff]  ;;  %s570_s8 = sshll.u32 %s822_s23, 3  ;;  %s609_s14 = smul.u32 12, %s822_s23 }
   0xd   : > { %282 = vmatpush.msra.mxu0 %v229_v4  ;;  %323 = vmatpush.msra.mxu1 %v230_v5  ;;  %v225_v6 = vld [vmem:[%s817_s1] sm:$0xff]  ;;  %v226_v7 = vld [vmem:[%s817_s1 + $0x8] sm:$0xff]  ;;  %s691_s11 = scalar_lea.vmem %s816_s0, %s570_s8  ;;  %s758_s21 = scalar_lea.vmem %s820_s4, %s570_s8 }
   0xe   : > { %365 = vmatpush.msra.mxu2 %v227_v1  ;;  %406 = vmatpush.msra.mxu3 %v228_v3  ;;  %v217_v8 = vld [vmem:[%s691_s11] sm:$0xff]  ;;  %v218_v9 = vld [vmem:[%s691_s11 + $0x8] sm:$0xff]  ;;  %v219_v10 = vld [vmem:[%s691_s11 + $0x10] sm:$0xff]  ;;  %s746_s18 = scalar_lea.vmem %s819_s3, %s609_s14 }
   0xf   : > { %283 = vmatpush.msra.mxu0 %v225_v6  ;;  %324 = vmatpush.msra.mxu1 %v226_v7  ;;  %v220_v11 = vld [vmem:[%s691_s11 + $0x18] sm:$0xff]  ;;  %v221_v12 = vld [vmem:[%s691_s11 + $0x20] sm:$0xff]  ;;  %v222_v13 = vld [vmem:[%s691_s11 + $0x28] sm:$0xff] }
  0x10   : > { %591 = vmatmul.msk.f32.vlgmr.msra.gmra.mxu2 %vm243_vm0, %v217_v8  ;;  %599 = vmatmul.msk.f32.vlgmr.msra.gmra.mxu3 %vm243_vm0, %v217_v8  ;;  %v223_v14 = vld [vmem:[%s691_s11 + $0x30] sm:$0xff]  ;;  %v224_v15 = vld [vmem:[%s691_s11 + $0x38] sm:$0xff]  ;;  %v233_v16 = vld [vmem:[%s818_s2] sm:$0xf] }
  0x11   : > { %575 = vmatmul.msk.f32.vlgmr.msra.gmra.mxu0 %vm243_vm0, %v217_v8  ;;  %583 = vmatmul.msk.f32.vlgmr.msra.gmra.mxu1 %vm243_vm0, %v217_v8  ;;  %v736_v17 = vperm.slane %v233_v16, 0  ;;  %v738_v18 = vperm.slane %v233_v16, 1  ;;  %v748_v23 = vperm.slane %v233_v16, 2  ;;  %v750_v24 = vperm.slane %v233_v16, 3 }
  0x18   : > { %592 = vmatmul.msk.f32.gmra.mxu2 %vm243_vm0, %v218_v9  ;;  %600 = vmatmul.msk.f32.gmra.mxu3 %vm243_vm0, %v218_v9 }
  0x19   : > { %576 = vmatmul.msk.f32.gmra.mxu0 %vm243_vm0, %v218_v9  ;;  %584 = vmatmul.msk.f32.gmra.mxu1 %vm243_vm0, %v218_v9 }
  0x20   : > { %593 = vmatmul.msk.f32.gmra.mxu2 %vm243_vm0, %v219_v10  ;;  %601 = vmatmul.msk.f32.gmra.mxu3 %vm243_vm0, %v219_v10 }
  0x21   : > { %577 = vmatmul.msk.f32.gmra.mxu0 %vm243_vm0, %v219_v10  ;;  %585 = vmatmul.msk.f32.gmra.mxu1 %vm243_vm0, %v219_v10 }
  0x28   : > { %594 = vmatmul.msk.f32.gmra.mxu2 %vm243_vm0, %v220_v11  ;;  %602 = vmatmul.msk.f32.gmra.mxu3 %vm243_vm0, %v220_v11 }
  0x29   : > { %578 = vmatmul.msk.f32.gmra.mxu0 %vm243_vm0, %v220_v11  ;;  %586 = vmatmul.msk.f32.gmra.mxu1 %vm243_vm0, %v220_v11 }
  0x30   : > { %595 = vmatmul.msk.f32.gmra.mxu2 %vm243_vm0, %v221_v12  ;;  %603 = vmatmul.msk.f32.gmra.mxu3 %vm243_vm0, %v221_v12 }
  0x31   : > { %579 = vmatmul.msk.f32.gmra.mxu0 %vm243_vm0, %v221_v12  ;;  %587 = vmatmul.msk.f32.gmra.mxu1 %vm243_vm0, %v221_v12 }
  0x38   : > { %596 = vmatmul.msk.f32.gmra.mxu2 %vm243_vm0, %v222_v13  ;;  %604 = vmatmul.msk.f32.gmra.mxu3 %vm243_vm0, %v222_v13 }
  0x39   : > { %580 = vmatmul.msk.f32.gmra.mxu0 %vm243_vm0, %v222_v13  ;;  %588 = vmatmul.msk.f32.gmra.mxu1 %vm243_vm0, %v222_v13 }
  0x40   : > { %597 = vmatmul.msk.f32.gmra.mxu2 %vm243_vm0, %v223_v14  ;;  %605 = vmatmul.msk.f32.gmra.mxu3 %vm243_vm0, %v223_v14 }
  0x41   : > { %581 = vmatmul.msk.f32.gmra.mxu0 %vm243_vm0, %v223_v14  ;;  %589 = vmatmul.msk.f32.gmra.mxu1 %vm243_vm0, %v223_v14 }
  0x48   : > { %598 = vmatmul.msk.f32.gmra.mxu2 %vm243_vm0, %v224_v15  ;;  %606 = vmatmul.msk.f32.gmra.mxu3 %vm243_vm0, %v224_v15 }
  0x49   : > { %582 = vmatmul.msk.f32.gmra.mxu0 %vm243_vm0, %v224_v15  ;;  %590 = vmatmul.msk.f32.gmra.mxu1 %vm243_vm0, %v224_v15 }
  0x8e   : > { %v285_v19 = vpop.f32.mrf.mxu0  ;;  %v326_v20 = vpop.f32.mrf.mxu1 }
  0x8f   : > { %v286_v21 = vadd.f32 %v285_v19, %v736_v17  ;;  %v327_v22 = vadd.f32 %v326_v20, %v738_v18 }
  0x91   : > { %v432_v25 = vpack.c.bf16 %v327_v22, %v286_v21 }
  0x93   : > { %448 = vst [vmem:[%s746_s18] sm:$0xff] %v432_v25  ;;  %v367_v26 = vpop.f32.mrf.mxu2  ;;  %v408_v27 = vpop.f32.mrf.mxu3 }
  0x94   : > { %v368_v28 = vadd.f32 %v367_v26, %v748_v23  ;;  %v409_v29 = vadd.f32 %v408_v27, %v750_v24 }
  0x96   : > { %v433_v30 = vpack.c.bf16 %v368_v28, %v368_v28  ;;  %464 = vst [vmem:[%s758_s21] sm:$0xff] %v409_v29  ;;  %v288_v31 = vpop.f32.mrf.mxu0  ;;  %v329_v32 = vpop.f32.mrf.mxu1 }
  0x97   : > { %v289_v33 = vadd.f32 %v288_v31, %v736_v17  ;;  %v330_v34 = vadd.f32 %v329_v32, %v738_v18 }
  0x98   : > { %449 = vst [vmem:[%s746_s18 + $0x8] sm:$0xf] %v433_v30 }
  0x99   : > { %v434_v35 = vpack.c.bf16 %v330_v34, %v289_v33 }
  0x9b   : > { %450 = vst [vmem:[%s746_s18 + $0xc] sm:$0xff] %v434_v35  ;;  %v370_v36 = vpop.f32.mrf.mxu2  ;;  %v411_v37 = vpop.f32.mrf.mxu3 }
  0x9c   : > { %v371_v38 = vadd.f32 %v370_v36, %v748_v23  ;;  %v412_v39 = vadd.f32 %v411_v37, %v750_v24 }
  0x9e   : > { %v435_v40 = vpack.c.bf16 %v371_v38, %v371_v38  ;;  %465 = vst [vmem:[%s758_s21 + $0x8] sm:$0xff] %v412_v39  ;;  %v291_v41 = vpop.f32.mrf.mxu0  ;;  %v332_v42 = vpop.f32.mrf.mxu1 }
  0x9f   : > { %v292_v43 = vadd.f32 %v291_v41, %v736_v17  ;;  %v333_v44 = vadd.f32 %v332_v42, %v738_v18 }
  0xa0   : > { %451 = vst [vmem:[%s746_s18 + $0x14] sm:$0xf] %v435_v40 }
  0xa1   : > { %v436_v45 = vpack.c.bf16 %v333_v44, %v292_v43 }
  0xa3   : > { %452 = vst [vmem:[%s746_s18 + $0x18] sm:$0xff] %v436_v45  ;;  %v373_v46 = vpop.f32.mrf.mxu2  ;;  %v414_v47 = vpop.f32.mrf.mxu3 }
  0xa4   : > { %v374_v48 = vadd.f32 %v373_v46, %v748_v23  ;;  %v415_v49 = vadd.f32 %v414_v47, %v750_v24 }
  0xa6   : > { %v437_v50 = vpack.c.bf16 %v374_v48, %v374_v48  ;;  %466 = vst [vmem:[%s758_s21 + $0x10] sm:$0xff] %v415_v49  ;;  %v294_v51 = vpop.f32.mrf.mxu0  ;;  %v335_v52 = vpop.f32.mrf.mxu1 }
  0xa7   : > { %v295_v53 = vadd.f32 %v294_v51, %v736_v17  ;;  %v336_v54 = vadd.f32 %v335_v52, %v738_v18 }
  0xa8   : > { %453 = vst [vmem:[%s746_s18 + $0x20] sm:$0xf] %v437_v50 }
  0xa9   : > { %v438_v55 = vpack.c.bf16 %v336_v54, %v295_v53 }
  0xab   : > { %454 = vst [vmem:[%s746_s18 + $0x24] sm:$0xff] %v438_v55  ;;  %v376_v56 = vpop.f32.mrf.mxu2  ;;  %v417_v57 = vpop.f32.mrf.mxu3 }
  0xac   : > { %v377_v58 = vadd.f32 %v376_v56, %v748_v23  ;;  %v418_v59 = vadd.f32 %v417_v57, %v750_v24 }
  0xae   : > { %v439_v60 = vpack.c.bf16 %v377_v58, %v377_v58  ;;  %467 = vst [vmem:[%s758_s21 + $0x18] sm:$0xff] %v418_v59  ;;  %v297_v61 = vpop.f32.mrf.mxu0  ;;  %v338_v62 = vpop.f32.mrf.mxu1 }
  0xaf   : > { %v298_v63 = vadd.f32 %v297_v61, %v736_v17  ;;  %v339_v0 = vadd.f32 %v338_v62, %v738_v18 }
  0xb0   : > { %455 = vst [vmem:[%s746_s18 + $0x2c] sm:$0xf] %v439_v60 }
  0xb1   : > { %v440_v1 = vpack.c.bf16 %v339_v0, %v298_v63 }
  0xb3   : > { %456 = vst [vmem:[%s746_s18 + $0x30] sm:$0xff] %v440_v1  ;;  %v379_v2 = vpop.f32.mrf.mxu2  ;;  %v420_v3 = vpop.f32.mrf.mxu3 }
  0xb4   : > { %v380_v4 = vadd.f32 %v379_v2, %v748_v23  ;;  %v421_v5 = vadd.f32 %v420_v3, %v750_v24 }
  0xb6   : > { %v441_v6 = vpack.c.bf16 %v380_v4, %v380_v4  ;;  %468 = vst [vmem:[%s758_s21 + $0x20] sm:$0xff] %v421_v5  ;;  %v300_v7 = vpop.f32.mrf.mxu0  ;;  %v341_v8 = vpop.f32.mrf.mxu1 }
  0xb7   : > { %v301_v9 = vadd.f32 %v300_v7, %v736_v17  ;;  %v342_v10 = vadd.f32 %v341_v8, %v738_v18 }
  0xb8   : > { %457 = vst [vmem:[%s746_s18 + $0x38] sm:$0xf] %v441_v6 }
  0xb9   : > { %v442_v11 = vpack.c.bf16 %v342_v10, %v301_v9 }
  0xbb   : > { %458 = vst [vmem:[%s746_s18 + $0x3c] sm:$0xff] %v442_v11  ;;  %v382_v12 = vpop.f32.mrf.mxu2  ;;  %v423_v13 = vpop.f32.mrf.mxu3 }
  0xbc   : > { %v383_v14 = vadd.f32 %v382_v12, %v748_v23  ;;  %v424_v15 = vadd.f32 %v423_v13, %v750_v24 }
  0xbe   : > { %v443_v16 = vpack.c.bf16 %v383_v14, %v383_v14  ;;  %469 = vst [vmem:[%s758_s21 + $0x28] sm:$0xff] %v424_v15  ;;  %v303_v19 = vpop.f32.mrf.mxu0  ;;  %v344_v20 = vpop.f32.mrf.mxu1 }
  0xbf   : > { %v304_v21 = vadd.f32 %v303_v19, %v736_v17  ;;  %v345_v22 = vadd.f32 %v344_v20, %v738_v18 }
  0xc0   : > { %459 = vst [vmem:[%s746_s18 + $0x44] sm:$0xf] %v443_v16 }
  0xc1   : > { %v444_v25 = vpack.c.bf16 %v345_v22, %v304_v21 }
  0xc3   : > { %460 = vst [vmem:[%s746_s18 + $0x48] sm:$0xff] %v444_v25  ;;  %v385_v26 = vpop.f32.mrf.mxu2  ;;  %v426_v27 = vpop.f32.mrf.mxu3 }
  0xc4   : > { %v386_v28 = vadd.f32 %v385_v26, %v748_v23  ;;  %v427_v29 = vadd.f32 %v426_v27, %v750_v24 }
  0xc6   : > { %v445_v30 = vpack.c.bf16 %v386_v28, %v386_v28  ;;  %470 = vst [vmem:[%s758_s21 + $0x30] sm:$0xff] %v427_v29  ;;  %v306_v31 = vpop.f32.mrf.mxu0  ;;  %v347_v32 = vpop.f32.mrf.mxu1 }
  0xc7   : > { %v307_v33 = vadd.f32 %v306_v31, %v736_v17  ;;  %v348_v34 = vadd.f32 %v347_v32, %v738_v18 }
  0xc8   : > { %461 = vst [vmem:[%s746_s18 + $0x50] sm:$0xf] %v445_v30 }
  0xc9   : > { %v446_v35 = vpack.c.bf16 %v348_v34, %v307_v33 }
  0xcb   : > { %462 = vst [vmem:[%s746_s18 + $0x54] sm:$0xff] %v446_v35  ;;  %v388_v36 = vpop.f32.mrf.mxu2  ;;  %v429_v37 = vpop.f32.mrf.mxu3 }
  0xcc   : > { %v389_v38 = vadd.f32 %v388_v36, %v748_v23  ;;  %v430_v39 = vadd.f32 %v429_v37, %v750_v24 }
  0xce   : > { %v447_v40 = vpack.c.bf16 %v389_v38, %v389_v38  ;;  %471 = vst [vmem:[%s758_s21 + $0x38] sm:$0xff] %v430_v39 }
  0xd0   : > { %463 = vst [vmem:[%s746_s18 + $0x5c] sm:$0xf] %v447_v40 }
  0xd1 PF: > { %s15_s15 = sadd.s32 1, %s624_s15  }
  0xd2   : > { %p12_p4 = scmp.ge.s32.totalorder %s15_s15, 4  }
  0xd4   :  { %14 = sbr.rel (!%p12_p4) target bundleno = 1 (0x1), region = 74 }

// kernel: transformer_conv.5
= control target key start
LH: loop header
LB: loop body
LE: loop exit
PB: predicated region body
PF: predicated region fallthrough
CT: control target
= control target key end

     0   :  { %s2159_s27 = smov 0   ;;  %s2927_s0 = inlined_call_operand.vmem [shape: bf16[128,384], index: 0, kind: input, shape index: {}]   ;;  %s2928_s1 = inlined_call_operand.vmem [shape: f32[8,128], index: 1, kind: input, shape index: {}]   ;;  %s2929_s2 = inlined_call_operand.vmem [shape: f32[256,16], index: 2, kind: input, shape index: {}]   ;;  %s2930_s3 = inlined_call_operand.vmem [shape: f32[16,128], index: 3, kind: input, shape index: {}]   ;;  %s2931_s4 = inlined_call_operand.vmem [shape: f32[8,128], index: 4, kind: input, shape index: {}]   ;;  %s2932_s5 = inlined_call_operand.vmem [shape: f32[8,256], index: 5, kind: input, shape index: {}]   ;;  %s2933_s6 = inlined_call_operand.vmem [shape: s32[256,1], index: 6, kind: input, shape index: {}]   ;;  %s2934_s7 = inlined_call_operand.vmem [shape: s32[256,1], index: 7, kind: input, shape index: {}]   ;;  %s2935_s8 = inlined_call_operand.vmem [shape: f32[128,128], index: 8, kind: output, shape index: {}]  }
   0x1 LB: > { %s2165_s28 = sadd.s32 4294967295, %s2107_s27   ;;  %p1816_p0 = scmp.ge.s32.totalorder %s2107_s27, 1  ;;  %s2107_s27 = sphi %s2159_s27, %s18_s27  }
   0x2   : > { %p232_p1 = scmp.lt.s32.totalorder %s2107_s27, 3 }
   0x4   : > { %p2169_p2 = pnand %p1816_p0, %p232_p1 }
   0x5   : > { %p1817_p3 = scmp.ne.s32.totalorder (!%p2169_p2), %s2165_s28, 0 }
   0x6   : > { %236 = sbr.rel (%p2169_p2) target bundleno = 33 (0x21), region = 12 }
   0xb   : > { %240 = sbr.rel (%p1817_p3) target bundleno = 33 (0x21), region = 16 }
  0x10   : > { %v1818_v0 = vld [vmem:[%s2927_s0 + $0x8] sm:$0xf]  ;;  %v1819_v1 = vld [vmem:[%s2927_s0 + $0x14] sm:$0xf]  ;;  %v1820_v2 = vld [vmem:[%s2927_s0 + $0x20] sm:$0xf] }
  0x11   : > { %259 = vst [vmem:[#allocation3] sm:$0xf] %v1818_v0  ;;  %v1821_v3 = vld [vmem:[%s2927_s0 + $0x2c] sm:$0xf]  ;;  %v1822_v4 = vld [vmem:[%s2927_s0 + $0x38] sm:$0xf] }
  0x12   : > { %261 = vst [vmem:[#allocation3 + $0x4] sm:$0xf] %v1819_v1  ;;  %v1823_v5 = vld [vmem:[%s2927_s0 + $0x44] sm:$0xf]  ;;  %v1824_v6 = vld [vmem:[%s2927_s0 + $0x50] sm:$0xf] }
  0x13   : > { %263 = vst [vmem:[#allocation3 + $0x8] sm:$0xf] %v1820_v2  ;;  %v1825_v7 = vld [vmem:[%s2927_s0 + $0x5c] sm:$0xf]  ;;  %v1826_v8 = vld [vmem:[%s2927_s0 + $0x68] sm:$0xf] }
  0x14   : > { %265 = vst [vmem:[#allocation3 + $0xc] sm:$0xf] %v1821_v3  ;;  %v1827_v9 = vld [vmem:[%s2927_s0 + $0x74] sm:$0xf]  ;;  %v1828_v10 = vld [vmem:[%s2927_s0 + $0x80] sm:$0xf] }
  0x15   : > { %267 = vst [vmem:[#allocation3 + $0x10] sm:$0xf] %v1822_v4  ;;  %v1829_v11 = vld [vmem:[%s2927_s0 + $0x8c] sm:$0xf]  ;;  %v1830_v12 = vld [vmem:[%s2927_s0 + $0x98] sm:$0xf] }
  0x16   : > { %269 = vst [vmem:[#allocation3 + $0x14] sm:$0xf] %v1823_v5  ;;  %v1831_v13 = vld [vmem:[%s2927_s0 + $0xa4] sm:$0xf]  ;;  %v1832_v14 = vld [vmem:[%s2927_s0 + $0xb0] sm:$0xf] }
  0x17   : > { %271 = vst [vmem:[#allocation3 + $0x18] sm:$0xf] %v1824_v6  ;;  %v1833_v15 = vld [vmem:[%s2927_s0 + $0xbc] sm:$0xf] }
  0x18   : > { %273 = vst [vmem:[#allocation3 + $0x1c] sm:$0xf] %v1825_v7 }
  0x19   : > { %275 = vst [vmem:[#allocation3 + $0x20] sm:$0xf] %v1826_v8 }
  0x1a   : > { %277 = vst [vmem:[#allocation3 + $0x24] sm:$0xf] %v1827_v9 }
  0x1b   : > { %279 = vst [vmem:[#allocation3 + $0x28] sm:$0xf] %v1828_v10 }
  0x1c   : > { %281 = vst [vmem:[#allocation3 + $0x2c] sm:$0xf] %v1829_v11 }
  0x1d   : > { %283 = vst [vmem:[#allocation3 + $0x30] sm:$0xf] %v1830_v12 }
  0x1e   : > { %285 = vst [vmem:[#allocation3 + $0x34] sm:$0xf] %v1831_v13 }
  0x1f   : > { %287 = vst [vmem:[#allocation3 + $0x38] sm:$0xf] %v1832_v14 }
  0x20   : > { %289 = vst [vmem:[#allocation3 + $0x3c] sm:$0xf] %v1833_v15 }
  0x21 PF: > { %395 = sbr.rel (%p2169_p2) target bundleno = 1529 (0x5f9), region = 89  ;;  %s1836_s21 = sshll.u32 (!%p2169_p2), %s2165_s28, 4 }
  0x22   : > { %p443_p4 = scmp.lt.s32.totalorder (!%p2169_p2), %s2165_s28, 1  ;;  %p438_p5 = scmp.lt.s32.totalorder (!%p2169_p2), %s1836_s21, 31 }
  0x23   : > { %p1843_p6 = scmp.ne.s32.totalorder (!%p2169_p2), %s2165_s28, 0 }
  0x26   : > { %s444_s22 = scalar_select %p443_p4, %s2165_s28, 1 }
  0x27   : > { %s2938_s21 = smov (!%p438_p5, %s1836_s21), 31  ;;  %462 = sbr.rel (%p1843_p6) target bundleno = 62 (0x3e), region = 97 }
  0x28   : > { %s1838_s23 = sshll.u32 %s444_s22, 3  ;;  %s1837_s24 = sshll.u32 %s2938_s21, 3 }
  0x29   : > { %s2232_s30 = scalar_lea.vmem %s2932_s5, %s1838_s23  ;;  %s2237_s29 = scalar_lea.vmem %s2929_s2, %s1837_s24 }
  0x2a   : > { %s2242_s13 = scalar_lea.vmem %s2933_s6, %s1837_s24  ;;  %s2247_s16 = scalar_lea.vmem %s2934_s7, %s1837_s24 }
  0x2c   : > { %v2109_v16 = vmov 0.0  }
  0x2d   : > { %463 = vst [vmem:[%s2935_s8] sm:$0xff] %v2109_v16 }
  0x2e   : > { %464 = vst [vmem:[%s2935_s8 + $0x8] sm:$0xff] %v2109_v16 }
  0x2f   : > { %465 = vst [vmem:[%s2935_s8 + $0x10] sm:$0xff] %v2109_v16 }
  0x30   : > { %466 = vst [vmem:[%s2935_s8 + $0x18] sm:$0xff] %v2109_v16 }
  0x31   : > { %467 = vst [vmem:[%s2935_s8 + $0x20] sm:$0xff] %v2109_v16 }
  0x32   : > { %468 = vst [vmem:[%s2935_s8 + $0x28] sm:$0xff] %v2109_v16 }
  0x33   : > { %469 = vst [vmem:[%s2935_s8 + $0x30] sm:$0xff] %v2109_v16 }
  0x34   : > { %470 = vst [vmem:[%s2935_s8 + $0x38] sm:$0xff] %v2109_v16 }
  0x35   : > { %471 = vst [vmem:[%s2935_s8 + $0x40] sm:$0xff] %v2109_v16 }
  0x36   : > { %472 = vst [vmem:[%s2935_s8 + $0x48] sm:$0xff] %v2109_v16 }
  0x37   : > { %473 = vst [vmem:[%s2935_s8 + $0x50] sm:$0xff] %v2109_v16 }
  0x38   : > { %474 = vst [vmem:[%s2935_s8 + $0x58] sm:$0xff] %v2109_v16 }
  0x39   : > { %475 = vst [vmem:[%s2935_s8 + $0x60] sm:$0xff] %v2109_v16 }
  0x3a   : > { %476 = vst [vmem:[%s2935_s8 + $0x68] sm:$0xff] %v2109_v16 }
  0x3b   : > { %477 = vst [vmem:[%s2935_s8 + $0x70] sm:$0xff] %v2109_v16 }
  0x3c   : > { %478 = vst [vmem:[%s2935_s8 + $0x78] sm:$0xff] %v2109_v16 }
  0x3d   : > { %479 = vst [vmem:[#allocation2] sm:$0xff] %v2109_v16 }
  0x3e PF: > { %v497_v17 = vld [vmem:[%s2242_s13 + $0x78] sm:$0xff]  ;;  %v495_v18 = vld [vmem:[%s2242_s13 + $0x68] sm:$0xff]  ;;  %v2110_v20 = vmov 0   ;;  %v494_v21 = vld [vmem:[%s2242_s13 + $0x60] sm:$0xff]  ;;  %v480_v48 = vlaneseq  ;;  %v2111_v51 = vmov 0.0   ;;  %v2112_v2 = vmov 1.0  }
  0x3f   : > { %v493_v19 = vld [vmem:[%s2242_s13 + $0x58] sm:$0xff]  ;;  %2066 = vset.pattern.permute.xlu2 %v2110_v20  ;;  %2065 = vset.pattern.permute.xlu1 %v2110_v20  ;;  %v496_v22 = vld [vmem:[%s2242_s13 + $0x70] sm:$0xff]  ;;  %v490_v24 = vld [vmem:[%s2242_s13 + $0x40] sm:$0xff]  ;;  %p1988_p7 = scmp.ne.s32.totalorder %s2165_s28, 1 }
  0x40   : > { %2064 = vset.pattern.permute.xlu0 %v2110_v20  ;;  %538 = vperm.xlu1 %2065, %v495_v18   ;;  %v492_v23 = vld [vmem:[%s2242_s13 + $0x50] sm:$0xff]  ;;  %v491_v25 = vld [vmem:[%s2242_s13 + $0x48] sm:$0xff]  ;;  %v489_v26 = vld [vmem:[%s2242_s13 + $0x38] sm:$0xff]  ;;  %v2328_v49 = vand.u32 127, %v480_v48 }
  0x41   : > { %544 = vperm.xlu0 %2064, %v497_v17   ;;  %532 = vperm.xlu2 %2066, %v493_v19   ;;  %v487_v27 = vld [vmem:[%s2242_s13 + $0x28] sm:$0xff]  ;;  %v488_v28 = vld [vmem:[%s2242_s13 + $0x30] sm:$0xff]  ;;  %v486_v29 = vld [vmem:[%s2242_s13 + $0x20] sm:$0xff] }
  0x42   : > { %v484_v30 = vld [vmem:[%s2242_s13 + $0x10] sm:$0xff]  ;;  %v485_v31 = vld [vmem:[%s2242_s13 + $0x18] sm:$0xff]  ;;  %v483_v32 = vld [vmem:[%s2242_s13 + $0x8] sm:$0xff] }
  0x43   : > { %v594_v33 = vld [vmem:[%s2247_s16] sm:$0xff]  ;;  %v595_v34 = vld [vmem:[%s2247_s16 + $0x8] sm:$0xff]  ;;  %v597_v36 = vld [vmem:[%s2247_s16 + $0x18] sm:$0xff] }
  0x44   : > { %v482_v35 = vld [vmem:[%s2242_s13] sm:$0xff]  ;;  %v596_v37 = vld [vmem:[%s2247_s16 + $0x10] sm:$0xff]  ;;  %v599_v38 = vld [vmem:[%s2247_s16 + $0x28] sm:$0xff] }
  0x45   : > { %v598_v39 = vld [vmem:[%s2247_s16 + $0x20] sm:$0xff]  ;;  %v601_v40 = vld [vmem:[%s2247_s16 + $0x38] sm:$0xff]  ;;  %v600_v41 = vld [vmem:[%s2247_s16 + $0x30] sm:$0xff] }
  0x46   : > { %v603_v42 = vld [vmem:[%s2247_s16 + $0x48] sm:$0xff]  ;;  %v602_v43 = vld [vmem:[%s2247_s16 + $0x40] sm:$0xff]  ;;  %v605_v44 = vld [vmem:[%s2247_s16 + $0x58] sm:$0xff] }
  0x47   : > { %v604_v45 = vld [vmem:[%s2247_s16 + $0x50] sm:$0xff]  ;;  %v607_v47 = vld [vmem:[%s2247_s16 + $0x68] sm:$0xff]  ;;  %v2014_v53 = vld [vmem:[#allocation3 + $0x38] sm:$0xff] }
  0x48   : > { %535 = vperm.xlu1 %2065, %v494_v21   ;;  %v608_v46 = vld [vmem:[%s2247_s16 + $0x70] sm:$0xff]  ;;  %v609_v54 = vld [vmem:[%s2247_s16 + $0x78] sm:$0xff]  ;;  %1105 = vmatpush.bf16.msra.mxu1 %v2014_v53  ;;  %v2011_v59 = vld [vmem:[#allocation3 + $0x20] sm:$0xff] }
  0x49   : > { %541 = vperm.xlu0 %2064, %v496_v22   ;;  %529 = vperm.xlu2 %2066, %v492_v23   ;;  %v2013_v55 = vld [vmem:[#allocation3 + $0x30] sm:$0xff]  ;;  %v2012_v58 = vld [vmem:[#allocation3 + $0x28] sm:$0xff]  ;;  %v2010_v60 = vld [vmem:[#allocation3 + $0x18] sm:$0xff] }
  0x4a   : > { %v2009_v61 = vld [vmem:[#allocation3 + $0x10] sm:$0xff]  ;;  %v2008_v3 = vld [vmem:[#allocation3 + $0x8] sm:$0xff]  ;;  %v2007_v4 = vld [vmem:[#allocation3] sm:$0xff] }
  0x4b   : > { %v927_v53 = vld [vmem:[%s2237_s29 + $0x10] sm:$0xff] }
  0x4c   : > { %1106 = vmatpush.bf16.msra.mxu1 %v2013_v55  ;;  %v929_v55 = vld [vmem:[%s2237_s29 + $0x20] sm:$0xff] }
  0x50   : > { %523 = vperm.xlu1 %2065, %v490_v24   ;;  %1107 = vmatpush.bf16.msra.mxu1 %v2012_v58  ;;  %v2113_v24 = vmov 1.0|1.0   ;;  %v932_v58 = vld [vmem:[%s2237_s29 + $0x38] sm:$0xff] }
  0x51   : > { %526 = vperm.xlu0 %2064, %v491_v25   ;;  %520 = vperm.xlu2 %2066, %v489_v26  }
  0x54   : > { %1108 = vmatpush.bf16.msra.mxu1 %v2011_v59  ;;  %v933_v59 = vld [vmem:[%s2237_s29 + $0x40] sm:$0xff] }
  0x58   : > { %514 = vperm.xlu1 %2065, %v487_v27   ;;  %1109 = vmatpush.bf16.msra.mxu1 %v2010_v60  ;;  %v934_v60 = vld [vmem:[%s2237_s29 + $0x48] sm:$0xff] }
  0x59   : > { %517 = vperm.xlu0 %2064, %v488_v28   ;;  %511 = vperm.xlu2 %2066, %v486_v29  }
  0x5c   : > { %1110 = vmatpush.bf16.msra.mxu1 %v2009_v61  ;;  %v935_v61 = vld [vmem:[%s2237_s29 + $0x50] sm:$0xff] }
  0x60   : > { %505 = vperm.xlu1 %2065, %v484_v30   ;;  %1111 = vmatpush.bf16.msra.mxu1 %v2008_v3  ;;  %v714_v30 = vld [vmem:[%s2928_s1] sm:$0xff] }
  0x61   : > { %508 = vperm.xlu0 %2064, %v485_v31   ;;  %502 = vperm.xlu2 %2066, %v483_v32  }
  0x64   : > { %1112 = vmatpush.bf16.msra.mxu1 %v2007_v4 }
  0x68   : > { %611 = vperm.xlu1 %2065, %v594_v33  }
  0x69   : > { %614 = vperm.xlu2 %2066, %v595_v34   ;;  %499 = vperm.xlu0 %2064, %v482_v35  }
  0x70   : > { %620 = vperm.xlu1 %2065, %v597_v36  }
  0x71   : > { %617 = vperm.xlu0 %2064, %v596_v37  }
  0x78   : > { %626 = vperm.xlu1 %2065, %v599_v38  }
  0x79   : > { %623 = vperm.xlu0 %2064, %v598_v39  }
  0x80   : > { %632 = vperm.xlu1 %2065, %v601_v40  }
  0x81   : > { %629 = vperm.xlu0 %2064, %v600_v41  }
  0x88   : > { %638 = vperm.xlu1 %2065, %v603_v42  }
  0x89   : > { %635 = vperm.xlu0 %2064, %v602_v43   ;;  %v942_v43 = vld [vmem:[%s2930_s3 + $0x8] sm:$0xff] }
  0x90   : > { %644 = vperm.xlu1 %2065, %v605_v44   ;;  %v941_v44 = vld [vmem:[%s2930_s3] sm:$0xff] }
  0x91   : > { %641 = vperm.xlu0 %2064, %v604_v45   ;;  %v735_v45 = vld [vmem:[%s2232_s30] sm:$0xff] }
  0x98   : > { %653 = vperm.xlu1 %2065, %v608_v46  }
  0x99   : > { %650 = vperm.xlu0 %2064, %v607_v47  }
  0x9b   : > { %v533_v50 = vpop.permute.xlu2 %532 }
  0x9c   : > { %vm557_vm0 = vcmp.eq.s32.totalorder %v533_v50, %v2328_v49 }
  0x9d   : > { %v2334_v52 = vsel %vm557_vm0, 1.0, %v2111_v51 }
  0xa1   : > { %656 = vperm.xlu0 %2064, %v609_v54   ;;  %v928_v54 = vld [vmem:[%s2237_s29 + $0x18] sm:$0xff] }
  0xa3   : > { %v530_v56 = vpop.permute.xlu2 %529 }
  0xa4   : > { %vm556_vm1 = vcmp.eq.s32.totalorder %v530_v56, %v2328_v49  ;;  %v930_v56 = vld [vmem:[%s2237_s29 + $0x28] sm:$0xff] }
  0xa5   : > { %v2341_v57 = vsel %vm556_vm1, 1.0, %v2111_v51 }
  0xab   : > { %v2355_v5 = vpop.permute.xlu2 %520 }
  0xac   : > { %vm553_vm8 = vcmp.eq.s32.totalorder %v2355_v5, %v2328_v49 }
  0xad   : > { %v1851_v38 = vsel %vm553_vm8, 1.0, %v2111_v51 }
  0xb2   : > { %v539_v62 = vpop.permute.xlu1 %538 }
  0xb3   : > { %v545_v63 = vpop.permute.xlu0 %544  ;;  %vm559_vm2 = vcmp.eq.s32.totalorder %v539_v62, %v2328_v49  ;;  %v2382_v12 = vpop.permute.xlu2 %511  ;;  %v936_v62 = vld [vmem:[%s2237_s29 + $0x58] sm:$0xff] }
  0xb4   : > { %vm561_vm3 = vcmp.eq.s32.totalorder %v545_v63, %v2328_v49  ;;  %v2348_v0 = vsel %vm559_vm2, 1.0, %v2111_v51  ;;  %vm550_vm11 = vcmp.eq.s32.totalorder %v2382_v12, %v2328_v49  ;;  %v762_v63 = vld [vmem:[%s2931_s4] sm:$0xff] }
  0xb5   : > { %v2351_v1 = vsel %vm561_vm3, 1.0, %v2111_v51  ;;  %1876 = vmatpush.xpose.msk.msra.mxu0 %vm561_vm3, %v2112_v2  ;;  %1892 = vmatpush.msk.msra.mxu3 %vm561_vm3, %v2112_v2  ;;  %v1848_v33 = vsel %vm550_vm11, 1.0, %v2111_v51 }
  0xb6   : > { %859 = vmatpush.msra.mxu2 %v762_v63 }
  0xba   : > { %v536_v6 = vpop.permute.xlu1 %535 }
  0xbb   : > { %v542_v7 = vpop.permute.xlu0 %541  ;;  %vm558_vm4 = vcmp.eq.s32.totalorder %v536_v6, %v2328_v49  ;;  %v503_v17 = vpop.permute.xlu2 %502 }
  0xbc   : > { %vm560_vm5 = vcmp.eq.s32.totalorder %v542_v7, %v2328_v49  ;;  %v2362_v8 = vsel %vm558_vm4, 1.0, %v2111_v51  ;;  %vm547_vm14 = vcmp.eq.s32.totalorder %v503_v17, %v2328_v49 }
  0xbd   : > { %v2365_v9 = vsel %vm560_vm5, 1.0, %v2111_v51  ;;  %1877 = vmatpush.xpose.msk.msra.mxu0 %vm560_vm5, %v2112_v2  ;;  %1893 = vmatpush.msk.msra.mxu3 %vm560_vm5, %v2112_v2  ;;  %v1845_v25 = vsel %vm547_vm14, 1.0, %v2111_v51 }
  0xbf   : > { %1894 = vmatpush.msk.msra.mxu3 %vm559_vm2, %v2112_v2 }
  0xc1   : > { %1878 = vmatpush.xpose.msk.msra.mxu0 %vm559_vm2, %v2112_v2  ;;  %1895 = vmatpush.msk.msra.mxu3 %vm558_vm4, %v2112_v2 }
  0xc2   : > { %v524_v10 = vpop.permute.xlu1 %523 }
  0xc3   : > { %v527_v11 = vpop.permute.xlu0 %526  ;;  %vm554_vm6 = vcmp.eq.s32.totalorder %v524_v10, %v2328_v49  ;;  %1896 = vmatpush.msk.msra.mxu3 %vm557_vm0, %v2112_v2  ;;  %v615_v20 = vpop.permute.xlu2 %614 }
  0xc4   : > { %vm555_vm7 = vcmp.eq.s32.totalorder %v527_v11, %v2328_v49  ;;  %v2388_v13 = vsel %vm554_vm6, 1.0, %v2111_v51  ;;  %vm659_vm15 = vcmp.eq.s32.totalorder %v615_v20, %v2328_v49 }
  0xc5   : > { %v2393_v14 = vsel %vm555_vm7, 1.0, %v2111_v51  ;;  %1879 = vmatpush.xpose.msk.msra.mxu0 %vm558_vm4, %v2112_v2  ;;  %1897 = vmatpush.msk.msra.mxu3 %vm556_vm1, %v2112_v2 }
  0xc7   : > { %1898 = vmatpush.msk.msra.mxu3 %vm555_vm7, %v2112_v2 }
  0xc9   : > { %1880 = vmatpush.xpose.msk.msra.mxu0 %vm557_vm0, %v2112_v2  ;;  %1899 = vmatpush.msk.msra.mxu3 %vm554_vm6, %v2112_v2 }
  0xca   : > { %v2412_v15 = vpop.permute.xlu1 %514 }
  0xcb   : > { %v2414_v16 = vpop.permute.xlu0 %517  ;;  %1900 = vmatpush.msk.msra.mxu3 %vm553_vm8, %v2112_v2  ;;  %vm551_vm10 = vcmp.eq.s32.totalorder %v2412_v15, %v2328_v49 }
  0xcc   : > { %vm552_vm9 = vcmp.eq.s32.totalorder %v2414_v16, %v2328_v49  ;;  %v1849_v34 = vsel %vm551_vm10, 1.0, %v2111_v51 }
  0xcd   : > { %1881 = vmatpush.xpose.msk.msra.mxu0 %vm556_vm1, %v2112_v2  ;;  %1901 = vmatpush.msk.msra.mxu3 %vm552_vm9, %v2112_v2  ;;  %v1850_v37 = vsel %vm552_vm9, 1.0, %v2111_v51 }
  0xcf   : > { %1902 = vmatpush.msk.msra.mxu3 %vm551_vm10, %v2112_v2 }
  0xd1   : > { %1882 = vmatpush.xpose.msk.msra.mxu0 %vm555_vm7, %v2112_v2  ;;  %1903 = vmatpush.msk.msra.mxu3 %vm550_vm11, %v2112_v2 }
  0xd2   : > { %v506_v18 = vpop.permute.xlu1 %505 }
  0xd3   : > { %v509_v19 = vpop.permute.xlu0 %508  ;;  %vm548_vm13 = vcmp.eq.s32.totalorder %v506_v18, %v2328_v49 }
  0xd4   : > { %vm549_vm12 = vcmp.eq.s32.totalorder %v509_v19, %v2328_v49  ;;  %v1846_v28 = vsel %vm548_vm13, 1.0, %v2111_v51 }
  0xd5   : > { %1883 = vmatpush.xpose.msk.msra.mxu0 %vm554_vm6, %v2112_v2  ;;  %1904 = vmatpush.msk.msra.mxu3 %vm549_vm12, %v2112_v2  ;;  %v1847_v29 = vsel %vm549_vm12, 1.0, %v2111_v51 }
  0xd7   : > { %1905 = vmatpush.msk.msra.mxu3 %vm548_vm13, %v2112_v2 }
  0xd9   : > { %1884 = vmatpush.xpose.msk.msra.mxu0 %vm553_vm8, %v2112_v2  ;;  %1906 = vmatpush.msk.msra.mxu3 %vm547_vm14, %v2112_v2 }
  0xda   : > { %v612_v21 = vpop.permute.xlu1 %611 }
  0xdb   : > { %vm658_vm0 = vcmp.eq.s32.totalorder %v612_v21, %v2328_v49  ;;  %v500_v22 = vpop.permute.xlu0 %499 }
  0xdc   : > { %vm1972_vm1 = vmpackc.low %vm659_vm15, %vm658_vm0  ;;  %vm546_vm2 = vcmp.eq.s32.totalorder %v500_v22, %v2328_v49 }
  0xdd   : > { %1885 = vmatpush.xpose.msk.msra.mxu0 %vm552_vm9, %v2112_v2  ;;  %1907 = vmatpush.msk.msra.mxu3 %vm546_vm2, %v2112_v2  ;;  %v1844_v23 = vsel %vm546_vm2, 1.0, %v2111_v51  ;;  %v925_v51 = vld [vmem:[%s2237_s29] sm:$0xff] }
  0xde   : > { %1973 = vmatmul.msk.bf16.vlgmr.msra.gmra.mxu1 %vm1972_vm1, %v2113_v24  ;;  %1186 = vxpose.xlu1.b32.start [1/16] %v1844_v23, 128 }
  0xdf   : > { %1006 = vmatpush.msrb.mxu3 %v942_v43 }
  0xe1   : > { %1886 = vmatpush.xpose.msk.msra.mxu0 %vm551_vm10, %v2112_v2  ;;  %1007 = vmatpush.msrb.mxu3 %v941_v44  ;;  %v938_v44 = vld [vmem:[%s2237_s29 + $0x68] sm:$0xff] }
  0xe2   : > { %v621_v26 = vpop.permute.xlu1 %620 }
  0xe3   : > { %v618_v27 = vpop.permute.xlu0 %617  ;;  %vm661_vm3 = vcmp.eq.s32.totalorder %v621_v26, %v2328_v49 }
  0xe4   : > { %vm660_vm4 = vcmp.eq.s32.totalorder %v618_v27, %v2328_v49 }
  0xe5   : > { %1887 = vmatpush.xpose.msk.msra.mxu0 %vm550_vm11, %v2112_v2  ;;  %vm1974_vm5 = vmpackc.low %vm661_vm3, %vm660_vm4  ;;  %vm795_vm3 = vcmask 64512  }
  0xe6   : > { %1187 = vxpose.xlu1.b32.cont [2/16] %v1845_v25, 128 }
  0xe9   : > { %1888 = vmatpush.xpose.msk.msra.mxu0 %vm549_vm12, %v2112_v2 }
  0xea   : > { %v627_v31 = vpop.permute.xlu1 %626 }
  0xeb   : > { %v624_v32 = vpop.permute.xlu0 %623  ;;  %vm663_vm6 = vcmp.eq.s32.totalorder %v627_v31, %v2328_v49 }
  0xec   : > { %vm662_vm7 = vcmp.eq.s32.totalorder %v624_v32, %v2328_v49  ;;  %v606_v32 = vld [vmem:[%s2247_s16 + $0x60] sm:$0xff] }
  0xed   : > { %1889 = vmatpush.xpose.msk.msra.mxu0 %vm548_vm13, %v2112_v2  ;;  %vm1976_vm12 = vmpackc.low %vm663_vm6, %vm662_vm7 }
  0xee   : > { %1975 = vmatmul.msk.bf16.gmra.mxu1 %vm1974_vm5, %v2113_v24  ;;  %1188 = vxpose.xlu1.b32.cont [3/16] %v1846_v28, 128 }
  0xf1   : > { %1890 = vmatpush.xpose.msk.msra.mxu0 %vm547_vm14, %v2112_v2 }
  0xf2   : > { %v633_v35 = vpop.permute.xlu1 %632 }
  0xf3   : > { %v630_v36 = vpop.permute.xlu0 %629  ;;  %vm665_vm13 = vcmp.eq.s32.totalorder %v633_v35, %v2328_v49 }
  0xf4   : > { %vm664_vm14 = vcmp.eq.s32.totalorder %v630_v36, %v2328_v49 }
  0xf5   : > { %1891 = vmatpush.xpose.msk.msra.mxu0 %vm546_vm2, %v2112_v2  ;;  %vm1978_vm11 = vmpackc.low %vm665_vm13, %vm664_vm14  ;;  %vm943_vm2 = vcmask 130048  }
  0xf6   : > { %1189 = vxpose.xlu1.b32.cont [4/16] %v1847_v29, 128 }
  0xf8   : > { %731 = vmatmul.f32.vlgmr.msra.gmra.mxu0 %v714_v30 }
  0xfa   : > { %v639_v39 = vpop.permute.xlu1 %638 }
  0xfb   : > { %v636_v40 = vpop.permute.xlu0 %635  ;;  %vm667_vm10 = vcmp.eq.s32.totalorder %v639_v39, %v2328_v49 }
  0xfc   : > { %vm666_vm15 = vcmp.eq.s32.totalorder %v636_v40, %v2328_v49  ;;  %v937_v40 = vld [vmem:[%s2237_s29 + $0x60] sm:$0xff] }
  0xfd   : > { %vm1980_vm0 = vmpackc.low %vm667_vm10, %vm666_vm15 }
  0xfe   : > { %1977 = vmatmul.msk.bf16.gmra.mxu1 %vm1976_vm12, %v2113_v24  ;;  %1190 = vxpose.xlu1.b32.cont [5/16] %v1848_v33, 128 }
 0x102   : > { %v645_v41 = vpop.permute.xlu1 %644 }
 0x103   : > { %v642_v42 = vpop.permute.xlu0 %641  ;;  %vm669_vm9 = vcmp.eq.s32.totalorder %v645_v41, %v2328_v49 }
 0x104   : > { %vm668_vm8 = vcmp.eq.s32.totalorder %v642_v42, %v2328_v49 }
 0x105   : > { %vm1982_vm1 = vmpackc.low %vm669_vm9, %vm668_vm8 }
 0x106   : > { %1191 = vxpose.xlu1.b32.cont [6/16] %v1849_v34, 128 }
 0x10e   : > { %1979 = vmatmul.msk.bf16.gmra.mxu1 %vm1978_vm11, %v2113_v24  ;;  %1192 = vxpose.xlu1.b32.cont [7/16] %v1850_v37, 128 }
 0x116   : > { %1193 = vxpose.xlu1.b32.cont [8/16] %v1851_v38, 128 }
 0x11e   : > { %1981 = vmatmul.msk.bf16.gmra.mxu1 %vm1980_vm0, %v2113_v24  ;;  %1194 = vxpose.xlu1.b32.cont [9/16] %v2388_v13, 128 }
 0x126   : > { %1195 = vxpose.xlu1.b32.cont [10/16] %v2393_v14, 128 }
 0x12e   : > { %1983 = vmatmul.msk.bf16.gmra.mxu1 %vm1982_vm1, %v2113_v24  ;;  %1196 = vxpose.xlu1.b32.cont [11/16] %v2341_v57, 128  ;;  %v931_v57 = vld [vmem:[%s2237_s29 + $0x30] sm:$0xff] }
 0x136   : > { %1197 = vxpose.xlu1.b32.cont [12/16] %v2334_v52, 128  ;;  %v926_v52 = vld [vmem:[%s2237_s29 + $0x8] sm:$0xff] }
 0x13e   : > { %1198 = vxpose.xlu1.b32.cont [13/16] %v2362_v8, 128 }
 0x146   : > { %1199 = vxpose.xlu1.b32.cont [14/16] %v2348_v0, 128 }
 0x14e   : > { %1200 = vxpose.xlu1.b32.cont [15/16] %v2365_v9, 128 }
 0x156   : > { %1201 = vxpose.xlu1.b32.end [16/16] %v2351_v1, 128  ;;  %v739_v1 = vld [vmem:[#allocation2] sm:$0xff] }
 0x15b   : > { %v1114_v0 = vpop.f32.mrf.mxu1 }
 0x163   : > { %v1116_v4 = vpop.f32.mrf.mxu1 }
 0x16b   : > { %v2582_v6 = vpop.f32.mrf.mxu1 }
 0x173   : > { %v2584_v8 = vpop.f32.mrf.mxu1 }
 0x175   : > { %v732_v46 = vpop.f32.mrf.mxu0 }
 0x176   : > { %v736_v47 = vsub.f32 %v735_v45, %v732_v46 }
 0x178   : > { %v737_v48 = vmul.f32 1.442695, %v736_v47 }
 0x17a   : > { %2067 = vpow2.f32 %v737_v48  ;;  %v939_v48 = vld [vmem:[%s2237_s29 + $0x70] sm:$0xff] }
 0x17b   : > { %v2588_v12 = vpop.f32.mrf.mxu1 }
 0x180   : > { %v2068_v50 = vpop.eup %2067 }
 0x181   : > { %763 = vxpose.xlu2.b32.start.end [1/1] (short) %v2068_v50, 128  ;;  %756 = vmatmul.f32.vlgmr.msra.gmra.mxu3 %v2068_v50 }
 0x183   : > { %v2591_v16 = vpop.f32.mrf.mxu1 }
 0x189   : > { %1924 = vmatmul.msk.f32.vlgmr.msrb.gmra.mxu3 %vm943_vm2, %v925_v51 }
 0x18b   : > { %v2596_v19 = vpop.f32.mrf.mxu1 }
 0x191   : > { %1925 = vmatmul.msk.f32.gmra.mxu3 %vm943_vm2, %v926_v52 }
 0x193   : > { %v2601_v22 = vpop.f32.mrf.mxu1 }
 0x199   : > { %1926 = vmatmul.msk.f32.gmra.mxu3 %vm943_vm2, %v927_v53  ;;  %v940_v53 = vld [vmem:[%s2237_s29 + $0x78] sm:$0xff] }
 0x19b   : > { %v1134_v27 = vpop.f32.mrf.mxu1 }
 0x1a1   : > { %1927 = vmatmul.msk.f32.gmra.mxu3 %vm943_vm2, %v928_v54 }
 0x1a9   : > { %1928 = vmatmul.msk.f32.gmra.mxu3 %vm943_vm2, %v929_v55 }
 0x1b1   : > { %1929 = vmatmul.msk.f32.gmra.mxu3 %vm943_vm2, %v930_v56 }
 0x1b9   : > { %1930 = vmatmul.msk.f32.gmra.mxu3 %vm943_vm2, %v931_v57  ;;  %v651_v57 = vpop.permute.xlu0 %650 }
 0x1ba   : > { %vm671_vm4 = vcmp.eq.s32.totalorder %v651_v57, %v2328_v49 }
 0x1c1   : > { %1931 = vmatmul.msk.f32.gmra.mxu3 %vm943_vm2, %v932_v58 }
 0x1c9   : > { %1932 = vmatmul.msk.f32.gmra.mxu3 %vm943_vm2, %v933_v59 }
 0x1d1   : > { %1933 = vmatmul.msk.f32.gmra.mxu3 %vm943_vm2, %v934_v60 }
 0x1d9   : > { %1934 = vmatmul.msk.f32.gmra.mxu3 %vm943_vm2, %v935_v61 }
 0x1e1   : > { %1935 = vmatmul.msk.f32.gmra.mxu3 %vm943_vm2, %v936_v62 }
 0x1e9   : > { %1936 = vmatmul.msk.f32.gmra.mxu3 %vm943_vm2, %v937_v40 }
 0x1f1   : > { %1937 = vmatmul.msk.f32.gmra.mxu3 %vm943_vm2, %v938_v44 }
 0x1f9   : > { %1938 = vmatmul.msk.f32.gmra.mxu3 %vm943_vm2, %v939_v48 }
 0x201   : > { %1939 = vmatmul.msk.f32.gmra.mxu3 %vm943_vm2, %v940_v53 }
 0x204   : > { %v757_v2 = vpop.f32.mrf.mxu3 }
 0x205   : > { %v760_v3 = vadd.f32 %v757_v2, %v739_v1  ;;  %v657_v1 = vpop.permute.xlu0 %656  ;;  %v654_v2 = vpop.permute.xlu1 %653 }
 0x206   : > { %vm673_vm7 = vcmp.eq.s32.totalorder %v657_v1, %v2328_v49  ;;  %vm672_vm12 = vcmp.eq.s32.totalorder %v654_v2, %v2328_v49 }
 0x207   : > { %761 = vst [vmem:[#allocation2] sm:$0xff] %v760_v3  ;;  %vm1986_vm13 = vmpackc.low %vm673_vm7, %vm672_vm12 }
 0x20c   : > { %v1009_v5 = vpop.f32.mrf.mxu3 }
 0x20d   : > { %v1115_v41 = vadd.f32 %v1114_v0, %v1009_v5 }
 0x214   : > { %v1012_v7 = vpop.f32.mrf.mxu3 }
 0x215   : > { %v1117_v45 = vadd.f32 %v1116_v4, %v1012_v7 }
 0x21a   : > { %v779_v9 = vpop.trf.xlu2 }
 0x21b   : > { %1908 = vmatmul.msk.f32.vlgmr.msra.gmra.mxu2 %vm795_vm3, %v779_v9 }
 0x21c   : > { %v1015_v10 = vpop.f32.mrf.mxu3 }
 0x21d   : > { %v1120_v50 = vadd.f32 %v2582_v6, %v1015_v10 }
 0x222   : > { %v780_v11 = vpop.trf.xlu2 }
 0x223   : > { %1909 = vmatmul.msk.f32.gmra.mxu2 %vm795_vm3, %v780_v11 }
 0x224   : > { %v1018_v13 = vpop.f32.mrf.mxu3 }
 0x225   : > { %v1122_v54 = vadd.f32 %v2584_v8, %v1018_v13 }
 0x22a   : > { %v781_v14 = vpop.trf.xlu2 }
 0x22b   : > { %1910 = vmatmul.msk.f32.gmra.mxu2 %vm795_vm3, %v781_v14  ;;  %v2661_v14 = vpop.trf.xlu1 }
 0x22c   : > { %v1021_v15 = vpop.f32.mrf.mxu3 }
 0x22d   : > { %v1125_v59 = vadd.f32 %v2588_v12, %v1021_v15  ;;  %v1136_v12 = vpop.f32.mrf.mxu1 }
 0x232   : > { %v782_v17 = vpop.trf.xlu2 }
 0x233   : > { %1911 = vmatmul.msk.f32.gmra.mxu2 %vm795_vm3, %v782_v17  ;;  %v2663_v17 = vpop.trf.xlu1 }
 0x234   : > { %v2594_v18 = vpop.f32.mrf.mxu3 }
 0x235   : > { %v1127_v62 = vadd.f32 %v2591_v16, %v2594_v18  ;;  %v1139_v16 = vpop.f32.mrf.mxu1 }
 0x23a   : > { %v783_v20 = vpop.trf.xlu2 }
 0x23b   : > { %1912 = vmatmul.msk.f32.gmra.mxu2 %vm795_vm3, %v783_v20 }
 0x23c   : > { %v2599_v21 = vpop.f32.mrf.mxu3 }
 0x23d   : > { %v1130_v3 = vadd.f32 %v2596_v19, %v2599_v21  ;;  %v2665_v19 = vpop.trf.xlu1  ;;  %v1141_v20 = vpop.f32.mrf.mxu1 }
 0x242   : > { %v784_v23 = vpop.trf.xlu2 }
 0x243   : > { %1913 = vmatmul.msk.f32.gmra.mxu2 %vm795_vm3, %v784_v23 }
 0x244   : > { %v2604_v25 = vpop.f32.mrf.mxu3 }
 0x245   : > { %v1132_v6 = vadd.f32 %v2601_v22, %v2604_v25  ;;  %v2667_v23 = vpop.trf.xlu1 }
 0x24a   : > { %v785_v26 = vpop.trf.xlu2 }
 0x24b   : > { %1914 = vmatmul.msk.f32.gmra.mxu2 %vm795_vm3, %v785_v26 }
 0x24c   : > { %v1033_v28 = vpop.f32.mrf.mxu3 }
 0x24d   : > { %v2607_v29 = vadd.f32 %v1134_v27, %v1033_v28  ;;  %v2669_v28 = vpop.trf.xlu1 }
 0x252   : > { %v786_v30 = vpop.trf.xlu2 }
 0x253   : > { %1915 = vmatmul.msk.f32.gmra.mxu2 %vm795_vm3, %v786_v30 }
 0x25a   : > { %v787_v31 = vpop.trf.xlu2 }
 0x25b   : > { %1916 = vmatmul.msk.f32.gmra.mxu2 %vm795_vm3, %v787_v31  ;;  %v2671_v31 = vpop.trf.xlu1 }
 0x262   : > { %647 = vperm.xlu2 %2066, %v606_v32   ;;  %v788_v33 = vpop.trf.xlu2 }
 0x263   : > { %1917 = vmatmul.msk.f32.gmra.mxu2 %vm795_vm3, %v788_v33 }
 0x26a   : > { %v789_v34 = vpop.trf.xlu2 }
 0x26b   : > { %1918 = vmatmul.msk.f32.gmra.mxu2 %vm795_vm3, %v789_v34 }
 0x272   : > { %v790_v35 = vpop.trf.xlu2 }
 0x273   : > { %1919 = vmatmul.msk.f32.gmra.mxu2 %vm795_vm3, %v790_v35  ;;  %v2673_v35 = vpop.trf.xlu1 }
 0x27a   : > { %v791_v36 = vpop.trf.xlu2 }
 0x27b   : > { %1920 = vmatmul.msk.f32.gmra.mxu2 %vm795_vm3, %v791_v36 }
 0x282   : > { %v792_v37 = vpop.trf.xlu2 }
 0x283   : > { %1921 = vmatmul.msk.f32.gmra.mxu2 %vm795_vm3, %v792_v37 }
 0x28a   : > { %v793_v38 = vpop.trf.xlu2 }
 0x28b   : > { %1922 = vmatmul.msk.f32.gmra.mxu2 %vm795_vm3, %v793_v38 }
 0x292   : > { %v794_v39 = vpop.trf.xlu2 }
 0x293   : > { %1923 = vmatmul.msk.f32.gmra.mxu2 %vm795_vm3, %v794_v39 }
 0x29e   : > { %v861_v42 = vpop.f32.mrf.mxu2 }
 0x29f   : > { %v2621_v43 = vmul.f32 %v1115_v41, %v861_v42 }
 0x2a6   : > { %v864_v46 = vpop.f32.mrf.mxu2 }
 0x2a7   : > { %v2625_v47 = vmul.f32 %v1117_v45, %v864_v46  ;;  %v2675_v45 = vpop.trf.xlu1 }
 0x2ae   : > { %v867_v51 = vpop.f32.mrf.mxu2 }
 0x2af   : > { %v2630_v52 = vmul.f32 %v1120_v50, %v867_v51  ;;  %v1210_v57 = vpop.trf.xlu1 }
 0x2b6   : > { %v870_v55 = vpop.f32.mrf.mxu2 }
 0x2b7   : > { %v2635_v56 = vmul.f32 %v1122_v54, %v870_v55 }
 0x2bc   : > { %v648_v58 = vpop.permute.xlu2 %647 }
 0x2bd   : > { %vm670_vm5 = vcmp.eq.s32.totalorder %v648_v58, %v2328_v49  ;;  %v1036_v49 = vpop.f32.mrf.mxu3 }
 0x2be   : > { %vm1984_vm6 = vmpackc.low %vm671_vm4, %vm670_vm5  ;;  %v873_v60 = vpop.f32.mrf.mxu2  ;;  %v1137_v54 = vadd.f32 %v1136_v12, %v1036_v49  ;;  %v1182_v12 = vld [vmem:[%s2935_s8 + $0x60] sm:$0xff] }
 0x2bf   : > { %v2640_v61 = vmul.f32 %v1125_v59, %v873_v60  ;;  %1985 = vmatmul.msk.bf16.gmra.mxu1 %vm1984_vm6, %v2113_v24  ;;  %v1211_v59 = vpop.trf.xlu1 }
 0x2c5   : > { %v1039_v13 = vpop.f32.mrf.mxu3 }
 0x2c6   : > { %v876_v63 = vpop.f32.mrf.mxu2  ;;  %v1140_v51 = vadd.f32 %v1139_v16, %v1039_v13 }
 0x2c7   : > { %v2645_v0 = vmul.f32 %v1127_v62, %v876_v63  ;;  %v1212_v60 = vpop.trf.xlu1  ;;  %v1170_v62 = vld [vmem:[%s2935_s8] sm:$0xff]  ;;  %v1180_v63 = vld [vmem:[%s2935_s8 + $0x50] sm:$0xff] }
 0x2ce   : > { %v879_v4 = vpop.f32.mrf.mxu2 }
 0x2cf   : > { %v2651_v5 = vmul.f32 %v1130_v3, %v879_v4  ;;  %1987 = vmatmul.msk.bf16.gmra.mxu1 %vm1986_vm13, %v2113_v24  ;;  %v1042_v24 = vpop.f32.mrf.mxu3  ;;  %v1171_v4 = vld [vmem:[%s2935_s8 + $0x8] sm:$0xff] }
 0x2d0   : > { %v1142_v48 = vadd.f32 %v1141_v20, %v1042_v24  ;;  %v1183_v24 = vld [vmem:[%s2935_s8 + $0x68] sm:$0xff]  ;;  %v1174_v20 = vld [vmem:[%s2935_s8 + $0x20] sm:$0xff] }
 0x2d6   : > { %v882_v7 = vpop.f32.mrf.mxu2 }
 0x2d7   : > { %v2656_v8 = vmul.f32 %v1132_v6, %v882_v7  ;;  %v1045_v21 = vpop.f32.mrf.mxu3  ;;  %v1181_v7 = vld [vmem:[%s2935_s8 + $0x58] sm:$0xff] }
 0x2de   : > { %v885_v9 = vpop.f32.mrf.mxu2 }
 0x2df   : > { %v2659_v10 = vmul.f32 %v2607_v29, %v885_v9  ;;  %v1048_v26 = vpop.f32.mrf.mxu3 }
 0x2e6   : > { %v888_v11 = vpop.f32.mrf.mxu2 }
 0x2e7   : > { %v1051_v30 = vpop.f32.mrf.mxu3  ;;  %v1163_v58 = vmul.f32 %v1137_v54, %v888_v11 }
 0x2ee   : > { %v891_v15 = vpop.f32.mrf.mxu2 }
 0x2ef   : > { %v1054_v34 = vpop.f32.mrf.mxu3  ;;  %v1164_v55 = vmul.f32 %v1140_v51, %v891_v15  ;;  %v1173_v15 = vld [vmem:[%s2935_s8 + $0x18] sm:$0xff] }
 0x2f6   : > { %v894_v18 = vpop.f32.mrf.mxu2 }
 0x2f7   : > { %v1165_v53 = vmul.f32 %v1142_v48, %v894_v18 }
 0x2fe   : > { %v897_v22 = vpop.f32.mrf.mxu2 }
 0x306   : > { %v900_v27 = vpop.f32.mrf.mxu2 }
 0x30e   : > { %v903_v32 = vpop.f32.mrf.mxu2 }
 0x316   : > { %v906_v39 = vpop.f32.mrf.mxu2 }
 0x33c   : > { %v1144_v25 = vpop.f32.mrf.mxu1 }
 0x33d   : > { %v1145_v42 = vadd.f32 %v1144_v25, %v1045_v21 }
 0x33f   : > { %v1166_v50 = vmul.f32 %v1145_v42, %v897_v22  ;;  %v1179_v42 = vld [vmem:[%s2935_s8 + $0x48] sm:$0xff] }
 0x344   : > { %v1146_v29 = vpop.f32.mrf.mxu1 }
 0x345   : > { %v1147_v40 = vadd.f32 %v1146_v29, %v1048_v26 }
 0x347   : > { %v1167_v46 = vmul.f32 %v1147_v40, %v900_v27  ;;  %v1175_v27 = vld [vmem:[%s2935_s8 + $0x28] sm:$0xff] }
 0x34c   : > { %v1149_v33 = vpop.f32.mrf.mxu1 }
 0x34d   : > { %v1150_v37 = vadd.f32 %v1149_v33, %v1051_v30  ;;  %v1185_v30 = vld [vmem:[%s2935_s8 + $0x78] sm:$0xff]  ;;  %v1176_v33 = vld [vmem:[%s2935_s8 + $0x30] sm:$0xff] }
 0x34f   : > { %v1168_v44 = vmul.f32 %v1150_v37, %v903_v32 }
 0x354   : > { %v1151_v36 = vpop.f32.mrf.mxu1 }
 0x355   : > { %v1152_v38 = vadd.f32 %v1151_v36, %v1054_v34  ;;  %v1177_v36 = vld [vmem:[%s2935_s8 + $0x38] sm:$0xff] }
 0x357   : > { %v1169_v41 = vmul.f32 %v1152_v38, %v906_v39  ;;  %v1178_v39 = vld [vmem:[%s2935_s8 + $0x40] sm:$0xff] }
 0x359   : > { %1218 = vmatpush.msrb.mxu0 %v1169_v41  ;;  %2015 = vmatpush.msrb.mxu1 %v1169_v41 }
 0x35a   : > { %2016 = vmatpush.msrb.mxu2 %v1169_v41 }
 0x35b   : > { %1219 = vmatpush.msrb.mxu0 %v1168_v44  ;;  %2017 = vmatpush.msrb.mxu1 %v1168_v44 }
 0x35c   : > { %2018 = vmatpush.msrb.mxu2 %v1168_v44 }
 0x35d   : > { %1220 = vmatpush.msrb.mxu0 %v1167_v46  ;;  %2019 = vmatpush.msrb.mxu1 %v1167_v46 }
 0x35e   : > { %2020 = vmatpush.msrb.mxu2 %v1167_v46 }
 0x35f   : > { %1221 = vmatpush.msrb.mxu0 %v1166_v50  ;;  %2021 = vmatpush.msrb.mxu1 %v1166_v50 }
 0x360   : > { %2022 = vmatpush.msrb.mxu2 %v1166_v50 }
 0x361   : > { %1222 = vmatpush.msrb.mxu0 %v1165_v53  ;;  %2023 = vmatpush.msrb.mxu1 %v1165_v53 }
 0x362   : > { %2024 = vmatpush.msrb.mxu2 %v1165_v53 }
 0x363   : > { %1223 = vmatpush.msrb.mxu0 %v1164_v55  ;;  %2025 = vmatpush.msrb.mxu1 %v1164_v55 }
 0x364   : > { %2026 = vmatpush.msrb.mxu2 %v1164_v55 }
 0x365   : > { %1224 = vmatpush.msrb.mxu0 %v1163_v58  ;;  %2027 = vmatpush.msrb.mxu1 %v1163_v58 }
 0x366   : > { %2028 = vmatpush.msrb.mxu2 %v1163_v58 }
 0x367   : > { %1225 = vmatpush.msrb.mxu0 %v2659_v10  ;;  %2029 = vmatpush.msrb.mxu1 %v2659_v10 }
 0x368   : > { %2030 = vmatpush.msrb.mxu2 %v2659_v10  ;;  %v1172_v10 = vld [vmem:[%s2935_s8 + $0x10] sm:$0xff] }
 0x369   : > { %1226 = vmatpush.msrb.mxu0 %v2656_v8  ;;  %2031 = vmatpush.msrb.mxu1 %v2656_v8 }
 0x36a   : > { %2032 = vmatpush.msrb.mxu2 %v2656_v8 }
 0x36b   : > { %1227 = vmatpush.msrb.mxu0 %v2651_v5  ;;  %2033 = vmatpush.msrb.mxu1 %v2651_v5 }
 0x36c   : > { %2034 = vmatpush.msrb.mxu2 %v2651_v5 }
 0x36d   : > { %1228 = vmatpush.msrb.mxu0 %v2645_v0  ;;  %2035 = vmatpush.msrb.mxu1 %v2645_v0 }
 0x36e   : > { %2036 = vmatpush.msrb.mxu2 %v2645_v0 }
 0x36f   : > { %1229 = vmatpush.msrb.mxu0 %v2640_v61  ;;  %2037 = vmatpush.msrb.mxu1 %v2640_v61 }
 0x370   : > { %2038 = vmatpush.msrb.mxu2 %v2640_v61 }
 0x371   : > { %1230 = vmatpush.msrb.mxu0 %v2635_v56  ;;  %2039 = vmatpush.msrb.mxu1 %v2635_v56 }
 0x372   : > { %2040 = vmatpush.msrb.mxu2 %v2635_v56  ;;  %v1213_v56 = vpop.trf.xlu1 }
 0x373   : > { %1231 = vmatpush.msrb.mxu0 %v2630_v52  ;;  %2041 = vmatpush.msrb.mxu1 %v2630_v52 }
 0x374   : > { %2042 = vmatpush.msrb.mxu2 %v2630_v52 }
 0x375   : > { %1232 = vmatpush.msrb.mxu0 %v2625_v47  ;;  %2043 = vmatpush.msrb.mxu1 %v2625_v47 }
 0x376   : > { %2044 = vmatpush.msrb.mxu2 %v2625_v47 }
 0x377   : > { %1233 = vmatpush.msrb.mxu0 %v2621_v43  ;;  %2045 = vmatpush.msrb.mxu1 %v2621_v43 }
 0x378   : > { %2046 = vmatpush.msrb.mxu2 %v2621_v43  ;;  %1234 = vmatmul.f32.vlgmr.msrb.gmra.mxu0 %v2661_v14 }
 0x379   : > { %1264 = vmatmul.f32.vlgmr.msrb.gmra.mxu1 %v1212_v60  ;;  %1267 = vmatmul.f32.vlgmr.msrb.gmra.mxu2 %v1213_v56 }
 0x37a   : > { %v1214_v52 = vpop.trf.xlu1 }
 0x380   : > { %1237 = vmatmul.f32.gmra.mxu0 %v2663_v17 }
 0x381   : > { %1270 = vmatmul.f32.gmra.mxu2 %v1214_v52 }
 0x382   : > { %v1215_v61 = vpop.trf.xlu1 }
 0x388   : > { %1240 = vmatmul.f32.gmra.mxu0 %v2665_v19 }
 0x389   : > { %1273 = vmatmul.f32.gmra.mxu2 %v1215_v61 }
 0x38a   : > { %v1216_v47 = vpop.trf.xlu1 }
 0x390   : > { %1243 = vmatmul.f32.gmra.mxu0 %v2667_v23  ;;  %v1184_v23 = vld [vmem:[%s2935_s8 + $0x70] sm:$0xff] }
 0x391   : > { %1276 = vmatmul.f32.gmra.mxu2 %v1216_v47 }
 0x392   : > { %v1217_v43 = vpop.trf.xlu1 }
 0x398   : > { %1246 = vmatmul.f32.gmra.mxu0 %v2669_v28 }
 0x399   : > { %1279 = vmatmul.f32.gmra.mxu2 %v1217_v43 }
 0x3a0   : > { %1249 = vmatmul.f32.gmra.mxu0 %v2671_v31 }
 0x3a8   : > { %1252 = vmatmul.f32.gmra.mxu0 %v2673_v35 }
 0x3b0   : > { %1255 = vmatmul.f32.gmra.mxu0 %v2675_v45 }
 0x3b8   : > { %1258 = vmatmul.f32.gmra.mxu0 %v1210_v57 }
 0x3c0   : > { %1261 = vmatmul.f32.gmra.mxu0 %v1211_v59 }
 0x3f5   : > { %v1235_v0 = vpop.f32.mrf.mxu0 }
 0x3f6   : > { %v1283_v1 = vadd.f32 %v1235_v0, %v1170_v62  ;;  %v1265_v2 = vpop.f32.mrf.mxu1 }
 0x3f7   : > { %v1293_v3 = vadd.f32 %v1265_v2, %v1180_v63 }
 0x3f8   : > { %1299 = vst [vmem:[%s2935_s8] sm:$0xff] %v1283_v1 }
 0x3f9   : > { %1309 = vst [vmem:[%s2935_s8 + $0x50] sm:$0xff] %v1293_v3 }
 0x3fc   : > { %v1268_v8 = vpop.f32.mrf.mxu2 }
 0x3fd   : > { %v1238_v5 = vpop.f32.mrf.mxu0  ;;  %v1294_v9 = vadd.f32 %v1268_v8, %v1181_v7 }
 0x3fe   : > { %v1284_v6 = vadd.f32 %v1238_v5, %v1171_v4 }
 0x3ff   : > { %1310 = vst [vmem:[%s2935_s8 + $0x58] sm:$0xff] %v1294_v9 }
 0x400   : > { %1300 = vst [vmem:[%s2935_s8 + $0x8] sm:$0xff] %v1284_v6 }
 0x404   : > { %v1271_v13 = vpop.f32.mrf.mxu2 }
 0x405   : > { %v1241_v49 = vpop.f32.mrf.mxu0  ;;  %v1295_v14 = vadd.f32 %v1271_v13, %v1182_v12 }
 0x406   : > { %v1285_v11 = vadd.f32 %v1241_v49, %v1172_v10 }
 0x407   : > { %1311 = vst [vmem:[%s2935_s8 + $0x60] sm:$0xff] %v1295_v14 }
 0x408   : > { %1301 = vst [vmem:[%s2935_s8 + $0x10] sm:$0xff] %v1285_v11 }
 0x40c   : > { %v1274_v18 = vpop.f32.mrf.mxu2 }
 0x40d   : > { %v1244_v16 = vpop.f32.mrf.mxu0  ;;  %v1296_v19 = vadd.f32 %v1274_v18, %v1183_v24 }
 0x40e   : > { %v1286_v17 = vadd.f32 %v1244_v16, %v1173_v15 }
 0x40f   : > { %1312 = vst [vmem:[%s2935_s8 + $0x68] sm:$0xff] %v1296_v19 }
 0x410   : > { %1302 = vst [vmem:[%s2935_s8 + $0x18] sm:$0xff] %v1286_v17 }
 0x414   : > { %v1277_v25 = vpop.f32.mrf.mxu2 }
 0x415   : > { %v1247_v21 = vpop.f32.mrf.mxu0  ;;  %v1297_v26 = vadd.f32 %v1277_v25, %v1184_v23 }
 0x416   : > { %v1287_v22 = vadd.f32 %v1247_v21, %v1174_v20 }
 0x417   : > { %1313 = vst [vmem:[%s2935_s8 + $0x70] sm:$0xff] %v1297_v26 }
 0x418   : > { %1303 = vst [vmem:[%s2935_s8 + $0x20] sm:$0xff] %v1287_v22 }
 0x41c   : > { %v1280_v31 = vpop.f32.mrf.mxu2 }
 0x41d   : > { %v1250_v28 = vpop.f32.mrf.mxu0  ;;  %v1298_v32 = vadd.f32 %v1280_v31, %v1185_v30 }
 0x41e   : > { %v1288_v29 = vadd.f32 %v1250_v28, %v1175_v27 }
 0x41f   : > { %1314 = vst [vmem:[%s2935_s8 + $0x78] sm:$0xff] %v1298_v32 }
 0x420   : > { %1304 = vst [vmem:[%s2935_s8 + $0x28] sm:$0xff] %v1288_v29 }
 0x425   : > { %v1253_v34 = vpop.f32.mrf.mxu0 }
 0x426   : > { %v1289_v35 = vadd.f32 %v1253_v34, %v1176_v33 }
 0x428   : > { %1305 = vst [vmem:[%s2935_s8 + $0x30] sm:$0xff] %v1289_v35 }
 0x42d   : > { %v1256_v37 = vpop.f32.mrf.mxu0 }
 0x42e   : > { %v1290_v38 = vadd.f32 %v1256_v37, %v1177_v36 }
 0x430   : > { %1306 = vst [vmem:[%s2935_s8 + $0x38] sm:$0xff] %v1290_v38 }
 0x435   : > { %v1259_v40 = vpop.f32.mrf.mxu0 }
 0x436   : > { %v1291_v41 = vadd.f32 %v1259_v40, %v1178_v39 }
 0x438   : > { %1307 = vst [vmem:[%s2935_s8 + $0x40] sm:$0xff] %v1291_v41 }
 0x43c   : > { %1318 = sbr.rel (%p1988_p7) target bundleno = 1529 (0x5f9), region = 101 }
 0x43d   : > { %v1262_v44 = vpop.f32.mrf.mxu0 }
 0x43e   : > { %v1292_v45 = vadd.f32 %v1262_v44, %v1179_v42 }
 0x440   : > { %1308 = vst [vmem:[%s2935_s8 + $0x48] sm:$0xff] %v1292_v45 }
 0x441   : > { %v1319_v46 = vld [vmem:[#allocation2] sm:$0xff]  ;;  %v1691_v27 = vld [vmem:[%s2935_s8 + $0x8] sm:$0xff]  ;;  %v1692_v41 = vld [vmem:[%s2935_s8 + $0x10] sm:$0xff] }
 0x442   : > { %v1320_v48 = vld [vmem:[%s2931_s4] sm:$0xff]  ;;  %1321 = vxpose.xlu0.b32.start.end [1/1] (short) %v1319_v46, 128 }
 0x443   : > { %1416 = vmatpush.msra.mxu0 %v1320_v48  ;;  %2047 = vmatpush.msra.mxu1 %v1320_v48  ;;  %v1690_v13 = vld [vmem:[%s2935_s8] sm:$0xff] }
 0x444   : > { %2048 = vmatpush.msra.mxu2 %v1320_v48  ;;  %2049 = vmatpush.msra.mxu3 %v1320_v48 }
 0x4e6   : > { %v1337_v50 = vpop.trf.xlu0 }
 0x4e7   : > { %1989 = vmatmul.msk.f32.vlgmr.msra.gmra.mxu0 %vm795_vm3, %v1337_v50 }
 0x4ee   : > { %v1338_v51 = vpop.trf.xlu0 }
 0x4ef   : > { %1990 = vmatmul.msk.f32.gmra.mxu0 %vm795_vm3, %v1338_v51 }
 0x4f6   : > { %v1339_v53 = vpop.trf.xlu0 }
 0x4f7   : > { %1991 = vmatmul.msk.f32.gmra.mxu0 %vm795_vm3, %v1339_v53 }
 0x4fe   : > { %v1340_v54 = vpop.trf.xlu0 }
 0x4ff   : > { %1992 = vmatmul.msk.f32.gmra.mxu0 %vm795_vm3, %v1340_v54 }
 0x506   : > { %v1341_v55 = vpop.trf.xlu0 }
 0x507   : > { %1993 = vmatmul.msk.f32.vlgmr.msra.gmra.mxu1 %vm795_vm3, %v1341_v55 }
 0x50e   : > { %v1342_v57 = vpop.trf.xlu0 }
 0x50f   : > { %1994 = vmatmul.msk.f32.gmra.mxu1 %vm795_vm3, %v1342_v57 }
 0x516   : > { %v1343_v58 = vpop.trf.xlu0 }
 0x517   : > { %1995 = vmatmul.msk.f32.gmra.mxu1 %vm795_vm3, %v1343_v58 }
 0x51e   : > { %v1344_v59 = vpop.trf.xlu0 }
 0x51f   : > { %1996 = vmatmul.msk.f32.gmra.mxu1 %vm795_vm3, %v1344_v59 }
 0x526   : > { %v1345_v60 = vpop.trf.xlu0 }
 0x527   : > { %1997 = vmatmul.msk.f32.vlgmr.msra.gmra.mxu2 %vm795_vm3, %v1345_v60  ;;  %v1693_v60 = vld [vmem:[%s2935_s8 + $0x18] sm:$0xff] }
 0x52e   : > { %v1346_v56 = vpop.trf.xlu0 }
 0x52f   : > { %1998 = vmatmul.msk.f32.gmra.mxu2 %vm795_vm3, %v1346_v56 }
 0x536   : > { %v1347_v52 = vpop.trf.xlu0 }
 0x537   : > { %1999 = vmatmul.msk.f32.gmra.mxu2 %vm795_vm3, %v1347_v52 }
 0x53e   : > { %v1348_v61 = vpop.trf.xlu0 }
 0x53f   : > { %2000 = vmatmul.msk.f32.gmra.mxu2 %vm795_vm3, %v1348_v61 }
 0x546   : > { %v1349_v47 = vpop.trf.xlu0 }
 0x547   : > { %2001 = vmatmul.msk.f32.vlgmr.msra.gmra.mxu3 %vm795_vm3, %v1349_v47 }
 0x54e   : > { %v1350_v43 = vpop.trf.xlu0 }
 0x54f   : > { %2002 = vmatmul.msk.f32.gmra.mxu3 %vm795_vm3, %v1350_v43 }
 0x556   : > { %v1351_v62 = vpop.trf.xlu0 }
 0x557   : > { %2003 = vmatmul.msk.f32.gmra.mxu3 %vm795_vm3, %v1351_v62 }
 0x55e   : > { %v1352_v63 = vpop.trf.xlu0 }
 0x55f   : > { %2004 = vmatmul.msk.f32.gmra.mxu3 %vm795_vm3, %v1352_v63 }
 0x564   : > { %v1418_v0 = vpop.f32.mrf.mxu0 }
 0x565   : > { %v1419_v1 = vadd.f32 1e-16, %v1418_v0 }
 0x567   : > { %2069 = vrcp.f32 %v1419_v1  ;;  %v1477_v7 = vand.u32 2147483648, %v1419_v1  ;;  %v1475_v9 = vand.u32 2147483647, %v1419_v1  ;;  %vm1471_vm11 = vweird.f32 %v1419_v1 }
 0x569   : > { %v1478_v12 = vor.u32 1.1754944e-38, %v1477_v7  ;;  %vm1476_vm15 = vcmp.eq.f32.partialorder %v1475_v9, 8.507059e+37 }
 0x56c   : > { %v1421_v2 = vpop.f32.mrf.mxu0 }
 0x56d   : > { %v2070_v3 = vpop.eup %2069  ;;  %v1422_v4 = vadd.f32 1e-16, %v1421_v2 }
 0x56e   : > { %v1467_v5 = vmul.f32 %v2070_v3, %v1419_v1  ;;  %vm1472_vm14 = vweird.f32 %v2070_v3 }
 0x56f   : > { %2071 = vrcp.f32 %v1422_v4  ;;  %vm1473_vm10 = vmor %vm1471_vm11, %vm1472_vm14  ;;  %v1491_v19 = vand.u32 2147483648, %v1422_v4  ;;  %v1489_v21 = vand.u32 2147483647, %v1422_v4  ;;  %vm1485_vm9 = vweird.f32 %v1422_v4 }
 0x570   : > { %v1468_v6 = vsub.f32 1.0, %v1467_v5 }
 0x571   : > { %v1492_v26 = vor.u32 1.1754944e-38, %v1491_v19  ;;  %vm1490_vm1 = vcmp.eq.f32.partialorder %v1489_v21, 8.507059e+37 }
 0x572   : > { %v1469_v8 = vmul.f32 %v2070_v3, %v1468_v6  ;;  %v1694_v6 = vld [vmem:[%s2935_s8 + $0x20] sm:$0xff] }
 0x574   : > { %v1470_v10 = vadd.f32 %v2070_v3, %v1469_v8  ;;  %v1424_v49 = vpop.f32.mrf.mxu0 }
 0x575   : > { %v2072_v11 = vpop.eup %2071  ;;  %v1425_v14 = vadd.f32 1e-16, %v1424_v49 }
 0x576   : > { %v1474_v15 = vsel %vm1473_vm10, %v2070_v3, %v1470_v10  ;;  %v1481_v16 = vmul.f32 %v2072_v11, %v1422_v4  ;;  %vm1486_vm0 = vweird.f32 %v2072_v11 }
 0x577   : > { %v1479_v17 = vsel %vm1476_vm15, %v1478_v12, %v1474_v15  ;;  %2073 = vrcp.f32 %v1425_v14  ;;  %vm1487_vm8 = vmor %vm1485_vm9, %vm1486_vm0  ;;  %v1505_v34 = vand.u32 2147483648, %v1425_v14  ;;  %v1503_v36 = vand.u32 2147483647, %v1425_v14 }
 0x578   : > { %v1706_v24 = vmul.f32 %v1690_v13, %v1479_v17  ;;  %v1482_v18 = vsub.f32 1.0, %v1481_v16  ;;  %vm1499_vm3 = vweird.f32 %v1425_v14 }
 0x579   : > { %v1506_v40 = vor.u32 1.1754944e-38, %v1505_v34  ;;  %vm1504_vm5 = vcmp.eq.f32.partialorder %v1503_v36, 8.507059e+37 }
 0x57a   : > { %1722 = vst [vmem:[%s2935_s8] sm:$0xff] %v1706_v24  ;;  %v1483_v20 = vmul.f32 %v2072_v11, %v1482_v18  ;;  %v1695_v18 = vld [vmem:[%s2935_s8 + $0x28] sm:$0xff] }
 0x57c   : > { %v1484_v22 = vadd.f32 %v2072_v11, %v1483_v20  ;;  %v1427_v23 = vpop.f32.mrf.mxu0 }
 0x57d   : > { %v2074_v25 = vpop.eup %2073  ;;  %v1428_v28 = vadd.f32 1e-16, %v1427_v23 }
 0x57e   : > { %v1488_v29 = vsel %vm1487_vm8, %v2072_v11, %v1484_v22  ;;  %v1495_v30 = vmul.f32 %v2074_v25, %v1425_v14  ;;  %vm1500_vm2 = vweird.f32 %v2074_v25 }
 0x57f   : > { %v1493_v31 = vsel %vm1490_vm1, %v1492_v26, %v1488_v29  ;;  %2075 = vrcp.f32 %v1428_v28  ;;  %vm1501_vm4 = vmor %vm1499_vm3, %vm1500_vm2  ;;  %v1519_v51 = vand.u32 2147483648, %v1428_v28  ;;  %v1517_v54 = vand.u32 2147483647, %v1428_v28 }
 0x580   : > { %v1707_v32 = vmul.f32 %v1691_v27, %v1493_v31  ;;  %v1496_v33 = vsub.f32 1.0, %v1495_v30  ;;  %vm1513_vm7 = vweird.f32 %v1428_v28 }
 0x581   : > { %v1520_v59 = vor.u32 1.1754944e-38, %v1519_v51  ;;  %vm1518_vm13 = vcmp.eq.f32.partialorder %v1517_v54, 8.507059e+37 }
 0x582   : > { %1723 = vst [vmem:[%s2935_s8 + $0x8] sm:$0xff] %v1707_v32  ;;  %v1497_v35 = vmul.f32 %v2074_v25, %v1496_v33  ;;  %v1696_v32 = vld [vmem:[%s2935_s8 + $0x30] sm:$0xff] }
 0x584   : > { %v1498_v37 = vadd.f32 %v2074_v25, %v1497_v35  ;;  %v1430_v38 = vpop.f32.mrf.mxu1 }
 0x585   : > { %v2076_v39 = vpop.eup %2075  ;;  %v1431_v42 = vadd.f32 1e-16, %v1430_v38 }
 0x586   : > { %v1502_v44 = vsel %vm1501_vm4, %v2074_v25, %v1498_v37  ;;  %v1509_v45 = vmul.f32 %v2076_v39, %v1428_v28  ;;  %vm1514_vm6 = vweird.f32 %v2076_v39 }
 0x587   : > { %v1507_v46 = vsel %vm1504_vm5, %v1506_v40, %v1502_v44  ;;  %2077 = vrcp.f32 %v1431_v42  ;;  %vm1515_vm12 = vmor %vm1513_vm7, %vm1514_vm6  ;;  %v1533_v63 = vand.u32 2147483648, %v1431_v42  ;;  %v1531_v1 = vand.u32 2147483647, %v1431_v42 }
 0x588   : > { %v1708_v48 = vmul.f32 %v1692_v41, %v1507_v46  ;;  %v1510_v50 = vsub.f32 1.0, %v1509_v45  ;;  %vm1527_vm11 = vweird.f32 %v1431_v42  ;;  %v1697_v46 = vld [vmem:[%s2935_s8 + $0x38] sm:$0xff] }
 0x589   : > { %v1534_v5 = vor.u32 1.1754944e-38, %v1533_v63  ;;  %vm1532_vm15 = vcmp.eq.f32.partialorder %v1531_v1, 8.507059e+37 }
 0x58a   : > { %1724 = vst [vmem:[%s2935_s8 + $0x10] sm:$0xff] %v1708_v48  ;;  %v1511_v53 = vmul.f32 %v2076_v39, %v1510_v50 }
 0x58c   : > { %v1512_v55 = vadd.f32 %v2076_v39, %v1511_v53  ;;  %v1433_v57 = vpop.f32.mrf.mxu1 }
 0x58d   : > { %v2078_v58 = vpop.eup %2077  ;;  %v1434_v56 = vadd.f32 1e-16, %v1433_v57 }
 0x58e   : > { %v1516_v52 = vsel %vm1515_vm12, %v2076_v39, %v1512_v55  ;;  %v1523_v61 = vmul.f32 %v2078_v58, %v1431_v42  ;;  %vm1528_vm14 = vweird.f32 %v2078_v58 }
 0x58f   : > { %v1521_v47 = vsel %vm1518_vm13, %v1520_v59, %v1516_v52  ;;  %2079 = vrcp.f32 %v1434_v56  ;;  %vm1529_vm10 = vmor %vm1527_vm11, %vm1528_vm14  ;;  %v1547_v12 = vand.u32 2147483648, %v1434_v56  ;;  %v1545_v14 = vand.u32 2147483647, %v1434_v56 }
 0x590   : > { %v1709_v43 = vmul.f32 %v1693_v60, %v1521_v47  ;;  %v1524_v62 = vsub.f32 1.0, %v1523_v61  ;;  %vm1541_vm9 = vweird.f32 %v1434_v56 }
 0x591   : > { %v1548_v24 = vor.u32 1.1754944e-38, %v1547_v12  ;;  %vm1546_vm1 = vcmp.eq.f32.partialorder %v1545_v14, 8.507059e+37 }
 0x592   : > { %1725 = vst [vmem:[%s2935_s8 + $0x18] sm:$0xff] %v1709_v43  ;;  %v1525_v0 = vmul.f32 %v2078_v58, %v1524_v62  ;;  %v1698_v62 = vld [vmem:[%s2935_s8 + $0x40] sm:$0xff] }
 0x594   : > { %v1526_v2 = vadd.f32 %v2078_v58, %v1525_v0  ;;  %v1436_v3 = vpop.f32.mrf.mxu1 }
 0x595   : > { %v2080_v4 = vpop.eup %2079  ;;  %v1437_v7 = vadd.f32 1e-16, %v1436_v3 }
 0x596   : > { %v1530_v8 = vsel %vm1529_vm10, %v2078_v58, %v1526_v2  ;;  %v1537_v9 = vmul.f32 %v2080_v4, %v1434_v56  ;;  %vm1542_vm0 = vweird.f32 %v2080_v4 }
 0x597   : > { %v1535_v10 = vsel %vm1532_vm15, %v1534_v5, %v1530_v8  ;;  %2081 = vrcp.f32 %v1437_v7  ;;  %vm1543_vm8 = vmor %vm1541_vm9, %vm1542_vm0  ;;  %v1561_v26 = vand.u32 2147483648, %v1437_v7  ;;  %v1559_v28 = vand.u32 2147483647, %v1437_v7 }
 0x598   : > { %v1710_v49 = vmul.f32 %v1694_v6, %v1535_v10  ;;  %v1538_v11 = vsub.f32 1.0, %v1537_v9  ;;  %vm1555_vm3 = vweird.f32 %v1437_v7 }
 0x599   : > { %v1562_v31 = vor.u32 1.1754944e-38, %v1561_v26  ;;  %vm1560_vm5 = vcmp.eq.f32.partialorder %v1559_v28, 8.507059e+37 }
 0x59a   : > { %1726 = vst [vmem:[%s2935_s8 + $0x20] sm:$0xff] %v1710_v49  ;;  %v1539_v13 = vmul.f32 %v2080_v4, %v1538_v11  ;;  %v1699_v11 = vld [vmem:[%s2935_s8 + $0x48] sm:$0xff] }
 0x59c   : > { %v1540_v15 = vadd.f32 %v2080_v4, %v1539_v13  ;;  %v1439_v16 = vpop.f32.mrf.mxu1 }
 0x59d   : > { %v2082_v17 = vpop.eup %2081  ;;  %v1440_v19 = vadd.f32 1e-16, %v1439_v16 }
 0x59e   : > { %v1544_v20 = vsel %vm1543_vm8, %v2080_v4, %v1540_v15  ;;  %v1551_v21 = vmul.f32 %v2082_v17, %v1437_v7  ;;  %vm1556_vm2 = vweird.f32 %v2082_v17 }
 0x59f   : > { %v1549_v22 = vsel %vm1546_vm1, %v1548_v24, %v1544_v20  ;;  %2083 = vrcp.f32 %v1440_v19  ;;  %vm1557_vm4 = vmor %vm1555_vm3, %vm1556_vm2  ;;  %v1575_v38 = vand.u32 2147483648, %v1440_v19  ;;  %v1573_v40 = vand.u32 2147483647, %v1440_v19 }
 0x5a0   : > { %v1711_v23 = vmul.f32 %v1695_v18, %v1549_v22  ;;  %v1552_v25 = vsub.f32 1.0, %v1551_v21  ;;  %vm1569_vm7 = vweird.f32 %v1440_v19 }
 0x5a1   : > { %v1576_v45 = vor.u32 1.1754944e-38, %v1575_v38  ;;  %vm1574_vm13 = vcmp.eq.f32.partialorder %v1573_v40, 8.507059e+37 }
 0x5a2   : > { %1727 = vst [vmem:[%s2935_s8 + $0x28] sm:$0xff] %v1711_v23  ;;  %v1553_v27 = vmul.f32 %v2082_v17, %v1552_v25  ;;  %v1700_v25 = vld [vmem:[%s2935_s8 + $0x50] sm:$0xff] }
 0x5a4   : > { %v1554_v29 = vadd.f32 %v2082_v17, %v1553_v27 }
 0x5a5   : > { %v2084_v30 = vpop.eup %2083 }
 0x5a6   : > { %v1558_v33 = vsel %vm1557_vm4, %v2082_v17, %v1554_v29  ;;  %v1565_v34 = vmul.f32 %v2084_v30, %v1440_v19  ;;  %vm1570_vm6 = vweird.f32 %v2084_v30 }
 0x5a7   : > { %v1563_v35 = vsel %vm1560_vm5, %v1562_v31, %v1558_v33  ;;  %vm1571_vm12 = vmor %vm1569_vm7, %vm1570_vm6 }
 0x5a8   : > { %v1712_v36 = vmul.f32 %v1696_v32, %v1563_v35  ;;  %v1566_v37 = vsub.f32 1.0, %v1565_v34 }
 0x5aa   : > { %1728 = vst [vmem:[%s2935_s8 + $0x30] sm:$0xff] %v1712_v36  ;;  %v1567_v39 = vmul.f32 %v2084_v30, %v1566_v37  ;;  %v1442_v41 = vpop.f32.mrf.mxu2 }
 0x5ab   : > { %v1443_v42 = vadd.f32 1e-16, %v1442_v41 }
 0x5ac   : > { %v1568_v44 = vadd.f32 %v2084_v30, %v1567_v39  ;;  %v1701_v39 = vld [vmem:[%s2935_s8 + $0x58] sm:$0xff] }
 0x5ad   : > { %2085 = vrcp.f32 %v1443_v42  ;;  %v1589_v59 = vand.u32 2147483648, %v1443_v42  ;;  %v1587_v56 = vand.u32 2147483647, %v1443_v42  ;;  %vm1583_vm11 = vweird.f32 %v1443_v42 }
 0x5ae   : > { %v1572_v48 = vsel %vm1571_vm12, %v2084_v30, %v1568_v44 }
 0x5af   : > { %v1577_v50 = vsel %vm1574_vm13, %v1576_v45, %v1572_v48  ;;  %v1590_v43 = vor.u32 1.1754944e-38, %v1589_v59  ;;  %vm1588_vm15 = vcmp.eq.f32.partialorder %v1587_v56, 8.507059e+37 }
 0x5b0   : > { %v1713_v51 = vmul.f32 %v1697_v46, %v1577_v50 }
 0x5b2   : > { %1729 = vst [vmem:[%s2935_s8 + $0x38] sm:$0xff] %v1713_v51  ;;  %v1445_v53 = vpop.f32.mrf.mxu2 }
 0x5b3   : > { %v2086_v54 = vpop.eup %2085  ;;  %v1446_v55 = vadd.f32 1e-16, %v1445_v53 }
 0x5b4   : > { %v1579_v57 = vmul.f32 %v2086_v54, %v1443_v42  ;;  %vm1584_vm14 = vweird.f32 %v2086_v54 }
 0x5b5   : > { %2087 = vrcp.f32 %v1446_v55  ;;  %vm1585_vm10 = vmor %vm1583_vm11, %vm1584_vm14  ;;  %v1603_v5 = vand.u32 2147483648, %v1446_v55  ;;  %v1601_v7 = vand.u32 2147483647, %v1446_v55  ;;  %vm1597_vm9 = vweird.f32 %v1446_v55 }
 0x5b6   : > { %v1580_v58 = vsub.f32 1.0, %v1579_v57 }
 0x5b7   : > { %v1604_v49 = vor.u32 1.1754944e-38, %v1603_v5  ;;  %vm1602_vm1 = vcmp.eq.f32.partialorder %v1601_v7, 8.507059e+37 }
 0x5b8   : > { %v1581_v60 = vmul.f32 %v2086_v54, %v1580_v58  ;;  %v1702_v58 = vld [vmem:[%s2935_s8 + $0x60] sm:$0xff] }
 0x5ba   : > { %v1582_v52 = vadd.f32 %v2086_v54, %v1581_v60  ;;  %v1448_v61 = vpop.f32.mrf.mxu2 }
 0x5bb   : > { %v2088_v47 = vpop.eup %2087  ;;  %v1449_v63 = vadd.f32 1e-16, %v1448_v61 }
 0x5bc   : > { %v1586_v0 = vsel %vm1585_vm10, %v2086_v54, %v1582_v52  ;;  %v1593_v1 = vmul.f32 %v2088_v47, %v1446_v55  ;;  %vm1598_vm0 = vweird.f32 %v2088_v47 }
 0x5bd   : > { %v1591_v2 = vsel %vm1588_vm15, %v1590_v43, %v1586_v0  ;;  %2089 = vrcp.f32 %v1449_v63  ;;  %vm1599_vm8 = vmor %vm1597_vm9, %vm1598_vm0  ;;  %v1617_v24 = vand.u32 2147483648, %v1449_v63  ;;  %v1615_v19 = vand.u32 2147483647, %v1449_v63 }
 0x5be   : > { %v1714_v3 = vmul.f32 %v1698_v62, %v1591_v2  ;;  %v1594_v4 = vsub.f32 1.0, %v1593_v1  ;;  %vm1611_vm3 = vweird.f32 %v1449_v63 }
 0x5bf   : > { %v1618_v23 = vor.u32 1.1754944e-38, %v1617_v24  ;;  %vm1616_vm5 = vcmp.eq.f32.partialorder %v1615_v19, 8.507059e+37 }
 0x5c0   : > { %1730 = vst [vmem:[%s2935_s8 + $0x40] sm:$0xff] %v1714_v3  ;;  %v1595_v6 = vmul.f32 %v2088_v47, %v1594_v4  ;;  %v1703_v4 = vld [vmem:[%s2935_s8 + $0x68] sm:$0xff] }
 0x5c2   : > { %v1596_v8 = vadd.f32 %v2088_v47, %v1595_v6  ;;  %v1451_v9 = vpop.f32.mrf.mxu2 }
 0x5c3   : > { %v2090_v10 = vpop.eup %2089  ;;  %v1452_v12 = vadd.f32 1e-16, %v1451_v9 }
 0x5c4   : > { %v1600_v13 = vsel %vm1599_vm8, %v2088_v47, %v1596_v8  ;;  %v1607_v14 = vmul.f32 %v2090_v10, %v1449_v63  ;;  %vm1612_vm2 = vweird.f32 %v2090_v10 }
 0x5c5   : > { %v1605_v15 = vsel %vm1602_vm1, %v1604_v49, %v1600_v13  ;;  %2091 = vrcp.f32 %v1452_v12  ;;  %vm1613_vm4 = vmor %vm1611_vm3, %vm1612_vm2  ;;  %v1631_v32 = vand.u32 2147483648, %v1452_v12  ;;  %v1629_v34 = vand.u32 2147483647, %v1452_v12 }
 0x5c6   : > { %v1715_v16 = vmul.f32 %v1699_v11, %v1605_v15  ;;  %v1608_v17 = vsub.f32 1.0, %v1607_v14  ;;  %vm1625_vm7 = vweird.f32 %v1452_v12 }
 0x5c7   : > { %v1632_v38 = vor.u32 1.1754944e-38, %v1631_v32  ;;  %vm1630_vm13 = vcmp.eq.f32.partialorder %v1629_v34, 8.507059e+37 }
 0x5c8   : > { %1731 = vst [vmem:[%s2935_s8 + $0x48] sm:$0xff] %v1715_v16  ;;  %v1609_v18 = vmul.f32 %v2090_v10, %v1608_v17  ;;  %v1704_v16 = vld [vmem:[%s2935_s8 + $0x70] sm:$0xff] }
 0x5ca   : > { %v1610_v20 = vadd.f32 %v2090_v10, %v1609_v18  ;;  %v1454_v21 = vpop.f32.mrf.mxu3 }
 0x5cb   : > { %v2092_v22 = vpop.eup %2091  ;;  %v1455_v26 = vadd.f32 1e-16, %v1454_v21 }
 0x5cc   : > { %v1614_v27 = vsel %vm1613_vm4, %v2090_v10, %v1610_v20  ;;  %v1621_v28 = vmul.f32 %v2092_v22, %v1452_v12  ;;  %vm1626_vm6 = vweird.f32 %v2092_v22 }
 0x5cd   : > { %v1619_v29 = vsel %vm1616_vm5, %v1618_v23, %v1614_v27  ;;  %2093 = vrcp.f32 %v1455_v26  ;;  %vm1627_vm12 = vmor %vm1625_vm7, %vm1626_vm6  ;;  %v1645_v48 = vand.u32 2147483648, %v1455_v26  ;;  %v1643_v51 = vand.u32 2147483647, %v1455_v26  ;;  %v1705_v27 = vld [vmem:[%s2935_s8 + $0x78] sm:$0xff] }
 0x5ce   : > { %v1716_v30 = vmul.f32 %v1700_v25, %v1619_v29  ;;  %v1622_v31 = vsub.f32 1.0, %v1621_v28  ;;  %vm1639_vm11 = vweird.f32 %v1455_v26 }
 0x5cf   : > { %v1646_v57 = vor.u32 1.1754944e-38, %v1645_v48  ;;  %vm1644_vm15 = vcmp.eq.f32.partialorder %v1643_v51, 8.507059e+37 }
 0x5d0   : > { %1732 = vst [vmem:[%s2935_s8 + $0x50] sm:$0xff] %v1716_v30  ;;  %v1623_v33 = vmul.f32 %v2092_v22, %v1622_v31 }
 0x5d2   : > { %v1624_v35 = vadd.f32 %v2092_v22, %v1623_v33  ;;  %v1457_v36 = vpop.f32.mrf.mxu3 }
 0x5d3   : > { %v2094_v37 = vpop.eup %2093  ;;  %v1458_v40 = vadd.f32 1e-16, %v1457_v36 }
 0x5d4   : > { %v1628_v41 = vsel %vm1627_vm12, %v2092_v22, %v1624_v35  ;;  %v1635_v42 = vmul.f32 %v2094_v37, %v1455_v26  ;;  %vm1640_vm14 = vweird.f32 %v2094_v37 }
 0x5d5   : > { %v1633_v44 = vsel %vm1630_vm13, %v1632_v38, %v1628_v41  ;;  %2095 = vrcp.f32 %v1458_v40  ;;  %vm1641_vm10 = vmor %vm1639_vm11, %vm1640_vm14  ;;  %v1659_v43 = vand.u32 2147483648, %v1458_v40  ;;  %v1657_v63 = vand.u32 2147483647, %v1458_v40 }
 0x5d6   : > { %v1717_v45 = vmul.f32 %v1701_v39, %v1633_v44  ;;  %v1636_v46 = vsub.f32 1.0, %v1635_v42  ;;  %vm1653_vm9 = vweird.f32 %v1458_v40 }
 0x5d7   : > { %v1660_v3 = vor.u32 1.1754944e-38, %v1659_v43  ;;  %vm1658_vm1 = vcmp.eq.f32.partialorder %v1657_v63, 8.507059e+37 }
 0x5d8   : > { %1733 = vst [vmem:[%s2935_s8 + $0x58] sm:$0xff] %v1717_v45  ;;  %v1637_v50 = vmul.f32 %v2094_v37, %v1636_v46 }
 0x5da   : > { %v1638_v53 = vadd.f32 %v2094_v37, %v1637_v50  ;;  %v1460_v54 = vpop.f32.mrf.mxu3 }
 0x5db   : > { %v2096_v55 = vpop.eup %2095  ;;  %v1461_v59 = vadd.f32 1e-16, %v1460_v54 }
 0x5dc   : > { %v1642_v60 = vsel %vm1641_vm10, %v2094_v37, %v1638_v53  ;;  %v1649_v56 = vmul.f32 %v2096_v55, %v1458_v40  ;;  %vm1654_vm0 = vweird.f32 %v2096_v55 }
 0x5dd   : > { %v1647_v52 = vsel %vm1644_vm15, %v1646_v57, %v1642_v60  ;;  %2097 = vrcp.f32 %v1461_v59  ;;  %vm1655_vm8 = vmor %vm1653_vm9, %vm1654_vm0  ;;  %v1673_v49 = vand.u32 2147483648, %v1461_v59  ;;  %v1671_v12 = vand.u32 2147483647, %v1461_v59 }
 0x5de   : > { %v1718_v61 = vmul.f32 %v1702_v58, %v1647_v52  ;;  %v1650_v47 = vsub.f32 1.0, %v1649_v56  ;;  %vm1667_vm3 = vweird.f32 %v1461_v59 }
 0x5df   : > { %v1674_v15 = vor.u32 1.1754944e-38, %v1673_v49  ;;  %vm1672_vm5 = vcmp.eq.f32.partialorder %v1671_v12, 8.507059e+37 }
 0x5e0   : > { %1734 = vst [vmem:[%s2935_s8 + $0x60] sm:$0xff] %v1718_v61  ;;  %v1651_v62 = vmul.f32 %v2096_v55, %v1650_v47 }
 0x5e2   : > { %v1652_v0 = vadd.f32 %v2096_v55, %v1651_v62  ;;  %v1463_v1 = vpop.f32.mrf.mxu3 }
 0x5e3   : > { %v2098_v2 = vpop.eup %2097  ;;  %v1464_v5 = vadd.f32 1e-16, %v1463_v1 }
 0x5e4   : > { %v1656_v6 = vsel %vm1655_vm8, %v2096_v55, %v1652_v0  ;;  %v1663_v7 = vmul.f32 %v2098_v2, %v1461_v59  ;;  %vm1668_vm2 = vweird.f32 %v2098_v2 }
 0x5e5   : > { %v1661_v8 = vsel %vm1658_vm1, %v1660_v3, %v1656_v6  ;;  %2099 = vrcp.f32 %v1464_v5  ;;  %vm1669_vm4 = vmor %vm1667_vm3, %vm1668_vm2  ;;  %v1687_v21 = vand.u32 2147483648, %v1464_v5  ;;  %v1685_v23 = vand.u32 2147483647, %v1464_v5 }
 0x5e6   : > { %v1719_v9 = vmul.f32 %v1703_v4, %v1661_v8  ;;  %v1664_v10 = vsub.f32 1.0, %v1663_v7  ;;  %vm1681_vm7 = vweird.f32 %v1464_v5 }
 0x5e7   : > { %v1688_v26 = vor.u32 1.1754944e-38, %v1687_v21  ;;  %vm1686_vm13 = vcmp.eq.f32.partialorder %v1685_v23, 8.507059e+37 }
 0x5e8   : > { %1735 = vst [vmem:[%s2935_s8 + $0x68] sm:$0xff] %v1719_v9  ;;  %v1665_v11 = vmul.f32 %v2098_v2, %v1664_v10 }
 0x5ea   : > { %v1666_v13 = vadd.f32 %v2098_v2, %v1665_v11 }
 0x5eb   : > { %v2100_v14 = vpop.eup %2099 }
 0x5ec   : > { %v1670_v17 = vsel %vm1669_vm4, %v2098_v2, %v1666_v13  ;;  %v1677_v24 = vmul.f32 %v2100_v14, %v1464_v5  ;;  %vm1682_vm6 = vweird.f32 %v2100_v14 }
 0x5ed   : > { %v1675_v18 = vsel %vm1672_vm5, %v1674_v15, %v1670_v17  ;;  %vm1683_vm12 = vmor %vm1681_vm7, %vm1682_vm6 }
 0x5ee   : > { %v1720_v19 = vmul.f32 %v1704_v16, %v1675_v18  ;;  %v1678_v20 = vsub.f32 1.0, %v1677_v24 }
 0x5f0   : > { %1736 = vst [vmem:[%s2935_s8 + $0x70] sm:$0xff] %v1720_v19  ;;  %v1679_v22 = vmul.f32 %v2100_v14, %v1678_v20 }
 0x5f2   : > { %v1680_v25 = vadd.f32 %v2100_v14, %v1679_v22 }
 0x5f4   : > { %v1684_v28 = vsel %vm1683_vm12, %v2100_v14, %v1680_v25 }
 0x5f5   : > { %v1689_v29 = vsel %vm1686_vm13, %v1688_v26, %v1684_v28 }
 0x5f6   : > { %v1721_v30 = vmul.f32 %v1705_v27, %v1689_v29 }
 0x5f8   : > { %1737 = vst [vmem:[%s2935_s8 + $0x78] sm:$0xff] %v1721_v30 }
 0x5f9 PF: > { %s18_s27 = sadd.s32 1, %s2107_s27  }
 0x5fa   : > { %p15_p8 = scmp.ge.s32.totalorder %s18_s27, 4  }
 0x5fc   :  { %17 = sbr.rel (!%p15_p8) target bundleno = 1 (0x1), region = 141 }

// kernel: transformer_conv.4
= control target key start
LH: loop header
LB: loop body
LE: loop exit
PB: predicated region body
PF: predicated region fallthrough
CT: control target
= control target key end

     0   :  { %s2537_s24 = smov 0   ;;  %s3639_s0 = inlined_call_operand.vmem [shape: bf16[128,384], index: 0, kind: input, shape index: {}]   ;;  %s3640_s1 = inlined_call_operand.vmem [shape: f32[256,16], index: 1, kind: input, shape index: {}]   ;;  %s3641_s2 = inlined_call_operand.vmem [shape: f32[16,128], index: 2, kind: input, shape index: {}]   ;;  %s3642_s3 = inlined_call_operand.vmem [shape: f32[128,8], index: 3, kind: input, shape index: {}]   ;;  %s3643_s4 = inlined_call_operand.vmem [shape: s32[256,1], index: 4, kind: input, shape index: {}]   ;;  %s3644_s5 = inlined_call_operand.vmem [shape: s32[256,1], index: 5, kind: input, shape index: {}]   ;;  %s3645_s6 = inlined_call_operand.vmem [shape: f32[8,256], index: 6, kind: output, shape index: {0}]   ;;  %s3646_s7 = inlined_call_operand.vmem [shape: f32[8,128], index: 7, kind: output, shape index: {1}]  }
   0x1 LB: > { %s2543_s25 = sadd.s32 4294967295, %s2484_s24   ;;  %p2135_p0 = scmp.ge.s32.totalorder %s2484_s24, 1  ;;  %s2484_s24 = sphi %s2537_s24, %s18_s24  }
   0x2   : > { %p211_p1 = scmp.lt.s32.totalorder %s2484_s24, 3 }
   0x4   : > { %p2547_p2 = pnand %p2135_p0, %p211_p1 }
   0x5   : > { %p2136_p3 = scmp.ne.s32.totalorder (!%p2547_p2), %s2543_s25, 0 }
   0x6   : > { %215 = sbr.rel (%p2547_p2) target bundleno = 33 (0x21), region = 12 }
   0xb   : > { %219 = sbr.rel (%p2136_p3) target bundleno = 33 (0x21), region = 16 }
  0x10   : > { %v278_v0 = vld [vmem:[%s3639_s0] sm:$0xff]  ;;  %v280_v1 = vld [vmem:[%s3639_s0 + $0xc] sm:$0xff]  ;;  %v282_v2 = vld [vmem:[%s3639_s0 + $0x18] sm:$0xff] }
  0x11   : > { %279 = vst [vmem:[#allocation2] sm:$0xff] %v278_v0  ;;  %v284_v3 = vld [vmem:[%s3639_s0 + $0x24] sm:$0xff]  ;;  %v286_v4 = vld [vmem:[%s3639_s0 + $0x30] sm:$0xff]  ;;  %v288_v5 = vld [vmem:[%s3639_s0 + $0x3c] sm:$0xff] }
  0x12   : > { %281 = vst [vmem:[#allocation2 + $0x8] sm:$0xff] %v280_v1  ;;  %v290_v6 = vld [vmem:[%s3639_s0 + $0x48] sm:$0xff]  ;;  %v292_v7 = vld [vmem:[%s3639_s0 + $0x54] sm:$0xff]  ;;  %v294_v8 = vld [vmem:[%s3639_s0 + $0x60] sm:$0xff] }
  0x13   : > { %283 = vst [vmem:[#allocation2 + $0x10] sm:$0xff] %v282_v2  ;;  %v296_v9 = vld [vmem:[%s3639_s0 + $0x6c] sm:$0xff]  ;;  %v298_v10 = vld [vmem:[%s3639_s0 + $0x78] sm:$0xff]  ;;  %v300_v11 = vld [vmem:[%s3639_s0 + $0x84] sm:$0xff] }
  0x14   : > { %285 = vst [vmem:[#allocation2 + $0x18] sm:$0xff] %v284_v3  ;;  %v302_v12 = vld [vmem:[%s3639_s0 + $0x90] sm:$0xff]  ;;  %v304_v13 = vld [vmem:[%s3639_s0 + $0x9c] sm:$0xff]  ;;  %v306_v14 = vld [vmem:[%s3639_s0 + $0xa8] sm:$0xff] }
  0x15   : > { %287 = vst [vmem:[#allocation2 + $0x20] sm:$0xff] %v286_v4  ;;  %v308_v15 = vld [vmem:[%s3639_s0 + $0xb4] sm:$0xff] }
  0x16   : > { %289 = vst [vmem:[#allocation2 + $0x28] sm:$0xff] %v288_v5 }
  0x17   : > { %291 = vst [vmem:[#allocation2 + $0x30] sm:$0xff] %v290_v6 }
  0x18   : > { %293 = vst [vmem:[#allocation2 + $0x38] sm:$0xff] %v292_v7 }
  0x19   : > { %295 = vst [vmem:[#allocation2 + $0x40] sm:$0xff] %v294_v8 }
  0x1a   : > { %297 = vst [vmem:[#allocation2 + $0x48] sm:$0xff] %v296_v9 }
  0x1b   : > { %299 = vst [vmem:[#allocation2 + $0x50] sm:$0xff] %v298_v10 }
  0x1c   : > { %301 = vst [vmem:[#allocation2 + $0x58] sm:$0xff] %v300_v11 }
  0x1d   : > { %303 = vst [vmem:[#allocation2 + $0x60] sm:$0xff] %v302_v12 }
  0x1e   : > { %305 = vst [vmem:[#allocation2 + $0x68] sm:$0xff] %v304_v13 }
  0x1f   : > { %307 = vst [vmem:[#allocation2 + $0x70] sm:$0xff] %v306_v14 }
  0x20   : > { %309 = vst [vmem:[#allocation2 + $0x78] sm:$0xff] %v308_v15 }
  0x21 PF: > { %355 = sbr.rel (%p2547_p2) target bundleno = 1024 (0x400), region = 78  ;;  %s2139_s16 = sshll.u32 (!%p2547_p2), %s2543_s25, 4 }
  0x22   : > { %p413_p4 = scmp.lt.s32.totalorder (!%p2547_p2), %s2543_s25, 1  ;;  %p396_p5 = scmp.lt.s32.totalorder (!%p2547_p2), %s2139_s16, 31 }
  0x23   : > { %p2146_p6 = scmp.ne.s32.totalorder (!%p2547_p2), %s2543_s25, 0 }
  0x26   : > { %s414_s17 = scalar_select %p413_p4, %s2543_s25, 1 }
  0x27   : > { %s3701_s16 = smov (!%p396_p5, %s2139_s16), 31  ;;  %420 = sbr.rel (%p2146_p6) target bundleno = 46 (0x2e), region = 86 }
  0x28   : > { %s2145_s18 = sshll.u32 %s414_s17, 3  ;;  %s2140_s19 = sshll.u32 %s3701_s16, 3 }
  0x29   : > { %s2610_s22 = scalar_lea.vmem %s3645_s6, %s2145_s18  ;;  %s2615_s26 = scalar_lea.vmem %s3640_s1, %s2140_s19 }
  0x2a   : > { %s2620_s30 = scalar_lea.vmem %s3643_s4, %s2140_s19  ;;  %s2625_s10 = scalar_lea.vmem %s3644_s5, %s2140_s19 }
  0x2c   : > { %v2486_v16 = vmov -1e+30  }
  0x2d   : > { %421 = vst [vmem:[%s3646_s7] sm:$0xff] %v2486_v16 }
  0x2e PF: > { %v428_v17 = vld [vmem:[%s2620_s30 + $0x20] sm:$0xff]  ;;  %v426_v18 = vld [vmem:[%s2620_s30 + $0x10] sm:$0xff]  ;;  %v2487_v20 = vmov 0   ;;  %v429_v21 = vld [vmem:[%s2620_s30 + $0x28] sm:$0xff]  ;;  %vm3651_vm3 = vcmask 130048  }
  0x2f   : > { %v424_v19 = vld [vmem:[%s2620_s30] sm:$0xff]  ;;  %2350 = vset.pattern.permute.xlu2 %v2487_v20  ;;  %2349 = vset.pattern.permute.xlu1 %v2487_v20  ;;  %v427_v22 = vld [vmem:[%s2620_s30 + $0x18] sm:$0xff]  ;;  %v425_v23 = vld [vmem:[%s2620_s30 + $0x8] sm:$0xff] }
  0x30   : > { %2348 = vset.pattern.permute.xlu0 %v2487_v20  ;;  %453 = vperm.xlu2 %2350, %v428_v17   ;;  %v432_v24 = vld [vmem:[%s2620_s30 + $0x40] sm:$0xff]  ;;  %v431_v25 = vld [vmem:[%s2620_s30 + $0x38] sm:$0xff]  ;;  %v430_v26 = vld [vmem:[%s2620_s30 + $0x30] sm:$0xff] }
  0x31   : > { %447 = vperm.xlu1 %2349, %v426_v18   ;;  %441 = vperm.xlu0 %2348, %v424_v19   ;;  %v435_v27 = vld [vmem:[%s2620_s30 + $0x58] sm:$0xff]  ;;  %v434_v28 = vld [vmem:[%s2620_s30 + $0x50] sm:$0xff]  ;;  %v433_v29 = vld [vmem:[%s2620_s30 + $0x48] sm:$0xff] }
  0x32   : > { %v438_v30 = vld [vmem:[%s2620_s30 + $0x70] sm:$0xff]  ;;  %v437_v31 = vld [vmem:[%s2620_s30 + $0x68] sm:$0xff]  ;;  %v436_v32 = vld [vmem:[%s2620_s30 + $0x60] sm:$0xff] }
  0x33   : > { %v545_v33 = vld [vmem:[%s2625_s10 + $0x8] sm:$0xff]  ;;  %v544_v34 = vld [vmem:[%s2625_s10] sm:$0xff]  ;;  %v439_v35 = vld [vmem:[%s2620_s30 + $0x78] sm:$0xff] }
  0x34   : > { %v548_v36 = vld [vmem:[%s2625_s10 + $0x20] sm:$0xff]  ;;  %v547_v37 = vld [vmem:[%s2625_s10 + $0x18] sm:$0xff]  ;;  %v546_v38 = vld [vmem:[%s2625_s10 + $0x10] sm:$0xff] }
  0x35   : > { %v551_v39 = vld [vmem:[%s2625_s10 + $0x38] sm:$0xff]  ;;  %v550_v40 = vld [vmem:[%s2625_s10 + $0x30] sm:$0xff]  ;;  %v549_v41 = vld [vmem:[%s2625_s10 + $0x28] sm:$0xff] }
  0x36   : > { %v2209_v42 = vld [vmem:[#allocation2 + $0x70] sm:$0xf]  ;;  %v2300_v43 = vld [vmem:[#allocation2 + $0x74] sm:$0xf0]  ;;  %v2205_v44 = vld [vmem:[#allocation2 + $0x60] sm:$0xf] }
  0x37   : > { %v2210_v45 = vor.u32 %v2300_v43, %v2209_v42  ;;  %v2299_v46 = vld [vmem:[#allocation2 + $0x64] sm:$0xf0]  ;;  %v554_v47 = vld [vmem:[%s2625_s10 + $0x50] sm:$0xff]  ;;  %v552_v49 = vld [vmem:[%s2625_s10 + $0x40] sm:$0xff] }
  0x38   : > { %456 = vperm.xlu2 %2350, %v429_v21   ;;  %v553_v48 = vld [vmem:[%s2625_s10 + $0x48] sm:$0xff]  ;;  %v2206_v50 = vor.u32 %v2299_v46, %v2205_v44  ;;  %v2201_v51 = vld [vmem:[#allocation2 + $0x50] sm:$0xf]  ;;  %v2298_v52 = vld [vmem:[#allocation2 + $0x54] sm:$0xf0] }
  0x39   : > { %450 = vperm.xlu1 %2349, %v427_v22   ;;  %444 = vperm.xlu0 %2348, %v425_v23   ;;  %v2197_v53 = vld [vmem:[#allocation2 + $0x40] sm:$0xf]  ;;  %v2202_v54 = vor.u32 %v2298_v52, %v2201_v51  ;;  %v2297_v55 = vld [vmem:[#allocation2 + $0x44] sm:$0xf0]  ;;  %v555_v58 = vld [vmem:[%s2625_s10 + $0x58] sm:$0xff] }
  0x3a   : > { %728 = vmatpush.bf16.msra.mxu0 %v2210_v45  ;;  %v557_v56 = vld [vmem:[%s2625_s10 + $0x68] sm:$0xff]  ;;  %v556_v57 = vld [vmem:[%s2625_s10 + $0x60] sm:$0xff]  ;;  %v2198_v59 = vor.u32 %v2297_v55, %v2197_v53  ;;  %v2193_v60 = vld [vmem:[#allocation2 + $0x30] sm:$0xf]  ;;  %v2488_v46 = vmov 1.0|1.0  }
  0x3b   : > { %v2296_v61 = vld [vmem:[#allocation2 + $0x34] sm:$0xf0]  ;;  %v2189_v62 = vld [vmem:[#allocation2 + $0x20] sm:$0xf]  ;;  %v2295_v0 = vld [vmem:[#allocation2 + $0x24] sm:$0xf0] }
  0x3c   : > { %v2194_v63 = vor.u32 %v2296_v61, %v2193_v60  ;;  %v559_v1 = vld [vmem:[%s2625_s10 + $0x78] sm:$0xff]  ;;  %v558_v2 = vld [vmem:[%s2625_s10 + $0x70] sm:$0xff]  ;;  %v2190_v3 = vor.u32 %v2295_v0, %v2189_v62  ;;  %v2181_v6 = vld [vmem:[#allocation2] sm:$0xf] }
  0x3d   : > { %v2185_v4 = vld [vmem:[#allocation2 + $0x10] sm:$0xf]  ;;  %v2294_v5 = vld [vmem:[#allocation2 + $0x14] sm:$0xf0]  ;;  %v2293_v8 = vld [vmem:[#allocation2 + $0x4] sm:$0xf0] }
  0x3e   : > { %729 = vmatpush.bf16.msra.mxu0 %v2206_v50  ;;  %v2186_v7 = vor.u32 %v2294_v5, %v2185_v4  ;;  %v2182_v9 = vor.u32 %v2293_v8, %v2181_v6  ;;  %v2273_v10 = vld [vmem:[#allocation2 + $0x74] sm:$0xf]  ;;  %v2308_v11 = vld [vmem:[#allocation2 + $0x78] sm:$0xf0]  ;;  %v2269_v13 = vld [vmem:[#allocation2 + $0x64] sm:$0xf] }
  0x3f   : > { %v2274_v12 = vor.u32 %v2308_v11, %v2273_v10  ;;  %v2307_v14 = vld [vmem:[#allocation2 + $0x68] sm:$0xf0]  ;;  %v2265_v16 = vld [vmem:[#allocation2 + $0x54] sm:$0xf]  ;;  %v2306_v17 = vld [vmem:[#allocation2 + $0x58] sm:$0xf0] }
  0x40   : > { %465 = vperm.xlu2 %2350, %v432_v24   ;;  %v2270_v15 = vor.u32 %v2307_v14, %v2269_v13  ;;  %v2261_v18 = vld [vmem:[#allocation2 + $0x44] sm:$0xf]  ;;  %v2266_v19 = vor.u32 %v2306_v17, %v2265_v16  ;;  %v2305_v21 = vld [vmem:[#allocation2 + $0x48] sm:$0xf0]  ;;  %v2257_v24 = vld [vmem:[#allocation2 + $0x34] sm:$0xf] }
  0x41   : > { %462 = vperm.xlu1 %2349, %v431_v25   ;;  %459 = vperm.xlu0 %2348, %v430_v26   ;;  %v2262_v23 = vor.u32 %v2305_v21, %v2261_v18  ;;  %v2304_v25 = vld [vmem:[#allocation2 + $0x38] sm:$0xf0]  ;;  %v793_v51 = vld [vmem:[%s2615_s26] sm:$0xff]  ;;  %v795_v61 = vld [vmem:[%s2615_s26 + $0x10] sm:$0xff]  ;;  %v3675_v13 = vmov 0 }
  0x42   : > { %730 = vmatpush.bf16.msra.mxu0 %v2202_v54  ;;  %973 = vmatpush.bf16.msra.mxu2 %v2274_v12  ;;  %v2258_v26 = vor.u32 %v2304_v25, %v2257_v24  ;;  %v797_v4 = vld [vmem:[%s2615_s26 + $0x20] sm:$0xff]  ;;  %v799_v10 = vld [vmem:[%s2615_s26 + $0x30] sm:$0xff]  ;;  %v800_v14 = vld [vmem:[%s2615_s26 + $0x38] sm:$0xff] }
  0x43   : > { %v801_v16 = vld [vmem:[%s2615_s26 + $0x40] sm:$0xff]  ;;  %v802_v21 = vld [vmem:[%s2615_s26 + $0x48] sm:$0xff] }
  0x46   : > { %731 = vmatpush.bf16.msra.mxu0 %v2198_v59  ;;  %974 = vmatpush.bf16.msra.mxu2 %v2270_v15  ;;  %v3677_v15 = vmov 0 }
  0x48   : > { %474 = vperm.xlu2 %2350, %v435_v27   ;;  %v2253_v27 = vld [vmem:[#allocation2 + $0x24] sm:$0xf] }
  0x49   : > { %471 = vperm.xlu1 %2349, %v434_v28   ;;  %468 = vperm.xlu0 %2348, %v433_v29   ;;  %v2303_v28 = vld [vmem:[#allocation2 + $0x28] sm:$0xf0] }
  0x4a   : > { %732 = vmatpush.bf16.msra.mxu0 %v2194_v63  ;;  %975 = vmatpush.bf16.msra.mxu2 %v2266_v19 }
  0x4e   : > { %733 = vmatpush.bf16.msra.mxu0 %v2190_v3  ;;  %976 = vmatpush.bf16.msra.mxu2 %v2262_v23  ;;  %v803_v23 = vld [vmem:[%s2615_s26 + $0x50] sm:$0xff] }
  0x50   : > { %483 = vperm.xlu2 %2350, %v438_v30   ;;  %v2254_v30 = vor.u32 %v2303_v28, %v2253_v27  ;;  %v3685_v27 = vmov 0  ;;  %v804_v28 = vld [vmem:[%s2615_s26 + $0x58] sm:$0xff] }
  0x51   : > { %480 = vperm.xlu1 %2349, %v437_v31   ;;  %477 = vperm.xlu0 %2348, %v436_v32  }
  0x52   : > { %734 = vmatpush.bf16.msra.mxu0 %v2186_v7  ;;  %977 = vmatpush.bf16.msra.mxu2 %v2258_v26  ;;  %v3683_v26 = vmov 0 }
  0x56   : > { %735 = vmatpush.bf16.msra.mxu0 %v2182_v9  ;;  %978 = vmatpush.bf16.msra.mxu2 %v2254_v30  ;;  %v798_v9 = vld [vmem:[%s2615_s26 + $0x28] sm:$0xff]  ;;  %v1053_v30 = vld [vmem:[%s3642_s3 + $0x78] sm:$0xff] }
  0x57   : > { %1054 = vmatpush.msra.mxu3 %v1053_v30 }
  0x58   : > { %564 = vperm.xlu2 %2350, %v545_v33   ;;  %v422_v33 = vlaneseq }
  0x59   : > { %561 = vperm.xlu1 %2349, %v544_v34   ;;  %486 = vperm.xlu0 %2348, %v439_v35   ;;  %v2249_v34 = vld [vmem:[#allocation2 + $0x14] sm:$0xf]  ;;  %v2302_v35 = vld [vmem:[#allocation2 + $0x18] sm:$0xf0] }
  0x60   : > { %573 = vperm.xlu2 %2350, %v548_v36   ;;  %v2250_v36 = vor.u32 %v2302_v35, %v2249_v34  ;;  %v2013_v34 = vld [vmem:[%s3646_s7 + $0x7] sm:$0x1] }
  0x61   : > { %570 = vperm.xlu1 %2349, %v547_v37   ;;  %567 = vperm.xlu0 %2348, %v546_v38   ;;  %v2245_v37 = vld [vmem:[#allocation2 + $0x4] sm:$0xf]  ;;  %v2301_v38 = vld [vmem:[#allocation2 + $0x8] sm:$0xf0] }
  0x62   : > { %979 = vmatpush.bf16.msra.mxu2 %v2250_v36  ;;  %v1051_v36 = vld [vmem:[%s3642_s3 + $0x68] sm:$0xff] }
  0x68   : > { %582 = vperm.xlu2 %2350, %v551_v39   ;;  %v2666_v39 = vand.u32 127, %v422_v33 }
  0x69   : > { %579 = vperm.xlu1 %2349, %v550_v40   ;;  %576 = vperm.xlu0 %2348, %v549_v41   ;;  %v2246_v40 = vor.u32 %v2301_v38, %v2245_v37  ;;  %v806_v37 = vld [vmem:[%s2615_s26 + $0x68] sm:$0xff]  ;;  %v1050_v38 = vld [vmem:[%s3642_s3 + $0x60] sm:$0xff] }
  0x6b   : > { %980 = vmatpush.bf16.msra.mxu2 %v2246_v40  ;;  %v1049_v40 = vld [vmem:[%s3642_s3 + $0x58] sm:$0xff] }
  0x70   : > { %591 = vperm.xlu2 %2350, %v554_v47   ;;  %v810_v47 = vld [vmem:[%s3641_s2 + $0x8] sm:$0xff] }
  0x71   : > { %588 = vperm.xlu1 %2349, %v553_v48   ;;  %585 = vperm.xlu0 %2348, %v552_v49   ;;  %v809_v48 = vld [vmem:[%s3641_s2] sm:$0xff] }
  0x72   : > { %874 = vmatpush.msra.mxu1 %v810_v47  ;;  %v1046_v47 = vld [vmem:[%s3642_s3 + $0x40] sm:$0xff] }
  0x74   : > { %875 = vmatpush.msra.mxu1 %v809_v48  ;;  %v1045_v48 = vld [vmem:[%s3642_s3 + $0x38] sm:$0xff] }
  0x75   : > { %2227 = vmatmul.msk.f32.vlgmr.msra.gmra.mxu1 %vm3651_vm3, %v793_v51 }
  0x76   : > { %2312 = vmatpush.lsf.msrb.mxu1 %v1053_v30 }
  0x78   : > { %600 = vperm.xlu2 %2350, %v557_v56  }
  0x79   : > { %597 = vperm.xlu1 %2349, %v556_v57   ;;  %594 = vperm.xlu0 %2348, %v555_v58   ;;  %v794_v57 = vld [vmem:[%s2615_s26 + $0x8] sm:$0xff] }
  0x7d   : > { %2228 = vmatmul.msk.f32.gmra.mxu1 %vm3651_vm3, %v794_v57  ;;  %v1041_v57 = vld [vmem:[%s3642_s3 + $0x18] sm:$0xff] }
  0x81   : > { %606 = vperm.xlu1 %2349, %v559_v1   ;;  %603 = vperm.xlu0 %2348, %v558_v2   ;;  %v796_v2 = vld [vmem:[%s2615_s26 + $0x18] sm:$0xff] }
  0x85   : > { %2229 = vmatmul.msk.f32.gmra.mxu1 %vm3651_vm3, %v795_v61  ;;  %v1038_v61 = vld [vmem:[%s3642_s3] sm:$0xff] }
  0x8a   : > { %v454_v22 = vpop.permute.xlu2 %453 }
  0x8b   : > { %vm2721_vm7 = vcmp.eq.s32.totalorder %v454_v22, %v2666_v39  ;;  %v3681_v22 = vmov 0 }
  0x8d   : > { %2230 = vmatmul.msk.f32.gmra.mxu1 %vm3651_vm3, %v796_v2 }
  0x92   : > { %v457_v29 = vpop.permute.xlu2 %456 }
  0x93   : > { %vm2726_vm8 = vcmp.eq.s32.totalorder %v457_v29, %v2666_v39  ;;  %v805_v29 = vld [vmem:[%s2615_s26 + $0x60] sm:$0xff] }
  0x94   : > { %vm2215_vm11 = vmpackc.low %vm2726_vm8, %vm2721_vm7 }
  0x95   : > { %2231 = vmatmul.msk.f32.gmra.mxu1 %vm3651_vm3, %v797_v4 }
  0x9a   : > { %v2668_v41 = vpop.permute.xlu2 %465 }
  0x9d   : > { %2232 = vmatmul.msk.f32.gmra.mxu1 %vm3651_vm3, %v798_v9 }
  0xa2   : > { %v2692_v52 = vpop.permute.xlu2 %474 }
  0xa3   : > { %v448_v31 = vpop.permute.xlu1 %447  ;;  %v442_v32 = vpop.permute.xlu0 %441 }
  0xa4   : > { %vm2671_vm0 = vcmp.eq.s32.totalorder %v442_v32, %v2666_v39  ;;  %vm2701_vm5 = vcmp.eq.s32.totalorder %v448_v31, %v2666_v39  ;;  %v1052_v31 = vld [vmem:[%s3642_s3 + $0x70] sm:$0xff] }
  0xa5   : > { %2233 = vmatmul.msk.f32.gmra.mxu1 %vm3651_vm3, %v799_v10  ;;  %1055 = vmatpush.msra.mxu3 %v1052_v31 }
  0xa6   : > { %2313 = vmatpush.lsf.msrb.mxu1 %v1052_v31 }
  0xa7   : > { %1056 = vmatpush.msra.mxu3 %v1051_v36 }
  0xa8   : > { %2314 = vmatpush.lsf.msrb.mxu1 %v1051_v36 }
  0xa9   : > { %1057 = vmatpush.msra.mxu3 %v1050_v38 }
  0xaa   : > { %v2712_v58 = vpop.permute.xlu2 %483  ;;  %2315 = vmatpush.lsf.msrb.mxu1 %v1050_v38 }
  0xab   : > { %v451_v43 = vpop.permute.xlu1 %450  ;;  %v445_v44 = vpop.permute.xlu0 %444  ;;  %1058 = vmatpush.msra.mxu3 %v1049_v40 }
  0xac   : > { %vm2676_vm1 = vcmp.eq.s32.totalorder %v445_v44, %v2666_v39  ;;  %vm2696_vm4 = vcmp.eq.s32.totalorder %v451_v43, %v2666_v39  ;;  %2316 = vmatpush.lsf.msrb.mxu1 %v1049_v40  ;;  %v1047_v43 = vld [vmem:[%s3642_s3 + $0x48] sm:$0xff]  ;;  %v807_v44 = vld [vmem:[%s2615_s26 + $0x70] sm:$0xff] }
  0xad   : > { %vm2211_vm2 = vmpackc.low %vm2676_vm1, %vm2671_vm0  ;;  %2234 = vmatmul.msk.f32.gmra.mxu1 %vm3651_vm3, %v800_v14 }
  0xae   : > { %2212 = vmatmul.msk.bf16.vlgmr.msra.gmra.mxu0 %vm2211_vm2, %v2488_v46  ;;  %vm2213_vm6 = vmpackc.low %vm2696_vm4, %vm2701_vm5 }
  0xb2   : > { %v565_v0 = vpop.permute.xlu2 %564 }
  0xb3   : > { %v463_v49 = vpop.permute.xlu1 %462  ;;  %v460_v50 = vpop.permute.xlu0 %459  ;;  %vm609_vm9 = vcmp.eq.s32.totalorder %v565_v0, %v2666_v39 }
  0xb4   : > { %vm2745_vm13 = vcmp.eq.s32.totalorder %v463_v49, %v2666_v39  ;;  %vm2750_vm14 = vcmp.eq.s32.totalorder %v460_v50, %v2666_v39  ;;  %v1044_v50 = vld [vmem:[%s3642_s3 + $0x30] sm:$0xff] }
  0xb5   : > { %2235 = vmatmul.msk.f32.gmra.mxu1 %vm3651_vm3, %v801_v16 }
  0xba   : > { %v574_v12 = vpop.permute.xlu2 %573 }
  0xbb   : > { %v472_v54 = vpop.permute.xlu1 %471  ;;  %v469_v55 = vpop.permute.xlu0 %468 }
  0xbd   : > { %2236 = vmatmul.msk.f32.gmra.mxu1 %vm3651_vm3, %v802_v21 }
  0xbe   : > { %2214 = vmatmul.msk.bf16.gmra.mxu0 %vm2213_vm6, %v2488_v46  ;;  %vm2217_vm6 = vmpackc.low %vm2745_vm13, %vm2750_vm14 }
  0xc2   : > { %v583_v19 = vpop.permute.xlu2 %582 }
  0xc3   : > { %v2714_v59 = vpop.permute.xlu1 %480  ;;  %v2716_v60 = vpop.permute.xlu0 %477 }
  0xc5   : > { %2237 = vmatmul.msk.f32.gmra.mxu1 %vm3651_vm3, %v803_v23 }
  0xca   : > { %v592_v33 = vpop.permute.xlu2 %591 }
  0xcb   : > { %v562_v1 = vpop.permute.xlu1 %561  ;;  %v2737_v3 = vpop.permute.xlu0 %486 }
  0xcc   : > { %vm608_vm10 = vcmp.eq.s32.totalorder %v562_v1, %v2666_v39 }
  0xcd   : > { %vm2275_vm12 = vmpackc.low %vm609_vm9, %vm608_vm10  ;;  %vm2767_vm10 = vcmp.eq.s32.totalorder %v469_v55, %v2666_v39  ;;  %v1042_v55 = vld [vmem:[%s3642_s3 + $0x20] sm:$0xff] }
  0xce   : > { %2216 = vmatmul.msk.bf16.gmra.mxu0 %vm2215_vm11, %v2488_v46  ;;  %2276 = vmatmul.msk.bf16.vlgmr.msra.gmra.mxu2 %vm2275_vm12, %v2488_v46  ;;  %v3676_v13 = vsel %vm2767_vm10, 4294967295, %v3675_v13  ;;  %vm2775_vm12 = vcmp.eq.s32.totalorder %v2668_v41, %v2666_v39  ;;  %v1048_v41 = vld [vmem:[%s3642_s3 + $0x50] sm:$0xff] }
  0xcf   : > { %v3678_v15 = vsel %vm2775_vm12, 4294967295, %v3677_v15  ;;  %1059 = vmatpush.msra.mxu3 %v1048_v41  ;;  %2317 = vmatpush.lsf.msrb.mxu1 %v1048_v41 }
  0xd1   : > { %1060 = vmatpush.msra.mxu3 %v1047_v43  ;;  %2318 = vmatpush.lsf.msrb.mxu1 %v1047_v43 }
  0xd2   : > { %v601_v51 = vpop.permute.xlu2 %600 }
  0xd3   : > { %v571_v5 = vpop.permute.xlu1 %570  ;;  %v568_v6 = vpop.permute.xlu0 %567  ;;  %1061 = vmatpush.msra.mxu3 %v1046_v47  ;;  %2319 = vmatpush.lsf.msrb.mxu1 %v1046_v47 }
  0xd4   : > { %vm611_vm15 = vcmp.eq.s32.totalorder %v571_v5, %v2666_v39  ;;  %vm610_vm2 = vcmp.eq.s32.totalorder %v568_v6, %v2666_v39 }
  0xd5   : > { %vm2277_vm9 = vmpackc.low %vm611_vm15, %vm610_vm2  ;;  %vm612_vm15 = vcmp.eq.s32.totalorder %v574_v12, %v2666_v39  ;;  %1062 = vmatpush.msra.mxu3 %v1045_v48  ;;  %2320 = vmatpush.lsf.msrb.mxu1 %v1045_v48 }
  0xd6   : > { %vm2219_vm2 = vmpackc.low %vm2767_vm10, %vm2775_vm12  ;;  %vm2814_vm12 = vcmp.eq.s32.totalorder %v2714_v59, %v2666_v39 }
  0xd7   : > { %v3684_v26 = vsel %vm2814_vm12, 4294967295, %v3683_v26  ;;  %1063 = vmatpush.msra.mxu3 %v1044_v50  ;;  %2321 = vmatpush.lsf.msrb.mxu1 %v1044_v50 }
  0xdb   : > { %v577_v11 = vpop.permute.xlu0 %576  ;;  %v580_v17 = vpop.permute.xlu1 %579 }
  0xdc   : > { %vm613_vm11 = vcmp.eq.s32.totalorder %v577_v11, %v2666_v39  ;;  %vm614_vm10 = vcmp.eq.s32.totalorder %v580_v17, %v2666_v39 }
  0xde   : > { %2218 = vmatmul.msk.bf16.gmra.mxu0 %vm2217_vm6, %v2488_v46  ;;  %2278 = vmatmul.msk.bf16.gmra.mxu2 %vm2277_vm9, %v2488_v46  ;;  %vm2279_vm6 = vmpackc.low %vm613_vm11, %vm612_vm15  ;;  %vm2790_vm9 = vcmp.eq.s32.totalorder %v472_v54, %v2666_v39  ;;  %vm2798_vm11 = vcmp.eq.s32.totalorder %v2692_v52, %v2666_v39  ;;  %vm615_vm15 = vcmp.eq.s32.totalorder %v583_v19, %v2666_v39  ;;  %v1043_v52 = vld [vmem:[%s3642_s3 + $0x28] sm:$0xff]  ;;  %v808_v54 = vld [vmem:[%s2615_s26 + $0x78] sm:$0xff] }
  0xdf   : > { %v3682_v22 = vsel %vm2798_vm11, 4294967295, %v3681_v22  ;;  %1064 = vmatpush.msra.mxu3 %v1043_v52  ;;  %2322 = vmatpush.lsf.msrb.mxu1 %v1043_v52 }
  0xe1   : > { %1065 = vmatpush.msra.mxu3 %v1042_v55  ;;  %2323 = vmatpush.lsf.msrb.mxu1 %v1042_v55 }
  0xe3   : > { %v589_v24 = vpop.permute.xlu1 %588  ;;  %v586_v25 = vpop.permute.xlu0 %585  ;;  %1066 = vmatpush.msra.mxu3 %v1041_v57  ;;  %2324 = vmatpush.lsf.msrb.mxu1 %v1041_v57 }
  0xeb   : > { %v595_v32 = vpop.permute.xlu0 %594  ;;  %v598_v49 = vpop.permute.xlu1 %597 }
  0xee   : > { %2220 = vmatmul.msk.bf16.gmra.mxu0 %vm2219_vm2, %v2488_v46  ;;  %2280 = vmatmul.msk.bf16.gmra.mxu2 %vm2279_vm6, %v2488_v46  ;;  %vm2221_vm2 = vmpackc.low %vm2798_vm11, %vm2790_vm9  ;;  %vm3687_vm11 = vcmask 130048  }
  0xef   : > { %vm2281_vm6 = vmpackc.low %vm615_vm15, %vm614_vm10  ;;  %vm2820_vm10 = vcmp.eq.s32.totalorder %v2716_v60, %v2666_v39  ;;  %vm617_vm15 = vcmp.eq.s32.totalorder %v589_v24, %v2666_v39  ;;  %2238 = vmatmul.msk.f32.gmra.mxu1 %vm3687_vm11, %v804_v28  ;;  %v1039_v60 = vld [vmem:[%s3642_s3 + $0x8] sm:$0xff] }
  0xf0   : > { %v3686_v27 = vsel %vm2820_vm10, 4294967295, %v3685_v27 }
  0xf2   : > { %v877_v59 = vpop.f32.mrf.mxu1 }
  0xf3   : > { %v607_v1 = vpop.permute.xlu1 %606  ;;  %v604_v2 = vpop.permute.xlu0 %603 }
  0xfe   : > { %2222 = vmatmul.msk.bf16.gmra.mxu0 %vm2221_vm2, %v2488_v46  ;;  %2282 = vmatmul.msk.bf16.gmra.mxu2 %vm2281_vm6, %v2488_v46  ;;  %vm616_vm2 = vcmp.eq.s32.totalorder %v586_v25, %v2666_v39  ;;  %vm2223_vm6 = vmpackc.low %vm2814_vm12, %vm2820_vm10  ;;  %vm3693_vm10 = vcmask 130048  }
  0xff   : > { %vm2283_vm3 = vmpackc.low %vm617_vm15, %vm616_vm2  ;;  %vm2851_vm15 = vcmp.eq.s32.totalorder %v2712_v58, %v2666_v39  ;;  %v1040_v58 = vld [vmem:[%s3642_s3 + $0x10] sm:$0xff] }
 0x100   : > { %vm3688_vm12 = vmmov %vm3687_vm11  ;;  %vm619_vm11 = vcmp.eq.s32.totalorder %v595_v32, %v2666_v39  ;;  %1067 = vmatpush.msra.mxu3 %v1040_v58  ;;  %2325 = vmatpush.lsf.msrb.mxu1 %v1040_v58 }
 0x101   : > { %2239 = vmatmul.msk.f32.gmra.mxu1 %vm3688_vm12, %v805_v29  ;;  %vm618_vm12 = vcmp.eq.s32.totalorder %v592_v33, %v2666_v39 }
 0x102   : > { %1068 = vmatpush.msra.mxu3 %v1039_v60  ;;  %2326 = vmatpush.lsf.msrb.mxu1 %v1039_v60 }
 0x104   : > { %1069 = vmatpush.msra.mxu3 %v1038_v61  ;;  %2327 = vmatpush.lsf.msrb.mxu1 %v1038_v61 }
 0x109   : > { %2240 = vmatmul.msk.f32.gmra.mxu1 %vm3693_vm10, %v806_v37 }
 0x10e   : > { %2224 = vmatmul.msk.bf16.gmra.mxu0 %vm2223_vm6, %v2488_v46  ;;  %2284 = vmatmul.msk.bf16.gmra.mxu2 %vm2283_vm3, %v2488_v46  ;;  %vm2844_vm3 = vcmp.eq.s32.totalorder %v2737_v3, %v2666_v39  ;;  %vm2285_vm6 = vmpackc.low %vm619_vm11, %vm618_vm12  ;;  %vm620_vm11 = vcmp.eq.s32.totalorder %v598_v49, %v2666_v39  ;;  %vm621_vm12 = vcmp.eq.s32.totalorder %v601_v51, %v2666_v39  ;;  %v880_v3 = vpop.f32.mrf.mxu1 }
 0x10f   : > { %vm2225_vm2 = vmpackc.low %vm2844_vm3, %vm2851_vm15 }
 0x111   : > { %2241 = vmatmul.msk.f32.gmra.mxu1 %vm3693_vm10, %v807_v44 }
 0x116   : > { %v883_v5 = vpop.f32.mrf.mxu1 }
 0x11e   : > { %2226 = vmatmul.msk.bf16.gmra.mxu0 %vm2225_vm2, %v2488_v46  ;;  %2286 = vmatmul.msk.bf16.gmra.mxu2 %vm2285_vm6, %v2488_v46  ;;  %vm2287_vm2 = vmpackc.low %vm621_vm12, %vm620_vm11  ;;  %vm622_vm11 = vcmp.eq.s32.totalorder %v604_v2, %v2666_v39  ;;  %v886_v9 = vpop.f32.mrf.mxu1 }
 0x11f   : > { %vm3694_vm6 = vmmov %vm3693_vm10  ;;  %vm623_vm10 = vcmp.eq.s32.totalorder %v607_v1, %v2666_v39 }
 0x120   : > { %2242 = vmatmul.msk.f32.gmra.mxu1 %vm3694_vm6, %v808_v54  ;;  %vm2289_vm12 = vmpackc.low %vm623_vm10, %vm622_vm11 }
 0x126   : > { %v889_v17 = vpop.f32.mrf.mxu1 }
 0x127   : > { %2328 = vllmr.1.mxu1 }
 0x12b   : > { %v737_v0 = vpop.f32.mrf.mxu0 }
 0x12e   : > { %2288 = vmatmul.msk.bf16.gmra.mxu2 %vm2287_vm2, %v2488_v46  ;;  %v892_v24 = vpop.f32.mrf.mxu1 }
 0x133   : > { %v739_v4 = vpop.f32.mrf.mxu0 }
 0x136   : > { %v895_v32 = vpop.f32.mrf.mxu1 }
 0x13b   : > { %v742_v6 = vpop.f32.mrf.mxu0 }
 0x13e   : > { %2290 = vmatmul.msk.bf16.gmra.mxu2 %vm2289_vm12, %v2488_v46  ;;  %v898_v40 = vpop.f32.mrf.mxu1 }
 0x143   : > { %v744_v12 = vpop.f32.mrf.mxu0 }
 0x146   : > { %v901_v49 = vpop.f32.mrf.mxu1 }
 0x14b   : > { %v747_v39 = vpop.f32.mrf.mxu0 }
 0x14e   : > { %v904_v57 = vpop.f32.mrf.mxu1 }
 0x151   : > { %v982_v10 = vpop.f32.mrf.mxu2 }
 0x152   : > { %v983_v11 = vadd.f32 %v982_v10, %v877_v59 }
 0x153   : > { %v749_v28 = vpop.f32.mrf.mxu0 }
 0x154   : > { %v2916_v14 = vmul.f32 %v983_v11, %v737_v0 }
 0x156   : > { %1070 = vmatmul.f32.vlgmr.msra.gmra.mxu3 %v2916_v14  ;;  %v907_v1 = vpop.f32.mrf.mxu1 }
 0x159   : > { %v984_v16 = vpop.f32.mrf.mxu2 }
 0x15a   : > { %v985_v19 = vadd.f32 %v984_v16, %v880_v3 }
 0x15b   : > { %v752_v33 = vpop.f32.mrf.mxu0 }
 0x15c   : > { %v2919_v21 = vmul.f32 %v985_v19, %v739_v4 }
 0x15e   : > { %1073 = vmatmul.f32.gmra.mxu3 %v2919_v21 }
 0x161   : > { %v987_v46 = vpop.f32.mrf.mxu2 }
 0x162   : > { %v988_v23 = vadd.f32 %v987_v46, %v883_v5 }
 0x163   : > { %v754_v44 = vpop.f32.mrf.mxu0 }
 0x164   : > { %v2922_v25 = vmul.f32 %v988_v23, %v742_v6 }
 0x166   : > { %1076 = vmatmul.f32.gmra.mxu3 %v2922_v25 }
 0x169   : > { %v989_v29 = vpop.f32.mrf.mxu2 }
 0x16a   : > { %v990_v30 = vadd.f32 %v989_v29, %v886_v9 }
 0x16b   : > { %v757_v52 = vpop.f32.mrf.mxu0 }
 0x16c   : > { %v2925_v31 = vmul.f32 %v990_v30, %v744_v12  ;;  %v910_v6 = vpop.f32.mrf.mxu1 }
 0x16e   : > { %1079 = vmatmul.f32.gmra.mxu3 %v2925_v31 }
 0x171   : > { %v992_v36 = vpop.f32.mrf.mxu2 }
 0x172   : > { %v993_v37 = vadd.f32 %v992_v36, %v889_v17  ;;  %v2489_v36 = vmov 3  }
 0x173   : > { %v759_v59 = vpop.f32.mrf.mxu0  ;;  %2353 = vset.pattern.permute.xlu1 %v2489_v36 }
 0x174   : > { %v2928_v38 = vmul.f32 %v993_v37, %v747_v39  ;;  %v2490_v37 = vmov 1  }
 0x175   : > { %2351 = vset.pattern.permute.xlu0 %v2490_v37 }
 0x176   : > { %1082 = vmatmul.f32.gmra.mxu3 %v2928_v38 }
 0x179   : > { %v994_v41 = vpop.f32.mrf.mxu2 }
 0x17a   : > { %v995_v43 = vadd.f32 %v994_v41, %v892_v24 }
 0x17b   : > { %v762_v2 = vpop.f32.mrf.mxu0 }
 0x17c   : > { %v2931_v47 = vmul.f32 %v995_v43, %v749_v28 }
 0x17e   : > { %1085 = vmatmul.f32.gmra.mxu3 %v2931_v47  ;;  %v913_v17 = vpop.f32.mrf.mxu1 }
 0x181   : > { %v997_v48 = vpop.f32.mrf.mxu2 }
 0x182   : > { %v998_v50 = vadd.f32 %v997_v48, %v895_v32 }
 0x183   : > { %v764_v11 = vpop.f32.mrf.mxu0 }
 0x184   : > { %v2934_v51 = vmul.f32 %v998_v50, %v752_v33 }
 0x186   : > { %1088 = vmatmul.f32.gmra.mxu3 %v2934_v51  ;;  %v916_v28 = vpop.f32.mrf.mxu1 }
 0x189   : > { %v999_v54 = vpop.f32.mrf.mxu2 }
 0x18a   : > { %v1000_v55 = vadd.f32 %v999_v54, %v898_v40 }
 0x18b   : > { %v767_v46 = vpop.f32.mrf.mxu0 }
 0x18c   : > { %v2937_v58 = vmul.f32 %v1000_v55, %v754_v44 }
 0x18e   : > { %1091 = vmatmul.f32.gmra.mxu3 %v2937_v58  ;;  %v919_v41 = vpop.f32.mrf.mxu1 }
 0x191   : > { %v1002_v60 = vpop.f32.mrf.mxu2 }
 0x192   : > { %v1003_v61 = vadd.f32 %v1002_v60, %v901_v49 }
 0x193   : > { %v769_v30 = vpop.f32.mrf.mxu0 }
 0x194   : > { %v2940_v0 = vmul.f32 %v1003_v61, %v757_v52  ;;  %v2491_v61 = vmov 6  }
 0x196   : > { %1094 = vmatmul.f32.gmra.mxu3 %v2940_v0 }
 0x199   : > { %v1004_v3 = vpop.f32.mrf.mxu2 }
 0x19a   : > { %v1005_v4 = vadd.f32 %v1004_v3, %v904_v57 }
 0x19b   : > { %v772_v43 = vpop.f32.mrf.mxu0 }
 0x19c   : > { %v1031_v5 = vmul.f32 %v1005_v4, %v759_v59 }
 0x19d   : > { %v922_v50 = vpop.f32.mrf.mxu1 }
 0x19e   : > { %1097 = vmatmul.f32.gmra.mxu3 %v1031_v5 }
 0x1a1   : > { %v1007_v9 = vpop.f32.mrf.mxu2 }
 0x1a2   : > { %v1008_v10 = vadd.f32 %v1007_v9, %v907_v1  ;;  %v2492_v1 = vmov 4   ;;  %v2495_v9 = vmov 5  }
 0x1a3   : > { %v774_v55 = vpop.f32.mrf.mxu0 }
 0x1a4   : > { %v1032_v12 = vmul.f32 %v1008_v10, %v762_v2  ;;  %v2493_v2 = vmov 2  }
 0x1a6   : > { %1100 = vmatmul.f32.gmra.mxu3 %v1032_v12 }
 0x1a9   : > { %v1009_v16 = vpop.f32.mrf.mxu2 }
 0x1aa   : > { %v1010_v19 = vadd.f32 %v1009_v16, %v910_v6  ;;  %v2494_v6 = vmov 7  }
 0x1ac   : > { %v1033_v39 = vmul.f32 %v1010_v19, %v764_v11 }
 0x1ae   : > { %1103 = vmatmul.f32.gmra.mxu3 %v1033_v39 }
 0x1b1   : > { %v1012_v23 = vpop.f32.mrf.mxu2 }
 0x1b2   : > { %v1013_v24 = vadd.f32 %v1012_v23, %v913_v17 }
 0x1b4   : > { %v1034_v29 = vmul.f32 %v1013_v24, %v767_v46 }
 0x1b6   : > { %1106 = vmatmul.f32.gmra.mxu3 %v1034_v29 }
 0x1b9   : > { %v1014_v32 = vpop.f32.mrf.mxu2 }
 0x1ba   : > { %v1015_v33 = vadd.f32 %v1014_v32, %v916_v28 }
 0x1bc   : > { %v1035_v40 = vmul.f32 %v1015_v33, %v769_v30 }
 0x1be   : > { %1109 = vmatmul.f32.gmra.mxu3 %v1035_v40 }
 0x1c1   : > { %v1017_v44 = vpop.f32.mrf.mxu2 }
 0x1c2   : > { %v1018_v48 = vadd.f32 %v1017_v44, %v919_v41 }
 0x1c4   : > { %v1036_v49 = vmul.f32 %v1018_v48, %v772_v43 }
 0x1c6   : > { %1112 = vmatmul.f32.gmra.mxu3 %v1036_v49 }
 0x1c9   : > { %v1019_v52 = vpop.f32.mrf.mxu2 }
 0x1ca   : > { %v1020_v54 = vadd.f32 %v1019_v52, %v922_v50 }
 0x1cc   : > { %v1037_v57 = vmul.f32 %v1020_v54, %v774_v55 }
 0x1ce   : > { %1115 = vmatmul.f32.gmra.mxu3 %v1037_v57  ;;  %1167 = vmatpush.xpose.msra.mxu1 %v1037_v57 }
 0x1d2   : > { %1168 = vmatpush.xpose.msra.mxu1 %v1036_v49 }
 0x1d6   : > { %1169 = vmatpush.xpose.msra.mxu1 %v1035_v40 }
 0x1d9   : > { %v1071_v59 = vpop.f32.mrf.mxu3 }
 0x1da   : > { %v1119_v60 = vmul.f32 0.35355338, %v1071_v59  ;;  %1170 = vmatpush.xpose.msra.mxu1 %v1034_v29 }
 0x1dc   : > { %1518 = vperm.xlu1 %2353, %v1119_v60   ;;  %1310 = vperm.xlu0 %2351, %v1119_v60  }
 0x1dd   : > { %1191 = vperm.xlu2 %2350, %v1119_v60  }
 0x1de   : > { %1171 = vmatpush.xpose.msra.mxu1 %v1033_v39 }
 0x1e1   : > { %v1074_v3 = vpop.f32.mrf.mxu3 }
 0x1e2   : > { %1172 = vmatpush.xpose.msra.mxu1 %v1032_v12  ;;  %v1120_v4 = vmul.f32 0.35355338, %v1074_v3 }
 0x1e4   : > { %2356 = vset.pattern.permute.xlu1 %v2491_v61  ;;  %2354 = vset.pattern.permute.xlu0 %v2492_v1 }
 0x1e5   : > { %2352 = vset.pattern.permute.xlu2 %v2493_v2  ;;  %1830 = vperm.xlu1 %2356, %v1119_v60  }
 0x1e6   : > { %1622 = vperm.xlu0 %2354, %v1119_v60   ;;  %1414 = vperm.xlu2 %2352, %v1119_v60  }
 0x1e7   : > { %1173 = vmatpush.xpose.msra.mxu1 %v1031_v5 }
 0x1eb   : > { %1174 = vmatpush.xpose.msra.mxu1 %v2940_v0 }
 0x1ed   : > { %2359 = vset.pattern.permute.xlu1 %v2490_v37 }
 0x1ee   : > { %2357 = vset.pattern.permute.xlu0 %v2494_v6  ;;  %2355 = vset.pattern.permute.xlu2 %v2495_v9 }
 0x1ef   : > { %1934 = vperm.xlu0 %2357, %v1119_v60   ;;  %1726 = vperm.xlu2 %2355, %v1119_v60  }
 0x1f0   : > { %1314 = vperm.xlu1 %2359, %v1120_v4   ;;  %1175 = vmatpush.xpose.msra.mxu1 %v2937_v58 }
 0x1f4   : > { %1176 = vmatpush.xpose.msra.mxu1 %v2934_v51  ;;  %v1077_v51 = vpop.f32.mrf.mxu3 }
 0x1f7   : > { %2358 = vset.pattern.permute.xlu0 %v2487_v20  ;;  %2361 = vset.pattern.permute.xlu2 %v2489_v36 }
 0x1f8   : > { %2362 = vset.pattern.permute.xlu1 %v2492_v1  ;;  %1177 = vmatpush.xpose.msra.mxu1 %v2931_v47  ;;  %v1121_v47 = vmul.f32 0.35355338, %v1077_v51 }
 0x1f9   : > { %1522 = vperm.xlu2 %2361, %v1120_v4   ;;  %1626 = vperm.xlu1 %2362, %v1120_v4  }
 0x1fa   : > { %1196 = vperm.xlu0 %2358, %v1120_v4  }
 0x1fc   : > { %1178 = vmatpush.xpose.msra.mxu1 %v2928_v38 }
 0x200   : > { %1179 = vmatpush.xpose.msra.mxu1 %v2925_v31 }
 0x201   : > { %2364 = vset.pattern.permute.xlu2 %v2491_v61  ;;  %2365 = vset.pattern.permute.xlu1 %v2494_v6 }
 0x202   : > { %2360 = vset.pattern.permute.xlu0 %v2493_v2  ;;  %1834 = vperm.xlu2 %2364, %v1120_v4  }
 0x203   : > { %1938 = vperm.xlu1 %2365, %v1120_v4   ;;  %1418 = vperm.xlu0 %2360, %v1120_v4  }
 0x204   : > { %1180 = vmatpush.xpose.msra.mxu1 %v2922_v25 }
 0x208   : > { %1181 = vmatpush.xpose.msra.mxu1 %v2919_v21  ;;  %v1080_v21 = vpop.f32.mrf.mxu3 }
 0x209   : > { %v1122_v25 = vmul.f32 0.35355338, %v1080_v21 }
 0x20a   : > { %2367 = vset.pattern.permute.xlu2 %v2490_v37 }
 0x20b   : > { %2366 = vset.pattern.permute.xlu1 %v2487_v20  ;;  %2363 = vset.pattern.permute.xlu0 %v2495_v9 }
 0x20c   : > { %1730 = vperm.xlu0 %2363, %v1120_v4   ;;  %1318 = vperm.xlu2 %2367, %v1121_v47  }
 0x20d   : > { %1201 = vperm.xlu1 %2366, %v1121_v47   ;;  %1182 = vmatpush.xpose.msra.mxu1 %v2916_v14 }
 0x210   : > { %2329 = vmatmul.lmr.bf16.vlgmr.msra.gmra.1.mxu1  ;;  %v1083_v14 = vpop.f32.mrf.mxu3 }
 0x211   : > { %v2975_v31 = vmul.f32 0.35355338, %v1083_v14 }
 0x214   : > { %2369 = vset.pattern.permute.xlu0 %v2489_v36  ;;  %2370 = vset.pattern.permute.xlu2 %v2492_v1 }
 0x215   : > { %2368 = vset.pattern.permute.xlu1 %v2493_v2  ;;  %1526 = vperm.xlu0 %2369, %v1121_v47  }
 0x216   : > { %1630 = vperm.xlu2 %2370, %v1121_v47   ;;  %1422 = vperm.xlu1 %2368, %v1121_v47  }
 0x218   : > { %v1086_v38 = vpop.f32.mrf.mxu3 }
 0x219   : > { %v2982_v58 = vmul.f32 0.35355338, %v1086_v38 }
 0x21d   : > { %2372 = vset.pattern.permute.xlu0 %v2491_v61 }
 0x21e   : > { %2373 = vset.pattern.permute.xlu2 %v2494_v6  ;;  %2371 = vset.pattern.permute.xlu1 %v2495_v9 }
 0x21f   : > { %1838 = vperm.xlu0 %2372, %v1121_v47   ;;  %1942 = vperm.xlu2 %2373, %v1121_v47  }
 0x220   : > { %1734 = vperm.xlu1 %2371, %v1121_v47   ;;  %v1089_v11 = vpop.f32.mrf.mxu3 }
 0x221   : > { %v3002_v12 = vmul.f32 0.35355338, %v1089_v11 }
 0x227   : > { %2382 = vset.pattern.permute.xlu0 %v2487_v20  ;;  %2374 = vset.pattern.permute.xlu2 %v2487_v20 }
 0x228   : > { %2375 = vset.pattern.permute.xlu1 %v2490_v37  ;;  %1206 = vperm.xlu2 %2374, %v1122_v25   ;;  %v1092_v30 = vpop.f32.mrf.mxu3 }
 0x229   : > { %1322 = vperm.xlu1 %2375, %v1122_v25   ;;  %1211 = vperm.xlu0 %2382, %v2975_v31   ;;  %v3027_v41 = vmul.f32 0.35355338, %v1092_v30 }
 0x230   : > { %2376 = vset.pattern.permute.xlu2 %v2493_v2 }
 0x231   : > { %2377 = vset.pattern.permute.xlu1 %v2489_v36  ;;  %2391 = vset.pattern.permute.xlu0 %v2490_v37 }
 0x232   : > { %1530 = vperm.xlu1 %2377, %v1122_v25   ;;  %1426 = vperm.xlu2 %2376, %v1122_v25  }
 0x233   : > { %1330 = vperm.xlu0 %2391, %v2982_v58  }
 0x237   : > { %v2987_v0 = vpop.permute.xlu2 %1191 }
 0x238   : > { %v1269_v4 = vsel %vm2671_vm0, %v2987_v0, -1e+30 }
 0x23a   : > { %2378 = vset.pattern.permute.xlu1 %v2492_v1  ;;  %2379 = vset.pattern.permute.xlu2 %v2495_v9 }
 0x23b   : > { %2394 = vset.pattern.permute.xlu0 %v2492_v1  ;;  %1634 = vperm.xlu1 %2378, %v1122_v25  }
 0x23c   : > { %1738 = vperm.xlu2 %2379, %v1122_v25   ;;  %1642 = vperm.xlu0 %2394, %v2982_v58  }
 0x240   : > { %v2993_v5 = vpop.permute.xlu2 %1414 }
 0x241   : > { %v1477_v38 = vsel %vm2671_vm0, %v2993_v5, -1e+30 }
 0x243   : > { %2380 = vset.pattern.permute.xlu1 %v2491_v61 }
 0x244   : > { %2383 = vset.pattern.permute.xlu2 %v2490_v37  ;;  %2397 = vset.pattern.permute.xlu0 %v2494_v6 }
 0x245   : > { %1842 = vperm.xlu1 %2380, %v1122_v25   ;;  %1326 = vperm.xlu2 %2383, %v2975_v31  }
 0x246   : > { %1954 = vperm.xlu0 %2397, %v2982_v58  }
 0x249   : > { %v3000_v10 = vpop.permute.xlu2 %1726 }
 0x24d   : > { %2381 = vset.pattern.permute.xlu1 %v2494_v6  ;;  %2385 = vset.pattern.permute.xlu2 %v2489_v36 }
 0x24e   : > { %2400 = vset.pattern.permute.xlu0 %v2493_v2  ;;  %1946 = vperm.xlu1 %2381, %v1122_v25   ;;  %v1519_v16 = vpop.permute.xlu1 %1518  ;;  %v1311_v17 = vpop.permute.xlu0 %1310 }
 0x24f   : > { %1534 = vperm.xlu2 %2385, %v2975_v31   ;;  %1438 = vperm.xlu0 %2400, %v3002_v12   ;;  %v1581_v39 = vsel %vm2671_vm0, %v1519_v16, -1e+30  ;;  %v1373_v48 = vsel %vm2671_vm0, %v1311_v17, -1e+30 }
 0x253   : > { %v1523_v19 = vpop.permute.xlu2 %1522 }
 0x254   : > { %v1582_v46 = vsel %vm2676_vm1, %v1523_v19, -1e+30 }
 0x255   : > { %v3013_v23 = vmax.f32 %v1581_v39, %v1582_v46 }
 0x256   : > { %2384 = vset.pattern.permute.xlu1 %v2493_v2 }
 0x257   : > { %2386 = vset.pattern.permute.xlu2 %v2492_v1  ;;  %2403 = vset.pattern.permute.xlu0 %v2495_v9  ;;  %v1831_v24 = vpop.permute.xlu1 %1830 }
 0x258   : > { %1430 = vperm.xlu1 %2384, %v2975_v31   ;;  %1638 = vperm.xlu2 %2386, %v2975_v31   ;;  %v1623_v28 = vpop.permute.xlu0 %1622  ;;  %v1893_v32 = vsel %vm2671_vm0, %v1831_v24, -1e+30 }
 0x259   : > { %1750 = vperm.xlu0 %2403, %v3002_v12   ;;  %v1685_v59 = vsel %vm2671_vm0, %v1623_v28, -1e+30  ;;  %v1095_v28 = vpop.f32.mrf.mxu3 }
 0x25a   : > { %v3082_v30 = vmul.f32 0.35355338, %v1095_v28 }
 0x25c   : > { %v1835_v29 = vpop.permute.xlu2 %1834 }
 0x25d   : > { %v1894_v33 = vsel %vm2676_vm1, %v1835_v29, -1e+30 }
 0x25e   : > { %v3025_v40 = vmax.f32 %v1893_v32, %v1894_v33  ;;  %v1789_v33 = vsel %vm2671_vm0, %v3000_v10, -1e+30 }
 0x260   : > { %2387 = vset.pattern.permute.xlu1 %v2495_v9  ;;  %2388 = vset.pattern.permute.xlu2 %v2491_v61 }
 0x261   : > { %2406 = vset.pattern.permute.xlu0 %v2487_v20  ;;  %1742 = vperm.xlu1 %2387, %v2975_v31   ;;  %v1935_v43 = vpop.permute.xlu0 %1934 }
 0x262   : > { %1846 = vperm.xlu2 %2388, %v2975_v31   ;;  %1226 = vperm.xlu0 %2406, %v3027_v41   ;;  %v1315_v44 = vpop.permute.xlu1 %1314  ;;  %v1997_v16 = vsel %vm2671_vm0, %v1935_v43, -1e+30  ;;  %vm3695_vm0 = vnez %v3678_v15 }
 0x263   : > { %v1374_v49 = vsel %vm2676_vm1, %v1315_v44, -1e+30 }
 0x264   : > { %v1390_v50 = vmax.f32 %v1373_v48, %v1374_v49 }
 0x266   : > { %v1319_v52 = vpop.permute.xlu2 %1318 }
 0x267   : > { %v1375_v54 = vsel %vm2701_vm5, %v1319_v52, -1e+30 }
 0x268   : > { %v3041_v55 = vmax.f32 %v1375_v54, %v1390_v50 }
 0x269   : > { %2390 = vset.pattern.permute.xlu1 %v2487_v20 }
 0x26a   : > { %2389 = vset.pattern.permute.xlu2 %v2494_v6  ;;  %2409 = vset.pattern.permute.xlu0 %v2489_v36 }
 0x26b   : > { %1950 = vperm.xlu2 %2389, %v2975_v31   ;;  %1216 = vperm.xlu1 %2390, %v2982_v58   ;;  %v1627_v57 = vpop.permute.xlu1 %1626 }
 0x26c   : > { %1546 = vperm.xlu0 %2409, %v3027_v41   ;;  %v1686_v60 = vsel %vm2676_vm1, %v1627_v57, -1e+30  ;;  %v1197_v3 = vpop.permute.xlu0 %1196 }
 0x26d   : > { %v1703_v51 = vmax.f32 %v1686_v60, %v1685_v59  ;;  %v1270_v47 = vsel %vm2676_vm1, %v1197_v3, -1e+30 }
 0x26e   : > { %v1286_v21 = vmax.f32 %v1269_v4, %v1270_v47 }
 0x270   : > { %v1631_v14 = vpop.permute.xlu2 %1630 }
 0x271   : > { %v1687_v25 = vsel %vm2701_vm5, %v1631_v14, -1e+30 }
 0x272   : > { %v3060_v31 = vmax.f32 %v1687_v25, %v1703_v51 }
 0x273   : > { %2392 = vset.pattern.permute.xlu2 %v2493_v2  ;;  %2393 = vset.pattern.permute.xlu1 %v2489_v36 }
 0x274   : > { %2412 = vset.pattern.permute.xlu0 %v2491_v61  ;;  %1434 = vperm.xlu2 %2392, %v2982_v58  }
 0x275   : > { %1538 = vperm.xlu1 %2393, %v2982_v58   ;;  %1858 = vperm.xlu0 %2412, %v3027_v41   ;;  %v1939_v0 = vpop.permute.xlu1 %1938  ;;  %v1419_v11 = vpop.permute.xlu0 %1418 }
 0x276   : > { %v1998_v17 = vsel %vm2676_vm1, %v1939_v0, -1e+30  ;;  %v1478_v19 = vsel %vm2676_vm1, %v1419_v11, -1e+30  ;;  %v1098_v0 = vpop.f32.mrf.mxu3 }
 0x277   : > { %v2015_v39 = vmax.f32 %v1998_v17, %v1997_v16  ;;  %v1496_v46 = vmax.f32 %v1478_v19, %v1477_v38  ;;  %v3130_v19 = vmul.f32 0.35355338, %v1098_v0 }
 0x279   : > { %v1943_v24 = vpop.permute.xlu2 %1942 }
 0x27a   : > { %v1999_v5 = vsel %vm2701_vm5, %v1943_v24, -1e+30 }
 0x27b   : > { %v3079_v29 = vmax.f32 %v1999_v5, %v2015_v39 }
 0x27c   : > { %2395 = vset.pattern.permute.xlu2 %v2495_v9 }
 0x27d   : > { %2396 = vset.pattern.permute.xlu1 %v2491_v61  ;;  %2415 = vset.pattern.permute.xlu0 %v2490_v37 }
 0x27e   : > { %1746 = vperm.xlu2 %2395, %v2982_v58   ;;  %1850 = vperm.xlu1 %2396, %v2982_v58   ;;  %v1731_v32 = vpop.permute.xlu0 %1730 }
 0x27f   : > { %1342 = vperm.xlu0 %2415, %v3082_v30   ;;  %v1790_v43 = vsel %vm2676_vm1, %v1731_v32, -1e+30  ;;  %v1202_v44 = vpop.permute.xlu1 %1201  ;;  %vm3696_vm1 = vnez %v3676_v13 }
 0x280   : > { %v1808_v48 = vmax.f32 %v1790_v43, %v1789_v33  ;;  %v1271_v49 = vsel %vm2701_vm5, %v1202_v44, -1e+30 }
 0x281   : > { %v1289_v50 = vmax.f32 %v1271_v49, %v1286_v21 }
 0x282   : > { %v1207_v52 = vpop.permute.xlu2 %1206 }
 0x283   : > { %v1272_v58 = vsel %vm2696_vm4, %v1207_v52, -1e+30 }
 0x284   : > { %v1287_v54 = vmax.f32 %v1272_v58, %v1289_v50  ;;  %v1101_v50 = vpop.f32.mrf.mxu3 }
 0x286   : > { %2398 = vset.pattern.permute.xlu2 %v2487_v20  ;;  %2399 = vset.pattern.permute.xlu1 %v2490_v37 }
 0x287   : > { %2418 = vset.pattern.permute.xlu0 %v2492_v1  ;;  %1334 = vperm.xlu1 %2399, %v3002_v12   ;;  %v1527_v42 = vpop.permute.xlu0 %1526 }
 0x288   : > { %1221 = vperm.xlu2 %2398, %v3002_v12   ;;  %1654 = vperm.xlu0 %2418, %v3082_v30   ;;  %v1583_v45 = vsel %vm2701_vm5, %v1527_v42, -1e+30  ;;  %v1423_v10 = vpop.permute.xlu1 %1422  ;;  %v3163_v42 = vmul.f32 0.35355338, %v1101_v50 }
 0x289   : > { %v1601_v57 = vmax.f32 %v1583_v45, %v3013_v23  ;;  %v1479_v59 = vsel %vm2701_vm5, %v1423_v10, -1e+30 }
 0x28a   : > { %v1494_v60 = vmax.f32 %v1479_v59, %v1496_v46 }
 0x28c   : > { %v1427_v3 = vpop.permute.xlu2 %1426 }
 0x28d   : > { %v1480_v4 = vsel %vm2696_vm4, %v1427_v3, -1e+30 }
 0x28e   : > { %v3111_v51 = vmax.f32 %v1480_v4, %v1494_v60 }
 0x28f   : > { %2402 = vset.pattern.permute.xlu1 %v2492_v1 }
 0x290   : > { %2401 = vset.pattern.permute.xlu2 %v2489_v36  ;;  %2421 = vset.pattern.permute.xlu0 %v2494_v6 }
 0x291   : > { %1646 = vperm.xlu1 %2402, %v3002_v12   ;;  %1542 = vperm.xlu2 %2401, %v3002_v12   ;;  %v1839_v23 = vpop.permute.xlu0 %1838 }
 0x292   : > { %1966 = vperm.xlu0 %2421, %v3082_v30   ;;  %v1895_v47 = vsel %vm2701_vm5, %v1839_v23, -1e+30  ;;  %v1735_v21 = vpop.permute.xlu1 %1734 }
 0x293   : > { %v3122_v14 = vmax.f32 %v1895_v47, %v3025_v40  ;;  %v1791_v25 = vsel %vm2701_vm5, %v1735_v21, -1e+30  ;;  %vm3698_vm5 = vnez %v3686_v27 }
 0x294   : > { %v1806_v38 = vmax.f32 %v1791_v25, %v1808_v48 }
 0x296   : > { %v1739_v11 = vpop.permute.xlu2 %1738 }
 0x297   : > { %v1792_v16 = vsel %vm2696_vm4, %v1739_v11, -1e+30 }
 0x298   : > { %v3128_v17 = vmax.f32 %v1792_v16, %v1806_v38 }
 0x299   : > { %2405 = vset.pattern.permute.xlu1 %v2494_v6  ;;  %2404 = vset.pattern.permute.xlu2 %v2491_v61 }
 0x29a   : > { %2424 = vset.pattern.permute.xlu0 %v2493_v2  ;;  %1958 = vperm.xlu1 %2405, %v3002_v12  }
 0x29b   : > { %1854 = vperm.xlu2 %2404, %v3002_v12   ;;  %1450 = vperm.xlu0 %2424, %v3130_v19   ;;  %v1323_v56 = vpop.permute.xlu1 %1322  ;;  %v1212_v40 = vpop.permute.xlu0 %1211 }
 0x29c   : > { %v1376_v39 = vsel %vm2696_vm4, %v1323_v56, -1e+30  ;;  %v1273_v46 = vsel %vm2721_vm7, %v1212_v40, -1e+30 }
 0x29d   : > { %v1394_v24 = vmax.f32 %v1376_v39, %v3041_v55  ;;  %v3143_v28 = vmax.f32 %v1273_v46, %v1287_v54 }
 0x29f   : > { %v1327_v5 = vpop.permute.xlu2 %1326 }
 0x2a0   : > { %v1377_v32 = vsel %vm2721_vm7, %v1327_v5, -1e+30 }
 0x2a1   : > { %v1392_v33 = vmax.f32 %v1377_v32, %v1394_v24  ;;  %v1104_v32 = vpop.f32.mrf.mxu3 }
 0x2a2   : > { %2408 = vset.pattern.permute.xlu1 %v2493_v2 }
 0x2a3   : > { %2407 = vset.pattern.permute.xlu2 %v2490_v37  ;;  %2427 = vset.pattern.permute.xlu0 %v2495_v9 }
 0x2a4   : > { %1442 = vperm.xlu1 %2408, %v3027_v41   ;;  %1338 = vperm.xlu2 %2407, %v3027_v41   ;;  %v1531_v12 = vpop.permute.xlu1 %1530 }
 0x2a5   : > { %1762 = vperm.xlu0 %2427, %v3130_v19   ;;  %v1584_v55 = vsel %vm2696_vm4, %v1531_v12, -1e+30  ;;  %v1331_v43 = vpop.permute.xlu0 %1330 }
 0x2a6   : > { %v1599_v44 = vmax.f32 %v1584_v55, %v1601_v57  ;;  %v1378_v48 = vsel %vm2726_vm8, %v1331_v43, -1e+30  ;;  %v3212_v55 = vmul.f32 0.35355338, %v1104_v32 }
 0x2a7   : > { %v3157_v49 = vmax.f32 %v1378_v48, %v1392_v33 }
 0x2a9   : > { %v1535_v52 = vpop.permute.xlu2 %1534 }
 0x2aa   : > { %v1585_v58 = vsel %vm2721_vm7, %v1535_v52, -1e+30 }
 0x2ab   : > { %v3161_v54 = vmax.f32 %v1585_v58, %v1599_v44 }
 0x2ac   : > { %2411 = vset.pattern.permute.xlu1 %v2495_v9  ;;  %2410 = vset.pattern.permute.xlu2 %v2492_v1 }
 0x2ad   : > { %2430 = vset.pattern.permute.xlu0 %v2487_v20  ;;  %1754 = vperm.xlu1 %2411, %v3027_v41   ;;  %v1635_v45 = vpop.permute.xlu1 %1634 }
 0x2ae   : > { %1650 = vperm.xlu2 %2410, %v3027_v41   ;;  %1241 = vperm.xlu0 %2430, %v3163_v42   ;;  %v1688_v10 = vsel %vm2696_vm4, %v1635_v45, -1e+30  ;;  %v1643_v57 = vpop.permute.xlu0 %1642 }
 0x2af   : > { %v1706_v59 = vmax.f32 %v3060_v31, %v1688_v10  ;;  %v1690_v60 = vsel %vm2726_vm8, %v1643_v57, -1e+30 }
 0x2b1   : > { %v1704_v3 = vmax.f32 %v1690_v60, %v1706_v59 }
 0x2b2   : > { %v1639_v4 = vpop.permute.xlu2 %1638 }
 0x2b3   : > { %v1689_v23 = vsel %vm2721_vm7, %v1639_v4, -1e+30 }
 0x2b4   : > { %v3178_v47 = vmax.f32 %v1689_v23, %v1704_v3 }
 0x2b5   : > { %2414 = vset.pattern.permute.xlu1 %v2487_v20 }
 0x2b6   : > { %2413 = vset.pattern.permute.xlu2 %v2494_v6  ;;  %2433 = vset.pattern.permute.xlu0 %v2489_v36 }
 0x2b7   : > { %1962 = vperm.xlu2 %2413, %v3027_v41   ;;  %1231 = vperm.xlu1 %2414, %v3082_v30   ;;  %v1843_v31 = vpop.permute.xlu1 %1842 }
 0x2b8   : > { %1558 = vperm.xlu0 %2433, %v3163_v42   ;;  %v1896_v21 = vsel %vm2696_vm4, %v1843_v31, -1e+30  ;;  %v1955_v25 = vpop.permute.xlu0 %1954 }
 0x2b9   : > { %v1911_v38 = vmax.f32 %v1896_v21, %v3122_v14  ;;  %v2002_v0 = vsel %vm2726_vm8, %v1955_v25, -1e+30 }
 0x2ba   : > { %v2018_v11 = vmax.f32 %v3079_v29, %v2002_v0  ;;  %v1107_v0 = vpop.f32.mrf.mxu3 }
 0x2bc   : > { %v1847_v16 = vpop.permute.xlu2 %1846 }
 0x2bd   : > { %v1897_v41 = vsel %vm2721_vm7, %v1847_v16, -1e+30 }
 0x2be   : > { %v3194_v56 = vmax.f32 %v1897_v41, %v1911_v38 }
 0x2bf   : > { %2416 = vset.pattern.permute.xlu2 %v2493_v2  ;;  %2417 = vset.pattern.permute.xlu1 %v2489_v36 }
 0x2c0   : > { %2436 = vset.pattern.permute.xlu0 %v2491_v61  ;;  %1446 = vperm.xlu2 %2416, %v3082_v30   ;;  %v1947_v14 = vpop.permute.xlu1 %1946 }
 0x2c1   : > { %1550 = vperm.xlu1 %2417, %v3082_v30   ;;  %1870 = vperm.xlu0 %2436, %v3163_v42   ;;  %v2000_v29 = vsel %vm2696_vm4, %v1947_v14, -1e+30  ;;  %v1439_v40 = vpop.permute.xlu0 %1438  ;;  %v3258_v14 = vmul.f32 0.35355338, %v1107_v0  ;;  %vm3697_vm4 = vnez %v3682_v22 }
 0x2c2   : > { %v2016_v39 = vmax.f32 %v2000_v29, %v2018_v11  ;;  %v1483_v46 = vsel %vm2750_vm14, %v1439_v40, -1e+30 }
 0x2c3   : > { %v1499_v24 = vmax.f32 %v3111_v51, %v1483_v46 }
 0x2c5   : > { %v1951_v5 = vpop.permute.xlu2 %1950 }
 0x2c6   : > { %v2001_v33 = vsel %vm2721_vm7, %v1951_v5, -1e+30 }
 0x2c7   : > { %v3209_v12 = vmax.f32 %v2001_v33, %v2016_v39 }
 0x2c8   : > { %2419 = vset.pattern.permute.xlu2 %v2495_v9 }
 0x2c9   : > { %2420 = vset.pattern.permute.xlu1 %v2491_v61  ;;  %2439 = vset.pattern.permute.xlu0 %v2490_v37 }
 0x2ca   : > { %1758 = vperm.xlu2 %2419, %v3082_v30   ;;  %1862 = vperm.xlu1 %2420, %v3082_v30   ;;  %v1431_v53 = vpop.permute.xlu1 %1430 }
 0x2cb   : > { %1354 = vperm.xlu0 %2439, %v3212_v55   ;;  %v1481_v51 = vsel %vm2721_vm7, %v1431_v53, -1e+30  ;;  %v1751_v43 = vpop.permute.xlu0 %1750 }
 0x2cc   : > { %v1497_v44 = vmax.f32 %v1481_v51, %v1499_v24  ;;  %v1795_v48 = vsel %vm2750_vm14, %v1751_v43, -1e+30 }
 0x2cd   : > { %v1811_v50 = vmax.f32 %v3128_v17, %v1795_v48  ;;  %v1110_v48 = vpop.f32.mrf.mxu3 }
 0x2ce   : > { %v1435_v52 = vpop.permute.xlu2 %1434 }
 0x2cf   : > { %v1482_v58 = vsel %vm2726_vm8, %v1435_v52, -1e+30 }
 0x2d0   : > { %v3226_v45 = vmax.f32 %v1482_v58, %v1497_v44 }
 0x2d2   : > { %2422 = vset.pattern.permute.xlu2 %v2487_v20  ;;  %2423 = vset.pattern.permute.xlu1 %v2490_v37 }
 0x2d3   : > { %2442 = vset.pattern.permute.xlu0 %v2492_v1  ;;  %1346 = vperm.xlu1 %2423, %v3130_v19   ;;  %v1743_v30 = vpop.permute.xlu1 %1742 }
 0x2d4   : > { %1236 = vperm.xlu2 %2422, %v3130_v19   ;;  %1666 = vperm.xlu0 %2442, %v3212_v55   ;;  %v1793_v17 = vsel %vm2721_vm7, %v1743_v30, -1e+30  ;;  %v1227_v10 = vpop.permute.xlu0 %1226  ;;  %v3290_v30 = vmul.f32 0.35355338, %v1110_v48  ;;  %vm3699_vm7 = vnez %v3684_v26  ;;  %v1701_v26 = vld [vmem:[%s3646_s7 + $0x4] sm:$0x1] }
 0x2d5   : > { %v1809_v57 = vmax.f32 %v1793_v17, %v1811_v50  ;;  %v1276_v59 = vsel %vm2745_vm13, %v1227_v10, -1e+30 }
 0x2d6   : > { %v1292_v60 = vmax.f32 %v3143_v28, %v1276_v59 }
 0x2d8   : > { %v1747_v3 = vpop.permute.xlu2 %1746 }
 0x2d9   : > { %v1794_v4 = vsel %vm2726_vm8, %v1747_v3, -1e+30 }
 0x2da   : > { %v3241_v23 = vmax.f32 %v1794_v4, %v1809_v57 }
 0x2db   : > { %2426 = vset.pattern.permute.xlu1 %v2492_v1 }
 0x2dc   : > { %2425 = vset.pattern.permute.xlu2 %v2489_v36  ;;  %2445 = vset.pattern.permute.xlu0 %v2494_v6 }
 0x2dd   : > { %1658 = vperm.xlu1 %2426, %v3130_v19   ;;  %1554 = vperm.xlu2 %2425, %v3130_v19   ;;  %v1217_v62 = vpop.permute.xlu1 %1216 }
 0x2de   : > { %1978 = vperm.xlu0 %2445, %v3212_v55   ;;  %v1274_v28 = vsel %vm2726_vm8, %v1217_v62, -1e+30  ;;  %v1547_v31 = vpop.permute.xlu0 %1546 }
 0x2df   : > { %v1290_v21 = vmax.f32 %v1274_v28, %v1292_v60  ;;  %v1588_v25 = vsel %vm2745_vm13, %v1547_v31, -1e+30 }
 0x2e0   : > { %v1604_v38 = vmax.f32 %v3161_v54, %v1588_v25 }
 0x2e2   : > { %v1222_v11 = vpop.permute.xlu2 %1221 }
 0x2e3   : > { %v1275_v16 = vsel %vm2750_vm14, %v1222_v11, -1e+30 }
 0x2e4   : > { %v3256_v41 = vmax.f32 %v1275_v16, %v1290_v21 }
 0x2e5   : > { %2429 = vset.pattern.permute.xlu1 %v2494_v6  ;;  %2428 = vset.pattern.permute.xlu2 %v2491_v61 }
 0x2e6   : > { %2448 = vset.pattern.permute.xlu0 %v2493_v2  ;;  %1970 = vperm.xlu1 %2429, %v3130_v19  }
 0x2e7   : > { %1866 = vperm.xlu2 %2428, %v3130_v19   ;;  %1462 = vperm.xlu0 %2448, %v3258_v14   ;;  %v1539_v54 = vpop.permute.xlu1 %1538  ;;  %v1859_v29 = vpop.permute.xlu0 %1858 }
 0x2e8   : > { %v1586_v40 = vsel %vm2726_vm8, %v1539_v54, -1e+30  ;;  %v1900_v39 = vsel %vm2745_vm13, %v1859_v29, -1e+30 }
 0x2e9   : > { %v1602_v46 = vmax.f32 %v1586_v40, %v1604_v38  ;;  %v1916_v24 = vmax.f32 %v3194_v56, %v1900_v39 }
 0x2eb   : > { %v1543_v5 = vpop.permute.xlu2 %1542 }
 0x2ec   : > { %v1587_v32 = vsel %vm2750_vm14, %v1543_v5, -1e+30 }
 0x2ed   : > { %v3273_v33 = vmax.f32 %v1587_v32, %v1602_v46  ;;  %v1113_v46 = vpop.f32.mrf.mxu3 }
 0x2ee   : > { %2432 = vset.pattern.permute.xlu1 %v2493_v2  ;;  %v3338_v32 = vmul.f32 0.35355338, %v1113_v46 }
 0x2ef   : > { %2431 = vset.pattern.permute.xlu2 %v2490_v37  ;;  %2451 = vset.pattern.permute.xlu0 %v2495_v9 }
 0x2f0   : > { %1454 = vperm.xlu1 %2432, %v3163_v42   ;;  %1350 = vperm.xlu2 %2431, %v3163_v42   ;;  %v1851_v19 = vpop.permute.xlu1 %1850 }
 0x2f1   : > { %1774 = vperm.xlu0 %2451, %v3258_v14   ;;  %v1898_v56 = vsel %vm2726_vm8, %v1851_v19, -1e+30  ;;  %v1343_v53 = vpop.permute.xlu0 %1342 }
 0x2f2   : > { %v1914_v51 = vmax.f32 %v1898_v56, %v1916_v24  ;;  %v1381_v43 = vsel %vm3695_vm0, %v1343_v53, -1e+30 }
 0x2f3   : > { %v1397_v44 = vmax.f32 %v3157_v49, %v1381_v43 }
 0x2f5   : > { %v1855_v50 = vpop.permute.xlu2 %1854 }
 0x2f6   : > { %v1899_v52 = vsel %vm2750_vm14, %v1855_v50, -1e+30 }
 0x2f7   : > { %v3288_v58 = vmax.f32 %v1899_v52, %v1914_v51 }
 0x2f8   : > { %2435 = vset.pattern.permute.xlu1 %v2495_v9  ;;  %2434 = vset.pattern.permute.xlu2 %v2492_v1 }
 0x2f9   : > { %2454 = vset.pattern.permute.xlu0 %v2487_v20  ;;  %1766 = vperm.xlu1 %2435, %v3163_v42   ;;  %v1335_v63 = vpop.permute.xlu1 %1334 }
 0x2fa   : > { %1662 = vperm.xlu2 %2434, %v3163_v42   ;;  %1256 = vperm.xlu0 %2454, %v3290_v30   ;;  %v1379_v49 = vsel %vm2750_vm14, %v1335_v63, -1e+30  ;;  %v1655_v17 = vpop.permute.xlu0 %1654 }
 0x2fb   : > { %v1395_v10 = vmax.f32 %v1379_v49, %v1397_v44  ;;  %v1693_v57 = vsel %vm3695_vm0, %v1655_v17, -1e+30 }
 0x2fc   : > { %v1709_v59 = vmax.f32 %v3178_v47, %v1693_v57 }
 0x2fe   : > { %v1339_v60 = vpop.permute.xlu2 %1338 }
 0x2ff   : > { %v1380_v3 = vsel %vm2745_vm13, %v1339_v60, -1e+30 }
 0x300   : > { %v3305_v4 = vmax.f32 %v1380_v3, %v1395_v10  ;;  %v1116_v10 = vpop.f32.mrf.mxu3 }
 0x301   : > { %2438 = vset.pattern.permute.xlu1 %v2487_v20  ;;  %v3370_v60 = vmul.f32 0.35355338, %v1116_v10 }
 0x302   : > { %2437 = vset.pattern.permute.xlu2 %v2494_v6  ;;  %2457 = vset.pattern.permute.xlu0 %v2489_v36 }
 0x303   : > { %1974 = vperm.xlu2 %2437, %v3163_v42   ;;  %1246 = vperm.xlu1 %2438, %v3212_v55   ;;  %v1647_v62 = vpop.permute.xlu1 %1646 }
 0x304   : > { %1570 = vperm.xlu0 %2457, %v3290_v30   ;;  %v1691_v47 = vsel %vm2750_vm14, %v1647_v62, -1e+30  ;;  %v1967_v28 = vpop.permute.xlu0 %1966 }
 0x305   : > { %v1707_v31 = vmax.f32 %v1691_v47, %v1709_v59  ;;  %v2005_v21 = vsel %vm3695_vm0, %v1967_v28, -1e+30 }
 0x306   : > { %v2021_v25 = vmax.f32 %v3209_v12, %v2005_v21 }
 0x308   : > { %v1651_v38 = vpop.permute.xlu2 %1650 }
 0x309   : > { %v1692_v0 = vsel %vm2745_vm13, %v1651_v38, -1e+30 }
 0x30a   : > { %v3320_v42 = vmax.f32 %v1692_v0, %v1707_v31 }
 0x30b   : > { %2440 = vset.pattern.permute.xlu2 %v2493_v2  ;;  %2441 = vset.pattern.permute.xlu1 %v2489_v36 }
 0x30c   : > { %2460 = vset.pattern.permute.xlu0 %v2491_v61  ;;  %1458 = vperm.xlu2 %2440, %v3212_v55   ;;  %v1959_v11 = vpop.permute.xlu1 %1958 }
 0x30d   : > { %1562 = vperm.xlu1 %2441, %v3212_v55   ;;  %1882 = vperm.xlu0 %2460, %v3290_v30   ;;  %v2003_v12 = vsel %vm2750_vm14, %v1959_v11, -1e+30  ;;  %v1451_v16 = vpop.permute.xlu0 %1450 }
 0x30e   : > { %v2019_v54 = vmax.f32 %v2003_v12, %v2021_v25  ;;  %v1486_v29 = vsel %vm3696_vm1, %v1451_v16, -1e+30 }
 0x30f   : > { %v1502_v40 = vmax.f32 %v3226_v45, %v1486_v29 }
 0x311   : > { %v1963_v39 = vpop.permute.xlu2 %1962 }
 0x312   : > { %v2004_v24 = vsel %vm2745_vm13, %v1963_v39, -1e+30 }
 0x313   : > { %v3335_v5 = vmax.f32 %v2004_v24, %v2019_v54 }
 0x314   : > { %2443 = vset.pattern.permute.xlu2 %v2495_v9 }
 0x315   : > { %2444 = vset.pattern.permute.xlu1 %v2491_v61  ;;  %2462 = vset.pattern.permute.xlu0 %v2490_v37 }
 0x316   : > { %1770 = vperm.xlu2 %2443, %v3212_v55   ;;  %1874 = vperm.xlu1 %2444, %v3212_v55   ;;  %v1443_v8 = vpop.permute.xlu1 %1442 }
 0x317   : > { %1366 = vperm.xlu0 %2462, %v3338_v32   ;;  %v1484_v45 = vsel %vm2745_vm13, %v1443_v8, -1e+30  ;;  %v1763_v19 = vpop.permute.xlu0 %1762 }
 0x318   : > { %v1500_v56 = vmax.f32 %v1484_v45, %v1502_v40  ;;  %v1798_v53 = vsel %vm3696_vm1, %v1763_v19, -1e+30 }
 0x319   : > { %v1814_v51 = vmax.f32 %v3241_v23, %v1798_v53 }
 0x31a   : > { %v1447_v43 = vpop.permute.xlu2 %1446 }
 0x31b   : > { %v1485_v44 = vsel %vm3695_vm0, %v1447_v43, -1e+30 }
 0x31c   : > { %v3352_v48 = vmax.f32 %v1485_v44, %v1500_v56 }
 0x31e   : > { %2446 = vset.pattern.permute.xlu2 %v2487_v20  ;;  %2447 = vset.pattern.permute.xlu1 %v2490_v37 }
 0x31f   : > { %2465 = vset.pattern.permute.xlu0 %v2492_v1  ;;  %1358 = vperm.xlu1 %2447, %v3258_v14   ;;  %v1755_v55 = vpop.permute.xlu1 %1754 }
 0x320   : > { %1251 = vperm.xlu2 %2446, %v3258_v14   ;;  %1678 = vperm.xlu0 %2465, %v3338_v32   ;;  %v1796_v23 = vsel %vm2745_vm13, %v1755_v55, -1e+30  ;;  %v1242_v50 = vpop.permute.xlu0 %1241 }
 0x321   : > { %v1812_v52 = vmax.f32 %v1796_v23, %v1814_v51  ;;  %v1279_v63 = vsel %vm2790_vm9, %v1242_v50, -1e+30 }
 0x322   : > { %v1295_v49 = vmax.f32 %v3256_v41, %v1279_v63 }
 0x324   : > { %v1759_v17 = vpop.permute.xlu2 %1758 }
 0x325   : > { %v1797_v57 = vsel %vm3695_vm0, %v1759_v17, -1e+30 }
 0x326   : > { %v3367_v59 = vmax.f32 %v1797_v57, %v1812_v52 }
 0x327   : > { %2450 = vset.pattern.permute.xlu1 %v2492_v1 }
 0x328   : > { %2449 = vset.pattern.permute.xlu2 %v2489_v36  ;;  %2470 = vset.pattern.permute.xlu0 %v2493_v2 }
 0x329   : > { %1670 = vperm.xlu1 %2450, %v3258_v14   ;;  %1566 = vperm.xlu2 %2449, %v3258_v14   ;;  %v1232_v7 = vpop.permute.xlu1 %1231 }
 0x32a   : > { %1474 = vperm.xlu0 %2470, %v3370_v60   ;;  %v1277_v41 = vsel %vm3695_vm0, %v1232_v7, -1e+30  ;;  %v1559_v3 = vpop.permute.xlu0 %1558 }
 0x32b   : > { %v1293_v62 = vmax.f32 %v1277_v41, %v1295_v49  ;;  %v1591_v47 = vsel %vm2790_vm9, %v1559_v3, -1e+30 }
 0x32c   : > { %v1607_v28 = vmax.f32 %v3273_v33, %v1591_v47 }
 0x32e   : > { %v1237_v31 = vpop.permute.xlu2 %1236 }
 0x32f   : > { %v1278_v21 = vsel %vm3696_vm1, %v1237_v31, -1e+30 }
 0x330   : > { %v3384_v25 = vmax.f32 %v1278_v21, %v1293_v62 }
 0x331   : > { %2453 = vset.pattern.permute.xlu1 %v2494_v6  ;;  %2452 = vset.pattern.permute.xlu2 %v2491_v61 }
 0x332   : > { %2473 = vset.pattern.permute.xlu0 %v2495_v9  ;;  %1982 = vperm.xlu1 %2453, %v3258_v14  }
 0x333   : > { %1878 = vperm.xlu2 %2452, %v3258_v14   ;;  %1786 = vperm.xlu0 %2473, %v3370_v60   ;;  %v1551_v38 = vpop.permute.xlu1 %1550  ;;  %v1871_v33 = vpop.permute.xlu0 %1870 }
 0x334   : > { %v1589_v0 = vsel %vm3695_vm0, %v1551_v38, -1e+30  ;;  %v1903_v11 = vsel %vm2790_vm9, %v1871_v33, -1e+30 }
 0x335   : > { %v1605_v12 = vmax.f32 %v1589_v0, %v1607_v28  ;;  %v1919_v16 = vmax.f32 %v3288_v58, %v1903_v11 }
 0x337   : > { %v1555_v54 = vpop.permute.xlu2 %1554 }
 0x338   : > { %v1590_v29 = vsel %vm3696_vm1, %v1555_v54, -1e+30 }
 0x339   : > { %v3399_v40 = vmax.f32 %v1590_v29, %v1605_v12 }
 0x33a   : > { %2456 = vset.pattern.permute.xlu1 %v2493_v2 }
 0x33b   : > { %2455 = vset.pattern.permute.xlu2 %v2490_v37  ;;  %2476 = vset.pattern.permute.xlu0 %v2494_v6 }
 0x33c   : > { %1466 = vperm.xlu1 %2456, %v3290_v30   ;;  %1362 = vperm.xlu2 %2455, %v3290_v30   ;;  %v1863_v14 = vpop.permute.xlu1 %1862 }
 0x33d   : > { %1990 = vperm.xlu0 %2476, %v3338_v32   ;;  %v1901_v58 = vsel %vm3695_vm0, %v1863_v14, -1e+30  ;;  %v1355_v39 = vpop.permute.xlu0 %1354 }
 0x33e   : > { %v1917_v46 = vmax.f32 %v1901_v58, %v1919_v16  ;;  %v1384_v24 = vsel %vm3697_vm4, %v1355_v39, -1e+30 }
 0x33f   : > { %v1400_v8 = vmax.f32 %v3305_v4, %v1384_v24 }
 0x341   : > { %v1867_v45 = vpop.permute.xlu2 %1866 }
 0x342   : > { %v1902_v19 = vsel %vm3696_vm1, %v1867_v45, -1e+30 }
 0x343   : > { %v3414_v56 = vmax.f32 %v1902_v19, %v1917_v46 }
 0x344   : > { %2459 = vset.pattern.permute.xlu1 %v2495_v9  ;;  %2458 = vset.pattern.permute.xlu2 %v2492_v1 }
 0x345   : > { %1778 = vperm.xlu1 %2459, %v3290_v30   ;;  %1674 = vperm.xlu2 %2458, %v3290_v30   ;;  %v1347_v15 = vpop.permute.xlu1 %1346 }
 0x346   : > { %v1382_v53 = vsel %vm3696_vm1, %v1347_v15, -1e+30  ;;  %v1667_v51 = vpop.permute.xlu0 %1666 }
 0x347   : > { %v1398_v4 = vmax.f32 %v1382_v53, %v1400_v8  ;;  %v1696_v43 = vsel %vm3697_vm4, %v1667_v51, -1e+30 }
 0x348   : > { %v1712_v44 = vmax.f32 %v3320_v42, %v1696_v43 }
 0x34a   : > { %v1351_v55 = vpop.permute.xlu2 %1350 }
 0x34b   : > { %v1383_v23 = vsel %vm2790_vm9, %v1351_v55, -1e+30 }
 0x34c   : > { %v1399_v50 = vmax.f32 %v1383_v23, %v1398_v4 }
 0x34d   : > { %2461 = vset.pattern.permute.xlu1 %v2487_v20  ;;  %2463 = vset.pattern.permute.xlu2 %v2493_v2 }
 0x34e   : > { %1470 = vperm.xlu2 %2463, %v3338_v32   ;;  %1261 = vperm.xlu1 %2461, %v3338_v32  }
 0x34f   : > { %v1659_v52 = vpop.permute.xlu1 %1658 }
 0x350   : > { %v1694_v63 = vsel %vm3696_vm1, %v1659_v52, -1e+30  ;;  %v1979_v49 = vpop.permute.xlu0 %1978 }
 0x351   : > { %v1710_v17 = vmax.f32 %v1694_v63, %v1712_v44  ;;  %v2008_v42 = vsel %vm3697_vm4, %v1979_v49, -1e+30 }
 0x352   : > { %v2022_v10 = vmax.f32 %v2008_v42, %v3335_v5 }
 0x354   : > { %v1663_v57 = vpop.permute.xlu2 %1662 }
 0x355   : > { %v1695_v7 = vsel %vm2790_vm9, %v1663_v57, -1e+30 }
 0x356   : > { %2466 = vset.pattern.permute.xlu2 %v2495_v9  ;;  %2464 = vset.pattern.permute.xlu1 %v2489_v36  ;;  %v1711_v2 = vmax.f32 %v1695_v7, %v1710_v17 }
 0x357   : > { %1782 = vperm.xlu2 %2466, %v3338_v32   ;;  %1574 = vperm.xlu1 %2464, %v3338_v32  }
 0x358   : > { %v1971_v41 = vpop.permute.xlu1 %1970 }
 0x359   : > { %v2006_v3 = vsel %vm3696_vm1, %v1971_v41, -1e+30  ;;  %v1463_v62 = vpop.permute.xlu0 %1462 }
 0x35a   : > { %v2024_v47 = vmax.f32 %v2006_v3, %v2022_v10  ;;  %v1489_v15 = vsel %vm3698_vm5, %v1463_v62, -1e+30 }
 0x35b   : > { %v1505_v51 = vmax.f32 %v3352_v48, %v1489_v15 }
 0x35d   : > { %v1975_v5 = vpop.permute.xlu2 %1974 }
 0x35e   : > { %v2007_v28 = vsel %vm2790_vm9, %v1975_v5, -1e+30 }
 0x35f   : > { %2468 = vset.pattern.permute.xlu2 %v2487_v20  ;;  %2467 = vset.pattern.permute.xlu1 %v2491_v61  ;;  %v2023_v9 = vmax.f32 %v2007_v28, %v2024_v47 }
 0x360   : > { %1886 = vperm.xlu1 %2467, %v3338_v32   ;;  %1266 = vperm.xlu2 %2468, %v3370_v60  }
 0x362   : > { %v1455_v31 = vpop.permute.xlu1 %1454 }
 0x363   : > { %v1775_v21 = vpop.permute.xlu0 %1774  ;;  %v1487_v53 = vsel %vm2790_vm9, %v1455_v31, -1e+30 }
 0x364   : > { %v1504_v55 = vmax.f32 %v1487_v53, %v1505_v51  ;;  %v1801_v49 = vsel %vm3698_vm5, %v1775_v21, -1e+30 }
 0x365   : > { %v1817_v57 = vmax.f32 %v3367_v59, %v1801_v49 }
 0x366   : > { %v1459_v38 = vpop.permute.xlu2 %1458 }
 0x368   : > { %2469 = vset.pattern.permute.xlu1 %v2490_v37  ;;  %2471 = vset.pattern.permute.xlu2 %v2489_v36 }
 0x369   : > { %1370 = vperm.xlu1 %2469, %v3370_v60   ;;  %1578 = vperm.xlu2 %2471, %v3370_v60  }
 0x36b   : > { %v1767_v13 = vpop.permute.xlu1 %1766 }
 0x36c   : > { %v3454_v20 = vpop.permute.xlu0 %1256  ;;  %v1799_v42 = vsel %vm2790_vm9, %v1767_v13, -1e+30 }
 0x36d   : > { %v1816_v41 = vmax.f32 %v1799_v42, %v1817_v57  ;;  %v1805_v57 = vld [vmem:[%s3646_s7 + $0x5] sm:$0x1] }
 0x370   : > { %v1771_v33 = vpop.permute.xlu2 %1770 }
 0x371   : > { %2472 = vset.pattern.permute.xlu1 %v2492_v1  ;;  %2474 = vset.pattern.permute.xlu2 %v2491_v61  ;;  %v1800_v47 = vsel %vm3697_vm4, %v1771_v33, -1e+30 }
 0x372   : > { %1682 = vperm.xlu1 %2472, %v3370_v60   ;;  %1890 = vperm.xlu2 %2474, %v3370_v60   ;;  %v1819_v31 = vmax.f32 %v1816_v41, %v1800_v47 }
 0x375   : > { %v3460_v32 = vpop.permute.xlu1 %1246 }
 0x376   : > { %v3462_v37 = vpop.permute.xlu0 %1570  ;;  %v1280_v33 = vsel %vm3697_vm4, %v3460_v32, -1e+30  ;;  %v1493_v32 = vld [vmem:[%s3646_s7 + $0x2] sm:$0x1] }
 0x37a   : > { %2477 = vset.pattern.permute.xlu1 %v2494_v6  ;;  %2475 = vset.pattern.permute.xlu2 %v2494_v6  ;;  %v3466_v36 = vpop.permute.xlu2 %1251 }
 0x37b   : > { %1994 = vperm.xlu1 %2477, %v3370_v60   ;;  %1986 = vperm.xlu2 %2475, %v3290_v30  }
 0x37f   : > { %v3470_v1 = vpop.permute.xlu1 %1562  ;;  %v3472_v61 = vpop.permute.xlu0 %1882 }
 0x383   : > { %v3474_v0 = vpop.permute.xlu2 %1566 }
 0x388   : > { %v3476_v11 = vpop.permute.xlu1 %1874 }
 0x389   : > { %v1367_v12 = vpop.permute.xlu0 %1366 }
 0x38a   : > { %v1387_v6 = vsel %vm2851_vm15, %v1367_v12, -1e+30 }
 0x38b   : > { %v1402_v54 = vmax.f32 %v1387_v6, %v1399_v50  ;;  %v1488_v50 = vsel %vm3697_vm4, %v1459_v38, -1e+30  ;;  %v1282_v38 = vsel %vm3699_vm7, %v3454_v20, -1e+30  ;;  %v1281_v20 = vsel %vm3698_vm5, %v3466_v36, -1e+30 }
 0x38c   : > { %v1507_v17 = vmax.f32 %v1504_v55, %v1488_v50  ;;  %v1592_v36 = vsel %vm3697_vm4, %v3470_v1, -1e+30  ;;  %v1593_v1 = vsel %vm3698_vm5, %v3474_v0, -1e+30  ;;  %v1904_v0 = vsel %vm3697_vm4, %v3476_v11, -1e+30 }
 0x38d   : > { %v3478_v16 = vpop.permute.xlu2 %1878  ;;  %v1285_v11 = vld [vmem:[%s3646_s7] sm:$0x1] }
 0x38e   : > { %v1905_v22 = vsel %vm3698_vm5, %v3478_v16, -1e+30 }
 0x391   : > { %v1359_v29 = vpop.permute.xlu1 %1358 }
 0x392   : > { %v1385_v60 = vsel %vm3698_vm5, %v1359_v29, -1e+30  ;;  %v1679_v14 = vpop.permute.xlu0 %1678  ;;  %v1298_v29 = vmax.f32 %v3384_v25, %v1282_v38 }
 0x393   : > { %v3484_v30 = vmax.f32 %v1385_v60, %v1402_v54  ;;  %v1699_v39 = vsel %vm2851_vm15, %v1679_v14, -1e+30 }
 0x394   : > { %v1714_v46 = vmax.f32 %v1699_v39, %v1711_v2 }
 0x396   : > { %v3486_v58 = vpop.permute.xlu2 %1362 }
 0x39b   : > { %v1671_v24 = vpop.permute.xlu1 %1670 }
 0x39c   : > { %v1697_v8 = vsel %vm3698_vm5, %v1671_v24, -1e+30  ;;  %v1475_v43 = vpop.permute.xlu0 %1474 }
 0x39d   : > { %v3492_v45 = vmax.f32 %v1697_v8, %v1714_v46  ;;  %v1492_v63 = vsel %vm2844_vm3, %v1475_v43, -1e+30  ;;  %v1297_v46 = vmax.f32 %v1280_v33, %v1298_v29 }
 0x39e   : > { %v1503_v10 = vmax.f32 %v1492_v63, %v1507_v17 }
 0x39f   : > { %v3494_v19 = vpop.permute.xlu2 %1674  ;;  %v1296_v43 = vmax.f32 %v1281_v20, %v1297_v46 }
 0x3a4   : > { %v1983_v4 = vpop.permute.xlu1 %1982 }
 0x3a5   : > { %v2009_v44 = vsel %vm3698_vm5, %v1983_v4, -1e+30  ;;  %v1787_v3 = vpop.permute.xlu0 %1786  ;;  %v1594_v4 = vsel %vm3699_vm7, %v3462_v37, -1e+30 }
 0x3a6   : > { %v3503_v23 = vmax.f32 %v2009_v44, %v2023_v9  ;;  %v1804_v9 = vsel %vm2844_vm3, %v1787_v3, -1e+30  ;;  %v1610_v63 = vmax.f32 %v3399_v40, %v1594_v4  ;;  %v1906_v3 = vsel %vm3699_vm7, %v3472_v61, -1e+30 }
 0x3a7   : > { %v1815_v13 = vmax.f32 %v1804_v9, %v1819_v31 }
 0x3a8   : > { %v1471_v52 = vpop.permute.xlu2 %1470 }
 0x3a9   : > { %v1491_v48 = vsel %vm2851_vm15, %v1471_v52, -1e+30 }
 0x3aa   : > { %v1506_v7 = vmax.f32 %v1491_v48, %v1503_v10  ;;  %v1609_v48 = vmax.f32 %v1592_v36, %v1610_v63 }
 0x3ae   : > { %v1467_v2 = vpop.permute.xlu1 %1466 }
 0x3af   : > { %v1490_v62 = vsel %vm3699_vm7, %v1467_v2, -1e+30 }
 0x3b0   : > { %v1508_v5 = vmax.f32 %v1506_v7, %v1490_v62  ;;  %v1608_v62 = vmax.f32 %v1593_v1, %v1609_v48 }
 0x3b1   : > { %v1783_v28 = vpop.permute.xlu2 %1782 }
 0x3b2   : > { %v1509_v18 = vrot.slane %v1508_v5, 4  ;;  %v1803_v59 = vsel %vm2851_vm15, %v1783_v28, -1e+30 }
 0x3b3   : > { %v1818_v6 = vmax.f32 %v1803_v59, %v1815_v13 }
 0x3b4   : > { %v1510_v21 = vmax.f32 %v1508_v5, %v1509_v18  ;;  %v1922_v18 = vmax.f32 %v3414_v56, %v1906_v3 }
 0x3b6   : > { %v1511_v12 = vrot.slane %v1510_v21, 2  ;;  %v1921_v59 = vmax.f32 %v1904_v0, %v1922_v18 }
 0x3b7   : > { %v1779_v54 = vpop.permute.xlu1 %1778 }
 0x3b8   : > { %v1512_v60 = vmax.f32 %v1510_v21, %v1511_v12  ;;  %v1802_v14 = vsel %vm3699_vm7, %v1779_v54, -1e+30  ;;  %v1920_v54 = vmax.f32 %v1905_v22, %v1921_v59 }
 0x3b9   : > { %v1820_v39 = vmax.f32 %v1818_v6, %v1802_v14 }
 0x3ba   : > { %v1513_v24 = vrot.slane %v1512_v60, 1  ;;  %v1267_v8 = vpop.permute.xlu2 %1266 }
 0x3bb   : > { %v1821_v15 = vrot.slane %v1820_v39, 4  ;;  %v1284_v25 = vsel %vm2844_vm3, %v1267_v8, -1e+30  ;;  %v1597_v8 = vld [vmem:[%s3646_s7 + $0x3] sm:$0x1] }
 0x3bc   : > { %v1514_v53 = vmax.f32 %v1512_v60, %v1513_v24  ;;  %v1299_v50 = vmax.f32 %v1296_v43, %v1284_v25 }
 0x3bd   : > { %v1822_v51 = vmax.f32 %v1820_v39, %v1821_v15  ;;  %v1386_v15 = vsel %vm3699_vm7, %v3486_v58, -1e+30  ;;  %v1909_v58 = vld [vmem:[%s3646_s7 + $0x6] sm:$0x1] }
 0x3be   : > { %v1515_v44 = vmax.f32 %v1493_v32, %v1514_v53  ;;  %v1403_v4 = vmax.f32 %v1386_v15, %v3484_v30  ;;  %v1698_v30 = vsel %vm3699_vm7, %v3494_v19, -1e+30 }
 0x3bf   : > { %v1823_v55 = vrot.slane %v1822_v51, 2 }
 0x3c0   : > { %1516 = vst [vmem:[%s3646_s7 + $0x2] sm:$0x1] %v1515_v44  ;;  %v1262_v52 = vpop.permute.xlu1 %1261 }
 0x3c1   : > { %v1824_v49 = vmax.f32 %v1822_v51, %v1823_v55  ;;  %v1283_v17 = vsel %vm2851_vm15, %v1262_v52, -1e+30 }
 0x3c2   : > { %v1300_v37 = vmax.f32 %v1283_v17, %v1299_v50  ;;  %v1184_v50 = vpop.f32.mrf.mxu1 }
 0x3c3   : > { %v1825_v42 = vrot.slane %v1824_v49, 1  ;;  %v1579_v10 = vpop.permute.xlu2 %1578  ;;  %v1187_v63 = vmul.f32 0.35355338, %v1184_v50 }
 0x3c4   : > { %v1301_v7 = vrot.slane %v1300_v37, 4  ;;  %v1596_v40 = vsel %vm2844_vm3, %v1579_v10, -1e+30  ;;  %v1715_v10 = vmax.f32 %v1698_v30, %v3492_v45  ;;  %v1389_v45 = vld [vmem:[%s3646_s7 + $0x1] sm:$0x1] }
 0x3c5   : > { %v1826_v2 = vmax.f32 %v1824_v49, %v1825_v42  ;;  %v1611_v28 = vmax.f32 %v1608_v62, %v1596_v40  ;;  %1188 = vst [vmem:[%s2610_s22] sm:$0xff] %v1187_v63 }
 0x3c6   : > { %v1302_v41 = vmax.f32 %v1300_v37, %v1301_v7 }
 0x3c7   : > { %v1827_v47 = vmax.f32 %v1805_v57, %v1826_v2  ;;  %v1991_v57 = vpop.permute.xlu0 %1990 }
 0x3c8   : > { %v1303_v5 = vrot.slane %v1302_v41, 2  ;;  %v2011_v19 = vsel %vm2851_vm15, %v1991_v57, -1e+30 }
 0x3c9   : > { %1828 = vst [vmem:[%s3646_s7 + $0x5] sm:$0x1] %v1827_v47  ;;  %v1575_v9 = vpop.permute.xlu1 %1574 }
 0x3ca   : > { %v1304_v31 = vmax.f32 %v1302_v41, %v1303_v5  ;;  %v1595_v21 = vsel %vm2851_vm15, %v1575_v9, -1e+30 }
 0x3cb   : > { %v1612_v61 = vmax.f32 %v1595_v21, %v1611_v28  ;;  %v2025_v28 = vmax.f32 %v2011_v19, %v3503_v23 }
 0x3cc   : > { %v1305_v38 = vrot.slane %v1304_v31, 1  ;;  %v1891_v13 = vpop.permute.xlu2 %1890 }
 0x3cd   : > { %v1613_v12 = vrot.slane %v1612_v61, 4  ;;  %v1908_v56 = vsel %vm2844_vm3, %v1891_v13, -1e+30 }
 0x3ce   : > { %v1306_v33 = vmax.f32 %v1304_v31, %v1305_v38  ;;  %v1923_v14 = vmax.f32 %v1920_v54, %v1908_v56 }
 0x3cf   : > { %v1614_v6 = vmax.f32 %v1612_v61, %v1613_v12 }
 0x3d0   : > { %v1307_v29 = vmax.f32 %v1285_v11, %v1306_v33 }
 0x3d1   : > { %v1615_v60 = vrot.slane %v1614_v6, 2 }
 0x3d2   : > { %1308 = vst [vmem:[%s3646_s7] sm:$0x1] %v1307_v29  ;;  %v1887_v27 = vpop.permute.xlu1 %1886 }
 0x3d3   : > { %v1616_v16 = vmax.f32 %v1614_v6, %v1615_v60  ;;  %v1907_v39 = vsel %vm2851_vm15, %v1887_v27, -1e+30 }
 0x3d4   : > { %v1924_v46 = vmax.f32 %v1907_v39, %v1923_v14 }
 0x3d5   : > { %v1617_v24 = vrot.slane %v1616_v16, 1  ;;  %v1987_v40 = vpop.permute.xlu2 %1986 }
 0x3d6   : > { %v1925_v20 = vrot.slane %v1924_v46, 4  ;;  %v2010_v5 = vsel %vm3699_vm7, %v1987_v40, -1e+30 }
 0x3d7   : > { %v1618_v32 = vmax.f32 %v1616_v16, %v1617_v24  ;;  %v2027_v31 = vmax.f32 %v2010_v5, %v2025_v28 }
 0x3d8   : > { %v1926_v53 = vmax.f32 %v1924_v46, %v1925_v20 }
 0x3d9   : > { %v1619_v51 = vmax.f32 %v1597_v8, %v1618_v32 }
 0x3da   : > { %v1927_v25 = vrot.slane %v1926_v53, 2 }
 0x3db   : > { %1620 = vst [vmem:[%s3646_s7 + $0x3] sm:$0x1] %v1619_v51  ;;  %v1371_v43 = vpop.permute.xlu1 %1370 }
 0x3dc   : > { %v1928_v44 = vmax.f32 %v1926_v53, %v1927_v25  ;;  %v1388_v55 = vsel %vm2844_vm3, %v1371_v43, -1e+30 }
 0x3dd   : > { %v1404_v36 = vmax.f32 %v1388_v55, %v1403_v4 }
 0x3de   : > { %v1929_v52 = vrot.slane %v1928_v44, 1 }
 0x3df   : > { %v1405_v49 = vrot.slane %v1404_v36, 4 }
 0x3e0   : > { %v1930_v17 = vmax.f32 %v1928_v44, %v1929_v52 }
 0x3e1   : > { %v1406_v37 = vmax.f32 %v1404_v36, %v1405_v49 }
 0x3e2   : > { %v1931_v48 = vmax.f32 %v1909_v58, %v1930_v17 }
 0x3e3   : > { %v1407_v42 = vrot.slane %v1406_v37, 2 }
 0x3e4   : > { %1932 = vst [vmem:[%s3646_s7 + $0x6] sm:$0x1] %v1931_v48  ;;  %v1683_v1 = vpop.permute.xlu1 %1682 }
 0x3e5   : > { %v1408_v7 = vmax.f32 %v1406_v37, %v1407_v42  ;;  %v1700_v2 = vsel %vm2844_vm3, %v1683_v1, -1e+30 }
 0x3e6   : > { %v1716_v41 = vmax.f32 %v1700_v2, %v1715_v10 }
 0x3e7   : > { %v1409_v3 = vrot.slane %v1408_v7, 1 }
 0x3e8   : > { %v1717_v62 = vrot.slane %v1716_v41, 4 }
 0x3e9   : > { %v1410_v47 = vmax.f32 %v1408_v7, %v1409_v3 }
 0x3ea   : > { %v1718_v0 = vmax.f32 %v1716_v41, %v1717_v62 }
 0x3eb   : > { %v1411_v9 = vmax.f32 %v1389_v45, %v1410_v47 }
 0x3ec   : > { %v1719_v18 = vrot.slane %v1718_v0, 2 }
 0x3ed   : > { %1412 = vst [vmem:[%s3646_s7 + $0x1] sm:$0x1] %v1411_v9  ;;  %v1995_v35 = vpop.permute.xlu1 %1994 }
 0x3ee   : > { %v1720_v21 = vmax.f32 %v1718_v0, %v1719_v18  ;;  %v2012_v61 = vsel %vm2844_vm3, %v1995_v35, -1e+30 }
 0x3ef   : > { %v2028_v59 = vmax.f32 %v2012_v61, %v2027_v31 }
 0x3f0   : > { %v1721_v38 = vrot.slane %v1720_v21, 1 }
 0x3f1   : > { %v2029_v13 = vrot.slane %v2028_v59, 4 }
 0x3f2   : > { %v1722_v23 = vmax.f32 %v1720_v21, %v1721_v38 }
 0x3f3   : > { %v2030_v22 = vmax.f32 %v2028_v59, %v2029_v13 }
 0x3f4   : > { %v1723_v11 = vmax.f32 %v1701_v26, %v1722_v23 }
 0x3f5   : > { %v2031_v12 = vrot.slane %v2030_v22, 2 }
 0x3f6   : > { %1724 = vst [vmem:[%s3646_s7 + $0x4] sm:$0x1] %v1723_v11 }
 0x3f7   : > { %v2032_v33 = vmax.f32 %v2030_v22, %v2031_v12 }
 0x3f9   : > { %v2033_v6 = vrot.slane %v2032_v33, 1 }
 0x3fb   : > { %v2034_v56 = vmax.f32 %v2032_v33, %v2033_v6 }
 0x3fd   : > { %v2035_v54 = vmax.f32 %v2013_v34, %v2034_v56 }
 0x3ff   : > { %2036 = vst [vmem:[%s3646_s7 + $0x7] sm:$0x1] %v2035_v54 }
 0x400 PF: > { %s18_s24 = sadd.s32 1, %s2484_s24  }
 0x401   : > { %p15_p7 = scmp.ge.s32.totalorder %s18_s24, 4  }
 0x403   :  { %17 = sbr.rel (!%p15_p7) target bundleno = 1 (0x1), region = 134 }

</bundles_post_ra>
